<compile_context>
chip_gen: v7x
topology: tpu7x:2x2x1
jax: 0.10.0
libtpu: 0.0.40
codegen_flags: <defaults>
</compile_context>

<pallas_src>
import jax
import jax.numpy as jnp
from jax.experimental import pallas as pl
from jax.experimental.pallas import tpu as pltpu


def _round_up(x, m):
    return ((x + m - 1) // m) * m


def _spectral_mix_kernel(xr_ref, xi_ref, wr_ref, wd_ref, ws_ref, or_ref, oi_ref):
    # xr/xi: (TM, Bp, Cinp)   wr/wd/ws: (TM, Cinp, Coutp)   out: (TM, Bp, Coutp)
    ar = xr_ref[...]
    ai = xi_ref[...]
    # Karatsuba complex product; Cin contracted on the MXU, mode = batch dim.
    k1 = jnp.einsum('mbc,mcd->mbd', ar + ai, wr_ref[...],
                    preferred_element_type=jnp.float32)
    k2 = jnp.einsum('mbc,mcd->mbd', ar, wd_ref[...],
                    preferred_element_type=jnp.float32)
    k3 = jnp.einsum('mbc,mcd->mbd', ai, ws_ref[...],
                    preferred_element_type=jnp.float32)
    or_ref[...] = k1 - k3   # = ar*wr - ai*wi
    oi_ref[...] = k1 + k2   # = ai*wr + ar*wi


def spectral_mix_pallas(xr, xi, wr, wd, ws, tile_m):
    """xr, xi: (MTp, Bp, Cinp) f32; wr, wd, ws: (MTp, Cinp, Coutp) f32.
    Returns (out_r, out_i): (MTp, Bp, Coutp) f32."""
    MTp, Bp, Cinp = xr.shape
    Coutp = wr.shape[-1]
    grid = (MTp // tile_m,)
    x_spec = pl.BlockSpec((tile_m, Bp, Cinp), lambda i: (i, 0, 0))
    w_spec = pl.BlockSpec((tile_m, Cinp, Coutp), lambda i: (i, 0, 0))
    o_spec = pl.BlockSpec((tile_m, Bp, Coutp), lambda i: (i, 0, 0))
    return pl.pallas_call(
        _spectral_mix_kernel,
        out_shape=(jax.ShapeDtypeStruct((MTp, Bp, Coutp), jnp.float32),
                   jax.ShapeDtypeStruct((MTp, Bp, Coutp), jnp.float32)),
        grid=grid,
        in_specs=[x_spec, x_spec, w_spec, w_spec, w_spec],
        out_specs=(o_spec, o_spec),
        compiler_params=pltpu.CompilerParams(
            dimension_semantics=("parallel",),     # independent mode tiles
            vmem_limit_bytes=32 * 1024 * 1024),
    )(xr, xi, wr, wd, ws)


class SpectralConv2d:
    def __init__(self, in_channels, out_channels, modes, key):
        self.in_channels = in_channels
        self.out_channels = out_channels
        self.modes1 = modes
        self.modes2 = modes
        scale = 1.0 / (in_channels * out_channels)
        k1, k2 = jax.random.split(key)
        # torch.rand -> uniform[0, 1); shape (Cout, Cin, m1, m2, 2)
        self.weights1 = scale * jax.random.uniform(
            k1, (out_channels, in_channels, modes, modes, 2), dtype=jnp.float32)
        self.weights2 = scale * jax.random.uniform(
            k2, (out_channels, in_channels, modes, modes, 2), dtype=jnp.float32)

        # ---- hoisted, Pallas-friendly weight layout (done once, not per fwd) --
        m_total = 2 * modes * modes                   # flattened (region, t, q)
        self._m_total = m_total
        self._cin_p = _round_up(in_channels, 8)       # sublane dim of w blocks
        self._cout_p = _round_up(out_channels, 128)   # lane-dense output stores
        self._b_align = 8                             # sublane dim of x/out

        # Mode-tile size: keep double-buffered weight blocks well under the
        # scoped-VMEM budget on every generation (v7x: 64 MiB physical).
        per_mode_bytes = 4 * (3 * self._cin_p * self._cout_p)
        tm = 64
        while tm > 8 and 2 * tm * per_mode_bytes > (8 << 20):
            tm //= 2
        self._tile_m = min(tm, m_total)
        self._mt_p = _round_up(m_total, self._tile_m)

        w = jnp.stack([self.weights1, self.weights2], 0)  # (2,Cout,Cin,m1,m2,2)
        wr = jnp.transpose(w[..., 0], (0, 3, 4, 2, 1)).reshape(
            m_total, in_channels, out_channels)
        wi = jnp.transpose(w[..., 1], (0, 3, 4, 2, 1)).reshape(
            m_total, in_channels, out_channels)
        pad = ((0, self._mt_p - m_total),
               (0, self._cin_p - in_channels),
               (0, self._cout_p - out_channels))
        # Karatsuba weight-side terms, precomputed off the forward critical path.
        self._w_r = jnp.pad(wr, pad).astype(jnp.float32)          # wr
        self._w_d = jnp.pad(wi - wr, pad).astype(jnp.float32)     # wi - wr
        self._w_s = jnp.pad(wr + wi, pad).astype(jnp.float32)     # wr + wi

    def __call__(self, x):
        B, Cin, H, W = x.shape
        m1, m2 = self.modes1, self.modes2
        Cout = self.out_channels
        Wf = W // 2 + 1

        x_ft = jnp.fft.rfft2(x, axes=(-2, -1))          # (B, Cin, H, Wf) c64

        # Retained frequency slabs, flattened to (mode, B, Cin).
        top = x_ft[:, :, :m1, :m2]                      # low-frequency rows
        bot = x_ft[:, :, H - m1:, :m2]                  # negative-frequency rows
        slab = jnp.stack([top, bot], axis=0)            # (2, B, Cin, m1, m2)
        slab = jnp.transpose(slab, (0, 3, 4, 1, 2)).reshape(self._m_total, B, Cin)

        b_p = _round_up(B, self._b_align)
        pad = ((0, self._mt_p - self._m_total),
               (0, b_p - B),
               (0, self._cin_p - Cin))
        xr = jnp.pad(slab.real.astype(jnp.float32), pad)
        xi = jnp.pad(slab.imag.astype(jnp.float32), pad)

        out_r, out_i = spectral_mix_pallas(
            xr, xi, self._w_r, self._w_d, self._w_s, self._tile_m)

        # Un-pad and restore (region, B, Cout, m1, m2).
        out_c = jax.lax.complex(out_r, out_i)[:self._m_total, :B, :Cout]
        out_c = out_c.reshape(2, m1, m2, B, Cout)
        out_c = jnp.transpose(out_c, (0, 3, 4, 1, 2))   # (2, B, Cout, m1, m2)

        # Assemble the output spectrum with pad/concat (no zeros + scatter).
        col_pad = ((0, 0), (0, 0), (0, 0), (0, Wf - m2))
        top_rows = jnp.pad(out_c[0], col_pad)           # (B, Cout, m1, Wf)
        bot_rows = jnp.pad(out_c[1], col_pad)           # (B, Cout, m1, Wf)
        if H >= 2 * m1:
            mid = jnp.zeros((B, Cout, H - 2 * m1, Wf), dtype=out_c.dtype)
            out_ft = jnp.concatenate([top_rows, mid, bot_rows], axis=2)
        else:
            # Overlapping slabs (H < 2*m1): preserve PyTorch "second write wins".
            out_ft = jnp.zeros((B, Cout, H, Wf), dtype=out_c.dtype)
            out_ft = out_ft.at[:, :, :m1, :m2].set(out_c[0])
            out_ft = out_ft.at[:, :, H - m1:, :m2].set(out_c[1])

        return jnp.fft.irfft2(out_ft, s=(H, W), axes=(-2, -1))   # (B, Cout, H, W)


def _reference_forward(x, w1, w2, modes):
    """Pure-JAX reference mirroring the PyTorch module."""
    B, Cin, H, W = x.shape
    Cout = w1.shape[0]
    x_ft = jnp.fft.rfft2(x, axes=(-2, -1))

    def cmul(a, b):  # a: (B,Cin,t,q) complex, b: (Cout,Cin,t,q,2)
        bw = b[..., 0] + 1j * b[..., 1]
        return jnp.einsum('bctq,dctq->bdtq', a, bw)

    out_ft = jnp.zeros((B, Cout, H, W // 2 + 1), dtype=jnp.complex64)
    out_ft = out_ft.at[:, :, :modes, :modes].set(
        cmul(x_ft[:, :, :modes, :modes], w1))
    out_ft = out_ft.at[:, :, H - modes:, :modes].set(
        cmul(x_ft[:, :, H - modes:, :modes], w2))
    return jnp.fft.irfft2(out_ft, s=(H, W), axes=(-2, -1))


if __name__ == "__main__":
    key = jax.random.PRNGKey(0)
    kx, kw = jax.random.split(key)

    B, Cin, Cout, H, W, modes = 2, 4, 4, 16, 16, 8
    x = jax.random.normal(kx, (B, Cin, H, W), dtype=jnp.float32)

    layer = SpectralConv2d(Cin, Cout, modes, kw)
    y = jax.block_until_ready(layer(x))

    y_ref = jax.block_until_ready(
        _reference_forward(x, layer.weights1, layer.weights2, modes))

    assert y.shape == (B, Cout, H, W)
    # Tolerance leaves headroom for MXU f32 matmul pass decomposition.
    assert jnp.allclose(y, y_ref, atol=1e-4, rtol=1e-4), \
        float(jnp.max(jnp.abs(y - y_ref)))

    print("KERNEL_OK")
</pallas_src>

<mosaic_0001>
module attributes {stable_mosaic.version = 11 : i64} {
  func.func @_spectral_mix_kernel(%arg0: i32, %arg1: memref<64x8x8xf32, #tpu.memory_space<vmem>>, %arg2: memref<64x8x8xf32, #tpu.memory_space<vmem>>, %arg3: memref<64x8x128xf32, #tpu.memory_space<vmem>>, %arg4: memref<64x8x128xf32, #tpu.memory_space<vmem>>, %arg5: memref<64x8x128xf32, #tpu.memory_space<vmem>>, %arg6: memref<64x8x128xf32, #tpu.memory_space<vmem>>, %arg7: memref<64x8x128xf32, #tpu.memory_space<vmem>>) attributes {dimension_semantics = [#tpu.dimension_semantics<parallel>], iteration_bounds = array<i64: 2>, scalar_prefetch = 0 : i64, scratch_operands = 0 : i64, tpu.core_type = #tpu.core_type<tc>, window_params = [{transform_indices = @transform_0, window_bounds = array<i64: 64, 8, 8>}, {transform_indices = @transform_1, window_bounds = array<i64: 64, 8, 8>}, {transform_indices = @transform_2, window_bounds = array<i64: 64, 8, 128>}, {transform_indices = @transform_3, window_bounds = array<i64: 64, 8, 128>}, {transform_indices = @transform_4, window_bounds = array<i64: 64, 8, 128>}, {transform_indices = @transform_5, window_bounds = array<i64: 64, 8, 128>}, {transform_indices = @transform_6, window_bounds = array<i64: 64, 8, 128>}]} {
    %c0 = arith.constant 0 : index
    %c0_0 = arith.constant 0 : index
    %c0_1 = arith.constant 0 : index
    %0 = vector.load %arg1[%c0, %c0_0, %c0_1] : memref<64x8x8xf32, #tpu.memory_space<vmem>>, vector<64x8x8xf32>
    %c0_2 = arith.constant 0 : index
    %c0_3 = arith.constant 0 : index
    %c0_4 = arith.constant 0 : index
    %1 = vector.load %arg2[%c0_2, %c0_3, %c0_4] : memref<64x8x8xf32, #tpu.memory_space<vmem>>, vector<64x8x8xf32>
    %2 = arith.addf %0, %1 : vector<64x8x8xf32>
    %c0_5 = arith.constant 0 : index
    %c0_6 = arith.constant 0 : index
    %c0_7 = arith.constant 0 : index
    %3 = vector.load %arg3[%c0_5, %c0_6, %c0_7] : memref<64x8x128xf32, #tpu.memory_space<vmem>>, vector<64x8x128xf32>
    "tpu.trace_start"() <{level = 10 : i32, message = "mbc,mcd->mbd"}> : () -> ()
    %cst = arith.constant dense<0.000000e+00> : vector<64x8x128xf32>
    %4 = tpu.matmul %2, %3, %cst {dimension_numbers = #tpu.dot_dimension_numbers<[2], [1], [1], [2], [0, 0, 0, 1, 1, 2], [0], [0]>} : vector<64x8x8xf32>, vector<64x8x128xf32>, vector<64x8x128xf32> -> vector<64x8x128xf32>
    "tpu.trace_stop"() : () -> ()
    %c0_8 = arith.constant 0 : index
    %c0_9 = arith.constant 0 : index
    %c0_10 = arith.constant 0 : index
    %5 = vector.load %arg4[%c0_8, %c0_9, %c0_10] : memref<64x8x128xf32, #tpu.memory_space<vmem>>, vector<64x8x128xf32>
    "tpu.trace_start"() <{level = 10 : i32, message = "mbc,mcd->mbd"}> : () -> ()
    %cst_11 = arith.constant dense<0.000000e+00> : vector<64x8x128xf32>
    %6 = tpu.matmul %0, %5, %cst_11 {dimension_numbers = #tpu.dot_dimension_numbers<[2], [1], [1], [2], [0, 0, 0, 1, 1, 2], [0], [0]>} : vector<64x8x8xf32>, vector<64x8x128xf32>, vector<64x8x128xf32> -> vector<64x8x128xf32>
    "tpu.trace_stop"() : () -> ()
    %c0_12 = arith.constant 0 : index
    %c0_13 = arith.constant 0 : index
    %c0_14 = arith.constant 0 : index
    %7 = vector.load %arg5[%c0_12, %c0_13, %c0_14] : memref<64x8x128xf32, #tpu.memory_space<vmem>>, vector<64x8x128xf32>
    "tpu.trace_start"() <{level = 10 : i32, message = "mbc,mcd->mbd"}> : () -> ()
    %cst_15 = arith.constant dense<0.000000e+00> : vector<64x8x128xf32>
    %8 = tpu.matmul %1, %7, %cst_15 {dimension_numbers = #tpu.dot_dimension_numbers<[2], [1], [1], [2], [0, 0, 0, 1, 1, 2], [0], [0]>} : vector<64x8x8xf32>, vector<64x8x128xf32>, vector<64x8x128xf32> -> vector<64x8x128xf32>
    "tpu.trace_stop"() : () -> ()
    %9 = arith.subf %4, %8 : vector<64x8x128xf32>
    %c0_16 = arith.constant 0 : index
    %c0_17 = arith.constant 0 : index
    %c0_18 = arith.constant 0 : index
    %10 = vector.load %arg6[%c0_16, %c0_17, %c0_18] : memref<64x8x128xf32, #tpu.memory_space<vmem>>, vector<64x8x128xf32>
    tpu.vector_store %arg6[%c0_16, %c0_17, %c0_18], %9 {strides = array<i32>} : memref<64x8x128xf32, #tpu.memory_space<vmem>>, vector<64x8x128xf32>,
    %11 = arith.addf %4, %6 : vector<64x8x128xf32>
    %c0_19 = arith.constant 0 : index
    %c0_20 = arith.constant 0 : index
    %c0_21 = arith.constant 0 : index
    %12 = vector.load %arg7[%c0_19, %c0_20, %c0_21] : memref<64x8x128xf32, #tpu.memory_space<vmem>>, vector<64x8x128xf32>
    tpu.vector_store %arg7[%c0_19, %c0_20, %c0_21], %11 {strides = array<i32>} : memref<64x8x128xf32, #tpu.memory_space<vmem>>, vector<64x8x128xf32>,
    return
  }
  func.func @transform_0(%arg0: i32) -> (i32, i32, i32) {
    %c0_i32 = arith.constant 0 : i32
    %c0_i32_0 = arith.constant 0 : i32
    %c0_i32_1 = arith.constant 0 : i32
    return %arg0, %c0_i32, %c0_i32_0 : i32, i32, i32
  }
  func.func @transform_1(%arg0: i32) -> (i32, i32, i32) {
    %c0_i32 = arith.constant 0 : i32
    %c0_i32_0 = arith.constant 0 : i32
    %c0_i32_1 = arith.constant 0 : i32
    return %arg0, %c0_i32, %c0_i32_0 : i32, i32, i32
  }
  func.func @transform_2(%arg0: i32) -> (i32, i32, i32) {
    %c0_i32 = arith.constant 0 : i32
    %c0_i32_0 = arith.constant 0 : i32
    %c0_i32_1 = arith.constant 0 : i32
    return %arg0, %c0_i32, %c0_i32_0 : i32, i32, i32
  }
  func.func @transform_3(%arg0: i32) -> (i32, i32, i32) {
    %c0_i32 = arith.constant 0 : i32
    %c0_i32_0 = arith.constant 0 : i32
    %c0_i32_1 = arith.constant 0 : i32
    return %arg0, %c0_i32, %c0_i32_0 : i32, i32, i32
  }
  func.func @transform_4(%arg0: i32) -> (i32, i32, i32) {
    %c0_i32 = arith.constant 0 : i32
    %c0_i32_0 = arith.constant 0 : i32
    %c0_i32_1 = arith.constant 0 : i32
    return %arg0, %c0_i32, %c0_i32_0 : i32, i32, i32
  }
  func.func @transform_5(%arg0: i32) -> (i32, i32, i32) {
    %c0_i32 = arith.constant 0 : i32
    %c0_i32_0 = arith.constant 0 : i32
    %c0_i32_1 = arith.constant 0 : i32
    return %arg0, %c0_i32, %c0_i32_0 : i32, i32, i32
  }
  func.func @transform_6(%arg0: i32) -> (i32, i32, i32) {
    %c0_i32 = arith.constant 0 : i32
    %c0_i32_0 = arith.constant 0 : i32
    %c0_i32_1 = arith.constant 0 : i32
    return %arg0, %c0_i32, %c0_i32_0 : i32, i32, i32
  }
}

</mosaic_0001>

<bundles_post_ra>
// kernel: tpu_custom_call.1
= control target key start
LH: loop header
LB: loop body
LE: loop exit
PB: predicated region body
PF: predicated region fallthrough
CT: control target
= control target key end

     0   :  { %12 = vsyncpa [#allocation3], 0  ;;  %s19098_s0 = inlined_call_operand.vmem [shape: f32[128,8,8], index: 0, kind: input, shape index: {}]   ;;  %s19099_s1 = inlined_call_operand.vmem [shape: f32[128,8,8], index: 1, kind: input, shape index: {}]   ;;  %s19100_s2 = inlined_call_operand.vmem [shape: f32[128,8,128], index: 2, kind: input, shape index: {}]   ;;  %s19101_s3 = inlined_call_operand.vmem [shape: f32[128,8,128], index: 3, kind: input, shape index: {}]   ;;  %s19102_s4 = inlined_call_operand.hbm [shape: f32[128,8,128], index: 4, kind: input, shape index: {}]   ;;  %s19103_s5 = inlined_call_operand.hbm [shape: f32[128,8,128], index: 5, kind: output, shape index: {0}]   ;;  %s19104_s6 = inlined_call_operand.hbm [shape: f32[128,8,128], index: 6, kind: output, shape index: {1}]  }
   0x1   :  { %14 = vsyncpa [#allocation3 + $0x1], 0 }
   0x2   :  { %15 = vsyncpa [#allocation4], 0 }
   0x3   :  { %17 = vsyncpa [#allocation4 + $0x1], 0 }
   0x4   :  { %18 = vsyncpa [#allocation7], 0 }
   0x5   :  { %20 = vsyncpa [#allocation7 + $0x1], 0  ;;  %s17084_s21 = smov 0   ;;  %s17086_s22 = smov 0  }
   0x6   :  { %s17088_s23 = smov 0   ;;  %s17090_s24 = smov 0  }
   0x7 LB: > { %s17105_s25 = sadd.s32 4294967295, %s17038_s24   ;;  %s15217_s26 = sadd.s32 4294967294, %s17038_s24   ;;  %s17038_s24 = sphi %s17090_s24, %s19184_s24   ;;  %s17034_s23 = sphi %s17088_s23, %s19183_s23   ;;  %s17030_s22 = sphi %s17086_s22, %s19182_s22   ;;  %s17026_s21 = sphi %s17084_s21, %s19181_s21  }
   0x8   : > { %s17109_s27 = sadd.s32 1, %s17038_s24   ;;  %s137_s28 = sadd.s32 1, %s17034_s23 }
   0x9   : > { %s134_s29 = ssub.s32 %s17038_s24, %s17109_s27  ;;  %p144_p0 = scmp.ne.s32.totalorder %s17034_s23, %s17030_s22 }
   0xa   : > { %p135_p1 = scmp.eq.s32.totalorder %s134_s29, 0  ;;  %p145_p2 = scmp.eq.s32.totalorder %s17038_s24, 0 }
   0xb   : > { %p150_p3 = scmp.ne.s32.totalorder %s17030_s22, %s17026_s21  ;;  %p151_p4 = scmp.eq.s32.totalorder %s17105_s25, 0 }
   0xc   : > { %s17121_s30 = scalar_select %p135_p1, %s17034_s23, %s137_s28  }
   0xd   : > { %p17123_p5 = por %p145_p2, %p144_p0  ;;  %p17127_p6 = por %p151_p4, %p150_p3 }
   0xe   : > { %p174_p7 = scmp.eq.s32.totalorder %s17105_s25, 1  ;;  %p180_p8 = scmp.eq.s32.totalorder %s15217_s26, 1 }
   0xf   : > { %p16799_p10 = scmp.lt.s32.totalorder %s17038_s24, 2  ;;  %s262_s11 = sand.u32 1, %s17034_s23  }
  0x10   : > { %p17134_p11 = por %p174_p7, %p144_p0  ;;  %p17138_p12 = por %p180_p8, %p150_p3 }
  0x11   : > { %s15435_s12 = sshll.u32 %s17038_s24, 13  ;;  %s15220_s13 = sshll.u32 %s262_s11, 9 }
  0x12   : > { %s19128_s9 = scalar_select %p17134_p11, 1, 0 }
  0x13   : > { %s19129_s10 = scalar_select %p17138_p12, 1, 0 }
  0x14   : > { %s17147_s16 = scalar_lea.hbm %s19102_s4, %s15435_s12  ;;  %s266_s17 = scalar_lea.vmem [#allocation2], %s15220_s13 }
  0x15   : > { %s273_s18 = sshll.u32 %s266_s17, 4  ;;  %p17151_p13 = pnand %p16799_p10, %p17123_p5  ;;  %s17155_s18 = int_to_ptr.vmem [resolvable:$true] %s273_s18 }
  0x16   : > { %s17157_s20 = scalar_lea.sflag [#allocation3], %s262_s11  ;;  %s16910_s26 = scalar_lea.hbm %s17147_s16, 8192 }
  0x17   : > { %p16911_p0 = scmp.ne.s32.totalorder %s17147_s16, %s16910_s26  ;;  %p16912_p1 = pneg %p17151_p13 }
  0x18   : > { %s16915_s7 = scalar_lea.hbm %s19102_s4, 16384  ;;  %p16916_p4 = scmp.lt.u32.totalorder %s17147_s16, %s19102_s4 }
  0x19   : > { %p16913_p2 = pnand %p16912_p1, %p16911_p0  ;;  %p16917_p5 = scmp.lt.u32.totalorder %s16915_s7, %s16910_s26 }
  0x1a   : > { %p16919_p8 = scmp.lt.u32.totalorder %s16910_s26, %s17147_s16 }
  0x1b   : > { %p16914_p3 = pneg %p16913_p2  ;;  %p16918_p7 = por %p16917_p5, %p16916_p4 }
  0x1d   : > { %p16920_p10 = por %p16919_p8, %p16918_p7 }
  0x1f   : > { %p16921_p9 = pnand %p16920_p10, %p16914_p3 }
  0x21   : > { %16924 = shalt.err (!%p16921_p9)
}
  0x22   : > { %s16925_s11 = scalar_lea.vmem %s17155_s18, 8192  ;;  %s17040_s14 = smov [#allocation2]  }
  0x23   : > { %p16926_p0 = scmp.ne.s32.totalorder %s17155_s18, %s16925_s11  ;;  %s16930_s15 = sshll.u32 %s17040_s14, 4  ;;  %s16931_s15 = int_to_ptr.vmem [resolvable:$false] %s16930_s15 }
  0x24   : > { %s16932_s17 = scalar_lea.vmem %s16931_s15, 16384  ;;  %p16933_p11 = scmp.lt.s32.totalorder %s17155_s18, %s16931_s15 }
  0x25   : > { %p16928_p2 = pnand %p16926_p0, %p16912_p1  ;;  %p16934_p4 = scmp.lt.s32.totalorder %s16932_s17, %s16925_s11 }
  0x27   : > { %p16929_p12 = pneg %p16928_p2  ;;  %p16935_p5 = por %p16934_p4, %p16933_p11 }
  0x29   : > { %p16936_p7 = pnand %p16935_p5, %p16929_p12 }
  0x2b   : > { %16939 = shalt.err (!%p16936_p7)
}
  0x2c   : > { %s17041_s26 = smov 128   ;;  %s17042_s28 = smov 8  }
  0x2d   : > { %16791 = dma.hbm_to_vmem [thread:$0]  (!%p17151_p13), %s17147_s16, 8192, %s17155_s18, %s17157_s20, %s17041_s26, %s17041_s26, %s17042_s28  }
  0x2e   : > { %p15223_p9 = scmp.ge.s32.totalorder %s17038_s24, 1  ;;  %p281_p1 = scmp.lt.s32.totalorder %s17038_s24, 3 }
  0x30   : > { %p282_p3 = pnand %p15223_p9, %p281_p1 }
  0x32   : > { %285 = sbr.rel (%p282_p3) target bundleno = 680 (0x2a8), region = 40 }
  0x39   : > { %s17188_s29 = sand.u32 1, %s17030_s22  }
  0x3a   : > { %s17191_s7 = sshll.u32 %s17188_s29, 9  ;;  %s288_s12 = scalar_lea.sflag [#allocation3], %s17188_s29 }
  0x3b   : > { %s17195_s13 = scalar_lea.vmem [#allocation2], %s17191_s7 }
  0x3c   : > { %17013 = dma.done.wait (%p17127_p6), %s288_s12, 8192  }
  0x3d   : > { %17015 = vsyncadd (%p17127_p6), %s288_s12, 4294959104  ;;  %s15227_s16 = sshll.u32 %s17105_s25, 6  ;;  %v17043_v0 = vmov 0.0   ;;  %vm17044_vm0 = vmmov 0   ;;  %vm628_vm1 = vcmask 64512   ;;  %s15035_s17 = scalar_lea.sflag [#allocation7], %s17188_s29 }
  0x3e   : > { %15822 = vmatprep.subr.mxu0 %v17043_v0  ;;  %15827 = vmatprep.subr.mxu1 %v17043_v0  ;;  %p346_p11 = scmp.lt.s32.totalorder %s15227_s16, 127  ;;  %p19166_p12 = scmp.ne.s32.totalorder %s19128_s9, 0 }
  0x3f   : > { %15824 = vmatprep.mubr.msk.f32.mxu0 %vm17044_vm0, %v17043_v0  ;;  %15829 = vmatprep.mubr.msk.f32.mxu1 %vm17044_vm0, %v17043_v0 }
  0x40   : > { %s19186_s16 = smov (!%p346_p11, %s15227_s16), 127 }
  0x41   : > { %s17208_s18 = sshll.u32 %s19186_s16, 3 }
  0x42   : > { %s17214_s20 = scalar_lea.vmem %s19100_s2, %s17208_s18  ;;  %s17220_s15 = scalar_lea.vmem %s19098_s0, %s17208_s18 }
  0x43   : > { %v564_v1 = vld [vmem:[%s17214_s20] sm:$0xff]  ;;  %v565_v2 = vld [vmem:[%s17214_s20 + $0x8] sm:$0xff]  ;;  %s17228_s28 = scalar_lea.vmem %s19099_s1, %s17208_s18  ;;  %v566_v9 = vld [vmem:[%s17214_s20 + $0x10] sm:$0xff]  ;;  %s17835_s8 = scalar_lea.vmem %s19101_s3, %s17208_s18 }
  0x44   : > { %v372_v3 = vld [vmem:[%s17220_s15] sm:$0xff]  ;;  %15823 = vmatpush3.msra.mxu0 %v564_v1  ;;  %15828 = vmatpush3.msra.mxu1 %v565_v2  ;;  %v373_v5 = vld [vmem:[%s17220_s15 + $0x8] sm:$0xff]  ;;  %v567_v10 = vld [vmem:[%s17214_s20 + $0x18] sm:$0xff]  ;;  %s18630_s18 = scalar_lea.vmem [#allocation6], %s17191_s7 }
  0x45   : > { %v436_v4 = vld [vmem:[%s17228_s28] sm:$0xff]  ;;  %v437_v6 = vld [vmem:[%s17228_s28 + $0x8] sm:$0xff]  ;;  %15832 = vmatprep.subr.mxu0 %v17043_v0  ;;  %15837 = vmatprep.subr.mxu1 %v17043_v0  ;;  %v374_v11 = vld [vmem:[%s17220_s15 + $0x10] sm:$0xff]  ;;  %s15064_s14 = sshll.u32 %s18630_s18, 4  ;;  %s18890_s14 = int_to_ptr.vmem [resolvable:$true] %s15064_s14 }
  0x46   : > { %v500_v7 = vadd.f32 %v436_v4, %v372_v3  ;;  %v501_v8 = vadd.f32 %v437_v6, %v373_v5  ;;  %v438_v12 = vld [vmem:[%s17228_s28 + $0x10] sm:$0xff]  ;;  %v375_v13 = vld [vmem:[%s17220_s15 + $0x18] sm:$0xff]  ;;  %v376_v17 = vld [vmem:[%s17220_s15 + $0x20] sm:$0xff]  ;;  %s16940_s26 = scalar_lea.vmem %s18890_s14, 8192 }
  0x47   : > { %v439_v14 = vld [vmem:[%s17228_s28 + $0x18] sm:$0xff]  ;;  %v502_v15 = vadd.f32 %v438_v12, %v374_v11  ;;  %v440_v18 = vld [vmem:[%s17228_s28 + $0x20] sm:$0xff]  ;;  %v377_v19 = vld [vmem:[%s17220_s15 + $0x28] sm:$0xff]  ;;  %p16941_p6 = scmp.ne.s32.totalorder %s18890_s14, %s16940_s26 }
  0x48   : > { %15825 = vmatmul.mubr.msk.f32.vlgmr.msra.gmra.mrb[0].mxu0 %vm628_vm1, %v500_v7  ;;  %15830 = vmatmul.mubr.msk.f32.vlgmr.msra.gmra.mrb[0].mxu1 %vm628_vm1, %v501_v8  ;;  %v503_v16 = vadd.f32 %v439_v14, %v375_v13  ;;  %v441_v20 = vld [vmem:[%s17228_s28 + $0x28] sm:$0xff]  ;;  %v568_v21 = vld [vmem:[%s17214_s20 + $0x20] sm:$0xff]  ;;  %v504_v23 = vadd.f32 %v440_v18, %v376_v17  ;;  %v378_v25 = vld [vmem:[%s17220_s15 + $0x30] sm:$0xff] }
  0x49   : > { %15833 = vmatpush3.msra.mxu0 %v566_v9  ;;  %15838 = vmatpush3.msra.mxu1 %v567_v10  ;;  %v569_v22 = vld [vmem:[%s17214_s20 + $0x28] sm:$0xff]  ;;  %v505_v24 = vadd.f32 %v441_v20, %v377_v19  ;;  %v442_v26 = vld [vmem:[%s17228_s28 + $0x30] sm:$0xff]  ;;  %v17261_v27 = vld [vmem:[%s17220_s15 + $0x38] sm:$0xff]  ;;  %p16942_p13 = pnand %p16941_p6, %p19166_p12 }
  0x4a   : > { %15834 = vmatprep.mubr.msk.f32.mxu0 %vm17044_vm0, %v17043_v0  ;;  %15839 = vmatprep.mubr.msk.f32.mxu1 %vm17044_vm0, %v17043_v0  ;;  %v443_v28 = vld [vmem:[%s17228_s28 + $0x38] sm:$0xff]  ;;  %v570_v29 = vld [vmem:[%s17214_s20 + $0x30] sm:$0xff]  ;;  %v506_v31 = vadd.f32 %v442_v26, %v378_v25  ;;  %v17276_v33 = vld [vmem:[%s17220_s15 + $0x40] sm:$0xff] }
  0x4b   : > { %15842 = vmatprep.subr.mxu0 %v17043_v0  ;;  %15847 = vmatprep.subr.mxu1 %v17043_v0  ;;  %v571_v30 = vld [vmem:[%s17214_s20 + $0x38] sm:$0xff]  ;;  %v507_v32 = vadd.f32 %v443_v28, %v17261_v27  ;;  %v444_v34 = vld [vmem:[%s17228_s28 + $0x40] sm:$0xff]  ;;  %v17280_v35 = vld [vmem:[%s17220_s15 + $0x48] sm:$0xff]  ;;  %p16943_p8 = pneg %p16942_p13 }
  0x4c   : > { %15835 = vmatmul.mubr.msk.f32.vlgmr.msra.gmra.mrb[2].mxu0 %vm628_vm1, %v502_v15  ;;  %15840 = vmatmul.mubr.msk.f32.vlgmr.msra.gmra.mrb[2].mxu1 %vm628_vm1, %v503_v16  ;;  %v445_v36 = vld [vmem:[%s17228_s28 + $0x48] sm:$0xff]  ;;  %v572_v37 = vld [vmem:[%s17214_s20 + $0x40] sm:$0xff]  ;;  %v508_v39 = vadd.f32 %v444_v34, %v17276_v33  ;;  %v17296_v41 = vld [vmem:[%s17220_s15 + $0x50] sm:$0xff] }
  0x4d   : > { %15843 = vmatpush3.msra.mxu0 %v568_v21  ;;  %15848 = vmatpush3.msra.mxu1 %v569_v22  ;;  %v573_v38 = vld [vmem:[%s17214_s20 + $0x48] sm:$0xff]  ;;  %v509_v40 = vadd.f32 %v445_v36, %v17280_v35  ;;  %v446_v42 = vld [vmem:[%s17228_s28 + $0x50] sm:$0xff]  ;;  %v17300_v43 = vld [vmem:[%s17220_s15 + $0x58] sm:$0xff] }
  0x4e   : > { %15844 = vmatprep.mubr.msk.f32.mxu0 %vm17044_vm0, %v17043_v0  ;;  %15849 = vmatprep.mubr.msk.f32.mxu1 %vm17044_vm0, %v17043_v0  ;;  %v447_v44 = vld [vmem:[%s17228_s28 + $0x58] sm:$0xff]  ;;  %v574_v45 = vld [vmem:[%s17214_s20 + $0x50] sm:$0xff]  ;;  %v510_v47 = vadd.f32 %v446_v42, %v17296_v41  ;;  %v17316_v49 = vld [vmem:[%s17220_s15 + $0x60] sm:$0xff] }
  0x4f   : > { %15852 = vmatprep.subr.mxu0 %v17043_v0  ;;  %15857 = vmatprep.subr.mxu1 %v17043_v0  ;;  %v575_v46 = vld [vmem:[%s17214_s20 + $0x58] sm:$0xff]  ;;  %v511_v48 = vadd.f32 %v447_v44, %v17300_v43  ;;  %v448_v50 = vld [vmem:[%s17228_s28 + $0x60] sm:$0xff]  ;;  %v17320_v51 = vld [vmem:[%s17220_s15 + $0x68] sm:$0xff] }
  0x50   : > { %15845 = vmatmul.mubr.msk.f32.vlgmr.msra.gmra.mrb[4].mxu0 %vm628_vm1, %v504_v23  ;;  %15850 = vmatmul.mubr.msk.f32.vlgmr.msra.gmra.mrb[4].mxu1 %vm628_vm1, %v505_v24  ;;  %v449_v52 = vld [vmem:[%s17228_s28 + $0x68] sm:$0xff]  ;;  %v576_v53 = vld [vmem:[%s17214_s20 + $0x60] sm:$0xff]  ;;  %v512_v55 = vadd.f32 %v448_v50, %v17316_v49  ;;  %v17336_v57 = vld [vmem:[%s17220_s15 + $0x70] sm:$0xff] }
  0x51   : > { %15853 = vmatpush3.msra.mxu0 %v570_v29  ;;  %15858 = vmatpush3.msra.mxu1 %v571_v30  ;;  %v577_v54 = vld [vmem:[%s17214_s20 + $0x68] sm:$0xff]  ;;  %v513_v56 = vadd.f32 %v449_v52, %v17320_v51  ;;  %v450_v58 = vld [vmem:[%s17228_s28 + $0x70] sm:$0xff]  ;;  %v17340_v59 = vld [vmem:[%s17220_s15 + $0x78] sm:$0xff] }
  0x52   : > { %15854 = vmatprep.mubr.msk.f32.mxu0 %vm17044_vm0, %v17043_v0  ;;  %15859 = vmatprep.mubr.msk.f32.mxu1 %vm17044_vm0, %v17043_v0  ;;  %v451_v60 = vld [vmem:[%s17228_s28 + $0x78] sm:$0xff]  ;;  %v578_v61 = vld [vmem:[%s17214_s20 + $0x70] sm:$0xff]  ;;  %v514_v63 = vadd.f32 %v450_v58, %v17336_v57  ;;  %v17356_v2 = vld [vmem:[%s17220_s15 + $0x80] sm:$0xff] }
  0x53   : > { %15862 = vmatprep.subr.mxu0 %v17043_v0  ;;  %15867 = vmatprep.subr.mxu1 %v17043_v0  ;;  %v579_v62 = vld [vmem:[%s17214_s20 + $0x78] sm:$0xff]  ;;  %v515_v1 = vadd.f32 %v451_v60, %v17340_v59  ;;  %v452_v3 = vld [vmem:[%s17228_s28 + $0x80] sm:$0xff]  ;;  %v17360_v4 = vld [vmem:[%s17220_s15 + $0x88] sm:$0xff] }
  0x54   : > { %15855 = vmatmul.mubr.msk.f32.vlgmr.msra.gmra.mrb[6].mxu0 %vm628_vm1, %v506_v31  ;;  %15860 = vmatmul.mubr.msk.f32.vlgmr.msra.gmra.mrb[6].mxu1 %vm628_vm1, %v507_v32  ;;  %v453_v5 = vld [vmem:[%s17228_s28 + $0x88] sm:$0xff]  ;;  %v580_v6 = vld [vmem:[%s17214_s20 + $0x80] sm:$0xff]  ;;  %v516_v8 = vadd.f32 %v452_v3, %v17356_v2  ;;  %v17376_v10 = vld [vmem:[%s17220_s15 + $0x90] sm:$0xff] }
  0x55   : > { %15863 = vmatpush3.msra.mxu0 %v572_v37  ;;  %15868 = vmatpush3.msra.mxu1 %v573_v38  ;;  %v581_v7 = vld [vmem:[%s17214_s20 + $0x88] sm:$0xff]  ;;  %v517_v9 = vadd.f32 %v453_v5, %v17360_v4  ;;  %v454_v11 = vld [vmem:[%s17228_s28 + $0x90] sm:$0xff]  ;;  %v17380_v12 = vld [vmem:[%s17220_s15 + $0x98] sm:$0xff] }
  0x56   : > { %15864 = vmatprep.mubr.msk.f32.mxu0 %vm17044_vm0, %v17043_v0  ;;  %15869 = vmatprep.mubr.msk.f32.mxu1 %vm17044_vm0, %v17043_v0  ;;  %v455_v13 = vld [vmem:[%s17228_s28 + $0x98] sm:$0xff]  ;;  %v582_v14 = vld [vmem:[%s17214_s20 + $0x90] sm:$0xff]  ;;  %v518_v16 = vadd.f32 %v454_v11, %v17376_v10  ;;  %v17396_v18 = vld [vmem:[%s17220_s15 + $0xa0] sm:$0xff] }
  0x57   : > { %15872 = vmatprep.subr.mxu0 %v17043_v0  ;;  %15877 = vmatprep.subr.mxu1 %v17043_v0  ;;  %v583_v15 = vld [vmem:[%s17214_s20 + $0x98] sm:$0xff]  ;;  %v519_v17 = vadd.f32 %v455_v13, %v17380_v12  ;;  %v456_v19 = vld [vmem:[%s17228_s28 + $0xa0] sm:$0xff]  ;;  %v17400_v20 = vld [vmem:[%s17220_s15 + $0xa8] sm:$0xff] }
  0x58   : > { %15865 = vmatmul.mubr.msk.f32.vlgmr.msra.gmra.mrb[8].mxu0 %vm628_vm1, %v508_v39  ;;  %15870 = vmatmul.mubr.msk.f32.vlgmr.msra.gmra.mrb[8].mxu1 %vm628_vm1, %v509_v40  ;;  %v457_v21 = vld [vmem:[%s17228_s28 + $0xa8] sm:$0xff]  ;;  %v584_v22 = vld [vmem:[%s17214_s20 + $0xa0] sm:$0xff]  ;;  %v520_v24 = vadd.f32 %v456_v19, %v17396_v18  ;;  %v17416_v26 = vld [vmem:[%s17220_s15 + $0xb0] sm:$0xff] }
  0x59   : > { %15873 = vmatpush3.msra.mxu0 %v574_v45  ;;  %15878 = vmatpush3.msra.mxu1 %v575_v46  ;;  %v585_v23 = vld [vmem:[%s17214_s20 + $0xa8] sm:$0xff]  ;;  %v521_v25 = vadd.f32 %v457_v21, %v17400_v20  ;;  %v458_v28 = vld [vmem:[%s17228_s28 + $0xb0] sm:$0xff]  ;;  %v17420_v29 = vld [vmem:[%s17220_s15 + $0xb8] sm:$0xff] }
  0x5a   : > { %15874 = vmatprep.mubr.msk.f32.mxu0 %vm17044_vm0, %v17043_v0  ;;  %15879 = vmatprep.mubr.msk.f32.mxu1 %vm17044_vm0, %v17043_v0  ;;  %v459_v30 = vld [vmem:[%s17228_s28 + $0xb8] sm:$0xff]  ;;  %v586_v31 = vld [vmem:[%s17214_s20 + $0xb0] sm:$0xff]  ;;  %v522_v34 = vadd.f32 %v458_v28, %v17416_v26  ;;  %v17436_v37 = vld [vmem:[%s17220_s15 + $0xc0] sm:$0xff] }
  0x5b   : > { %15882 = vmatprep.subr.mxu0 %v17043_v0  ;;  %15887 = vmatprep.subr.mxu1 %v17043_v0  ;;  %v587_v32 = vld [vmem:[%s17214_s20 + $0xb8] sm:$0xff]  ;;  %v523_v36 = vadd.f32 %v459_v30, %v17420_v29  ;;  %v460_v38 = vld [vmem:[%s17228_s28 + $0xc0] sm:$0xff]  ;;  %v17440_v39 = vld [vmem:[%s17220_s15 + $0xc8] sm:$0xff] }
  0x5c   : > { %15875 = vmatmul.mubr.msk.f32.vlgmr.msra.gmra.mrb[10].mxu0 %vm628_vm1, %v510_v47  ;;  %15880 = vmatmul.mubr.msk.f32.vlgmr.msra.gmra.mrb[10].mxu1 %vm628_vm1, %v511_v48  ;;  %v461_v40 = vld [vmem:[%s17228_s28 + $0xc8] sm:$0xff]  ;;  %v588_v42 = vld [vmem:[%s17214_s20 + $0xc0] sm:$0xff]  ;;  %v524_v45 = vadd.f32 %v460_v38, %v17436_v37  ;;  %v17456_v47 = vld [vmem:[%s17220_s15 + $0xd0] sm:$0xff] }
  0x5d   : > { %15883 = vmatpush3.msra.mxu0 %v576_v53  ;;  %15888 = vmatpush3.msra.mxu1 %v577_v54  ;;  %v589_v44 = vld [vmem:[%s17214_s20 + $0xc8] sm:$0xff]  ;;  %v525_v46 = vadd.f32 %v461_v40, %v17440_v39  ;;  %v462_v48 = vld [vmem:[%s17228_s28 + $0xd0] sm:$0xff]  ;;  %v17460_v50 = vld [vmem:[%s17220_s15 + $0xd8] sm:$0xff] }
  0x5e   : > { %15884 = vmatprep.mubr.msk.f32.mxu0 %vm17044_vm0, %v17043_v0  ;;  %15889 = vmatprep.mubr.msk.f32.mxu1 %vm17044_vm0, %v17043_v0  ;;  %v463_v52 = vld [vmem:[%s17228_s28 + $0xd8] sm:$0xff]  ;;  %v590_v53 = vld [vmem:[%s17214_s20 + $0xd0] sm:$0xff]  ;;  %v17476_v58 = vld [vmem:[%s17220_s15 + $0xe0] sm:$0xff] }
  0x5f   : > { %15892 = vmatprep.subr.mxu0 %v17043_v0  ;;  %15897 = vmatprep.subr.mxu1 %v17043_v0  ;;  %v591_v54 = vld [vmem:[%s17214_s20 + $0xd8] sm:$0xff]  ;;  %v464_v60 = vld [vmem:[%s17228_s28 + $0xe0] sm:$0xff]  ;;  %v594_v11 = vld [vmem:[%s17214_s20 + $0xf0] sm:$0xff] }
  0x60   : > { %15885 = vmatmul.mubr.msk.f32.vlgmr.msra.gmra.mrb[12].mxu0 %vm628_vm1, %v512_v55  ;;  %15890 = vmatmul.mubr.msk.f32.vlgmr.msra.gmra.mrb[12].mxu1 %vm628_vm1, %v513_v56  ;;  %v526_v55 = vadd.f32 %v462_v48, %v17456_v47  ;;  %v527_v56 = vadd.f32 %v463_v52, %v17460_v50  ;;  %v528_v3 = vadd.f32 %v464_v60, %v17476_v58  ;;  %v595_v13 = vld [vmem:[%s17214_s20 + $0xf8] sm:$0xff]  ;;  %v17520_v19 = vld [vmem:[%s17220_s15 + $0x108] sm:$0xff]  ;;  %v17536_v28 = vld [vmem:[%s17220_s15 + $0x110] sm:$0xff] }
  0x61   : > { %15893 = vmatpush3.msra.mxu0 %v578_v61  ;;  %15898 = vmatpush3.msra.mxu1 %v579_v62  ;;  %v17480_v61 = vld [vmem:[%s17220_s15 + $0xe8] sm:$0xff]  ;;  %v470_v30 = vld [vmem:[%s17228_s28 + $0x110] sm:$0xff]  ;;  %v600_v48 = vld [vmem:[%s17214_s20 + $0x120] sm:$0xff] }
  0x62   : > { %15894 = vmatprep.mubr.msk.f32.mxu0 %vm17044_vm0, %v17043_v0  ;;  %15899 = vmatprep.mubr.msk.f32.mxu1 %vm17044_vm0, %v17043_v0  ;;  %v465_v62 = vld [vmem:[%s17228_s28 + $0xe8] sm:$0xff]  ;;  %v534_v38 = vadd.f32 %v470_v30, %v17536_v28  ;;  %v17580_v60 = vld [vmem:[%s17220_s15 + $0x138] sm:$0xff]  ;;  %v606_v30 = vld [vmem:[%s17214_s20 + $0x150] sm:$0xff] }
  0x63   : > { %15902 = vmatprep.subr.mxu0 %v17043_v0  ;;  %15907 = vmatprep.subr.mxu1 %v17043_v0  ;;  %v529_v5 = vadd.f32 %v465_v62, %v17480_v61  ;;  %v469_v21 = vld [vmem:[%s17228_s28 + $0x108] sm:$0xff]  ;;  %v475_v62 = vld [vmem:[%s17228_s28 + $0x138] sm:$0xff] }
  0x64   : > { %15895 = vmatmul.mubr.msk.f32.vlgmr.msra.gmra.mrb[14].mxu0 %vm628_vm1, %v514_v63  ;;  %15900 = vmatmul.mubr.msk.f32.vlgmr.msra.gmra.mrb[14].mxu1 %vm628_vm1, %v515_v1  ;;  %v592_v63 = vld [vmem:[%s17214_s20 + $0xe0] sm:$0xff]  ;;  %v593_v1 = vld [vmem:[%s17214_s20 + $0xe8] sm:$0xff] }
  0x65   : > { %15903 = vmatpush3.msra.mxu0 %v580_v6  ;;  %15908 = vmatpush3.msra.mxu1 %v581_v7  ;;  %v17496_v6 = vld [vmem:[%s17220_s15 + $0xf0] sm:$0xff]  ;;  %v601_v52 = vld [vmem:[%s17214_s20 + $0x128] sm:$0xff] }
  0x66   : > { %15904 = vmatprep.mubr.msk.f32.mxu0 %vm17044_vm0, %v17043_v0  ;;  %15909 = vmatprep.mubr.msk.f32.mxu1 %vm17044_vm0, %v17043_v0  ;;  %v466_v7 = vld [vmem:[%s17228_s28 + $0xf0] sm:$0xff] }
  0x67   : > { %15912 = vmatprep.subr.mxu0 %v17043_v0  ;;  %15917 = vmatprep.subr.mxu1 %v17043_v0 }
  0x68   : > { %15905 = vmatmul.mubr.msk.f32.vlgmr.msra.gmra.mrb[16].mxu0 %vm628_vm1, %v516_v8  ;;  %15910 = vmatmul.mubr.msk.f32.vlgmr.msra.gmra.mrb[16].mxu1 %vm628_vm1, %v517_v9  ;;  %v17500_v8 = vld [vmem:[%s17220_s15 + $0xf8] sm:$0xff] }
  0x69   : > { %15913 = vmatpush3.msra.mxu0 %v582_v14  ;;  %15918 = vmatpush3.msra.mxu1 %v583_v15  ;;  %v467_v9 = vld [vmem:[%s17228_s28 + $0xf8] sm:$0xff]  ;;  %v530_v14 = vadd.f32 %v466_v7, %v17496_v6  ;;  %v17596_v7 = vld [vmem:[%s17220_s15 + $0x140] sm:$0xff] }
  0x6a   : > { %15914 = vmatprep.mubr.msk.f32.mxu0 %vm17044_vm0, %v17043_v0  ;;  %15919 = vmatprep.mubr.msk.f32.mxu1 %vm17044_vm0, %v17043_v0  ;;  %v531_v15 = vadd.f32 %v467_v9, %v17500_v8  ;;  %v476_v9 = vld [vmem:[%s17228_s28 + $0x140] sm:$0xff] }
  0x6b   : > { %15922 = vmatprep.subr.mxu0 %v17043_v0  ;;  %15927 = vmatprep.subr.mxu1 %v17043_v0 }
  0x6c   : > { %15915 = vmatmul.mubr.msk.f32.vlgmr.msra.gmra.mrb[18].mxu0 %vm628_vm1, %v518_v16  ;;  %15920 = vmatmul.mubr.msk.f32.vlgmr.msra.gmra.mrb[18].mxu1 %vm628_vm1, %v519_v17  ;;  %v17516_v16 = vld [vmem:[%s17220_s15 + $0x100] sm:$0xff] }
  0x6d   : > { %15923 = vmatpush3.msra.mxu0 %v584_v22  ;;  %15928 = vmatpush3.msra.mxu1 %v585_v23  ;;  %v468_v17 = vld [vmem:[%s17228_s28 + $0x100] sm:$0xff]  ;;  %v597_v23 = vld [vmem:[%s17214_s20 + $0x108] sm:$0xff] }
  0x6e   : > { %15924 = vmatprep.mubr.msk.f32.mxu0 %vm17044_vm0, %v17043_v0  ;;  %15929 = vmatprep.mubr.msk.f32.mxu1 %vm17044_vm0, %v17043_v0  ;;  %v596_v22 = vld [vmem:[%s17214_s20 + $0x100] sm:$0xff] }
  0x6f   : > { %15932 = vmatprep.subr.mxu0 %v17043_v0  ;;  %15937 = vmatprep.subr.mxu1 %v17043_v0 }
  0x70   : > { %15925 = vmatmul.mubr.msk.f32.vlgmr.msra.gmra.mrb[20].mxu0 %vm628_vm1, %v520_v24  ;;  %15930 = vmatmul.mubr.msk.f32.vlgmr.msra.gmra.mrb[20].mxu1 %vm628_vm1, %v521_v25  ;;  %v532_v24 = vadd.f32 %v468_v17, %v17516_v16  ;;  %v533_v25 = vadd.f32 %v469_v21, %v17520_v19  ;;  %v540_v17 = vadd.f32 %v476_v9, %v17596_v7 }
  0x71   : > { %15933 = vmatpush3.msra.mxu0 %v586_v31  ;;  %15938 = vmatpush3.msra.mxu1 %v587_v32  ;;  %v17540_v31 = vld [vmem:[%s17220_s15 + $0x118] sm:$0xff] }
  0x72   : > { %15934 = vmatprep.mubr.msk.f32.mxu0 %vm17044_vm0, %v17043_v0  ;;  %15939 = vmatprep.mubr.msk.f32.mxu1 %vm17044_vm0, %v17043_v0  ;;  %v471_v32 = vld [vmem:[%s17228_s28 + $0x118] sm:$0xff] }
  0x73   : > { %15942 = vmatprep.subr.mxu0 %v17043_v0  ;;  %15947 = vmatprep.subr.mxu1 %v17043_v0  ;;  %v535_v40 = vadd.f32 %v471_v32, %v17540_v31  ;;  %v607_v32 = vld [vmem:[%s17214_s20 + $0x158] sm:$0xff] }
  0x74   : > { %15935 = vmatmul.mubr.msk.f32.vlgmr.msra.gmra.mrb[22].mxu0 %vm628_vm1, %v522_v34  ;;  %15940 = vmatmul.mubr.msk.f32.vlgmr.msra.gmra.mrb[22].mxu1 %vm628_vm1, %v523_v36  ;;  %v598_v34 = vld [vmem:[%s17214_s20 + $0x110] sm:$0xff]  ;;  %v599_v36 = vld [vmem:[%s17214_s20 + $0x118] sm:$0xff] }
  0x75   : > { %15943 = vmatpush3.msra.mxu0 %v588_v42  ;;  %15948 = vmatpush3.msra.mxu1 %v589_v44  ;;  %v17556_v42 = vld [vmem:[%s17220_s15 + $0x120] sm:$0xff] }
  0x76   : > { %15944 = vmatprep.mubr.msk.f32.mxu0 %vm17044_vm0, %v17043_v0  ;;  %15949 = vmatprep.mubr.msk.f32.mxu1 %vm17044_vm0, %v17043_v0  ;;  %v472_v44 = vld [vmem:[%s17228_s28 + $0x120] sm:$0xff] }
  0x77   : > { %15952 = vmatprep.subr.mxu0 %v17043_v0  ;;  %15957 = vmatprep.subr.mxu1 %v17043_v0 }
  0x78   : > { %15945 = vmatmul.mubr.msk.f32.vlgmr.msra.gmra.mrb[24].mxu0 %vm628_vm1, %v524_v45  ;;  %15950 = vmatmul.mubr.msk.f32.vlgmr.msra.gmra.mrb[24].mxu1 %vm628_vm1, %v525_v46  ;;  %v17560_v45 = vld [vmem:[%s17220_s15 + $0x128] sm:$0xff] }
  0x79   : > { %15953 = vmatpush3.msra.mxu0 %v590_v53  ;;  %15958 = vmatpush3.msra.mxu1 %v591_v54  ;;  %v473_v46 = vld [vmem:[%s17228_s28 + $0x128] sm:$0xff]  ;;  %v536_v53 = vadd.f32 %v472_v44, %v17556_v42 }
  0x7a   : > { %15954 = vmatprep.mubr.msk.f32.mxu0 %vm17044_vm0, %v17043_v0  ;;  %15959 = vmatprep.mubr.msk.f32.mxu1 %vm17044_vm0, %v17043_v0  ;;  %v537_v54 = vadd.f32 %v473_v46, %v17560_v45  ;;  %v17640_v44 = vld [vmem:[%s17220_s15 + $0x168] sm:$0xff] }
  0x7b   : > { %15962 = vmatprep.subr.mxu0 %v17043_v0  ;;  %15967 = vmatprep.subr.mxu1 %v17043_v0  ;;  %v481_v46 = vld [vmem:[%s17228_s28 + $0x168] sm:$0xff] }
  0x7c   : > { %15955 = vmatmul.mubr.msk.f32.vlgmr.msra.gmra.mrb[26].mxu0 %vm628_vm1, %v526_v55  ;;  %15960 = vmatmul.mubr.msk.f32.vlgmr.msra.gmra.mrb[26].mxu1 %vm628_vm1, %v527_v56  ;;  %v17576_v55 = vld [vmem:[%s17220_s15 + $0x130] sm:$0xff] }
  0x7d   : > { %15963 = vmatpush3.msra.mxu0 %v592_v63  ;;  %15968 = vmatpush3.msra.mxu1 %v593_v1  ;;  %v474_v56 = vld [vmem:[%s17228_s28 + $0x130] sm:$0xff]  ;;  %v603_v1 = vld [vmem:[%s17214_s20 + $0x138] sm:$0xff] }
  0x7e   : > { %15964 = vmatprep.mubr.msk.f32.mxu0 %vm17044_vm0, %v17043_v0  ;;  %15969 = vmatprep.mubr.msk.f32.mxu1 %vm17044_vm0, %v17043_v0  ;;  %v602_v63 = vld [vmem:[%s17214_s20 + $0x130] sm:$0xff] }
  0x7f   : > { %15972 = vmatprep.subr.mxu0 %v17043_v0  ;;  %15977 = vmatprep.subr.mxu1 %v17043_v0 }
  0x80   : > { %15965 = vmatmul.mubr.msk.f32.vlgmr.msra.gmra.mrb[28].mxu0 %vm628_vm1, %v528_v3  ;;  %15970 = vmatmul.mubr.msk.f32.vlgmr.msra.gmra.mrb[28].mxu1 %vm628_vm1, %v529_v5  ;;  %v538_v3 = vadd.f32 %v474_v56, %v17576_v55  ;;  %v539_v5 = vadd.f32 %v475_v62, %v17580_v60  ;;  %v17656_v56 = vld [vmem:[%s17220_s15 + $0x170] sm:$0xff] }
  0x81   : > { %15973 = vmatpush3.msra.mxu0 %v594_v11  ;;  %15978 = vmatpush3.msra.mxu1 %v595_v13  ;;  %v17600_v11 = vld [vmem:[%s17220_s15 + $0x148] sm:$0xff]  ;;  %v482_v62 = vld [vmem:[%s17228_s28 + $0x170] sm:$0xff] }
  0x82   : > { %15974 = vmatprep.mubr.msk.f32.mxu0 %vm17044_vm0, %v17043_v0  ;;  %15979 = vmatprep.mubr.msk.f32.mxu1 %vm17044_vm0, %v17043_v0  ;;  %v477_v13 = vld [vmem:[%s17228_s28 + $0x148] sm:$0xff]  ;;  %v546_v9 = vadd.f32 %v482_v62, %v17656_v56  ;;  %v17716_v62 = vld [vmem:[%s17220_s15 + $0x1a0] sm:$0xff] }
  0x83   : > { %15982 = vmatprep.subr.mxu0 %v17043_v0  ;;  %15987 = vmatprep.subr.mxu1 %v17043_v0  ;;  %v541_v21 = vadd.f32 %v477_v13, %v17600_v11 }
  0x84   : > { %15975 = vmatmul.mubr.msk.f32.vlgmr.msra.gmra.mrb[30].mxu0 %vm628_vm1, %v530_v14  ;;  %15980 = vmatmul.mubr.msk.f32.vlgmr.msra.gmra.mrb[30].mxu1 %vm628_vm1, %v531_v15  ;;  %v604_v14 = vld [vmem:[%s17214_s20 + $0x140] sm:$0xff]  ;;  %v605_v15 = vld [vmem:[%s17214_s20 + $0x148] sm:$0xff] }
  0x85   : > { %15983 = vmatpush3.msra.mxu0 %v596_v22  ;;  %15988 = vmatpush3.msra.mxu1 %v597_v23  ;;  %v17616_v22 = vld [vmem:[%s17220_s15 + $0x150] sm:$0xff] }
  0x86   : > { %15984 = vmatprep.mubr.msk.f32.mxu0 %vm17044_vm0, %v17043_v0  ;;  %15989 = vmatprep.mubr.msk.f32.mxu1 %vm17044_vm0, %v17043_v0  ;;  %v478_v23 = vld [vmem:[%s17228_s28 + $0x150] sm:$0xff] }
  0x87   : > { %15992 = vmatprep.subr.mxu0 %v17043_v0  ;;  %15997 = vmatprep.subr.mxu1 %v17043_v0 }
  0x88   : > { %15985 = vmatmul.mubr.msk.f32.vlgmr.msra.gmra.mrb[32].mxu0 %vm628_vm1, %v532_v24  ;;  %15990 = vmatmul.mubr.msk.f32.vlgmr.msra.gmra.mrb[32].mxu1 %vm628_vm1, %v533_v25  ;;  %v17620_v24 = vld [vmem:[%s17220_s15 + $0x158] sm:$0xff] }
  0x89   : > { %15993 = vmatpush3.msra.mxu0 %v598_v34  ;;  %15998 = vmatpush3.msra.mxu1 %v599_v36  ;;  %v479_v25 = vld [vmem:[%s17228_s28 + $0x158] sm:$0xff]  ;;  %v542_v34 = vadd.f32 %v478_v23, %v17616_v22  ;;  %v612_v23 = vld [vmem:[%s17214_s20 + $0x180] sm:$0xff] }
  0x8a   : > { %15994 = vmatprep.mubr.msk.f32.mxu0 %vm17044_vm0, %v17043_v0  ;;  %15999 = vmatprep.mubr.msk.f32.mxu1 %vm17044_vm0, %v17043_v0  ;;  %v543_v36 = vadd.f32 %v479_v25, %v17620_v24  ;;  %v613_v25 = vld [vmem:[%s17214_s20 + $0x188] sm:$0xff] }
  0x8b   : > { %16002 = vmatprep.subr.mxu0 %v17043_v0  ;;  %16007 = vmatprep.subr.mxu1 %v17043_v0 }
  0x8c   : > { %15995 = vmatmul.mubr.msk.f32.vlgmr.msra.gmra.mrb[34].mxu0 %vm628_vm1, %v534_v38  ;;  %16000 = vmatmul.mubr.msk.f32.vlgmr.msra.gmra.mrb[34].mxu1 %vm628_vm1, %v535_v40  ;;  %v17636_v38 = vld [vmem:[%s17220_s15 + $0x160] sm:$0xff] }
  0x8d   : > { %16003 = vmatpush3.msra.mxu0 %v600_v48  ;;  %16008 = vmatpush3.msra.mxu1 %v601_v52  ;;  %v480_v40 = vld [vmem:[%s17228_s28 + $0x160] sm:$0xff]  ;;  %v609_v52 = vld [vmem:[%s17214_s20 + $0x168] sm:$0xff] }
  0x8e   : > { %16004 = vmatprep.mubr.msk.f32.mxu0 %vm17044_vm0, %v17043_v0  ;;  %16009 = vmatprep.mubr.msk.f32.mxu1 %vm17044_vm0, %v17043_v0  ;;  %v608_v48 = vld [vmem:[%s17214_s20 + $0x160] sm:$0xff] }
  0x8f   : > { %16012 = vmatprep.subr.mxu0 %v17043_v0  ;;  %16017 = vmatprep.subr.mxu1 %v17043_v0 }
  0x90   : > { %16005 = vmatmul.mubr.msk.f32.vlgmr.msra.gmra.mrb[36].mxu0 %vm628_vm1, %v536_v53  ;;  %16010 = vmatmul.mubr.msk.f32.vlgmr.msra.gmra.mrb[36].mxu1 %vm628_vm1, %v537_v54  ;;  %v544_v53 = vadd.f32 %v480_v40, %v17636_v38  ;;  %v545_v54 = vadd.f32 %v481_v46, %v17640_v44  ;;  %v17700_v40 = vld [vmem:[%s17220_s15 + $0x198] sm:$0xff] }
  0x91   : > { %16013 = vmatpush3.msra.mxu0 %v602_v63  ;;  %16018 = vmatpush3.msra.mxu1 %v603_v1  ;;  %v17660_v63 = vld [vmem:[%s17220_s15 + $0x178] sm:$0xff] }
  0x92   : > { %16014 = vmatprep.mubr.msk.f32.mxu0 %vm17044_vm0, %v17043_v0  ;;  %16019 = vmatprep.mubr.msk.f32.mxu1 %vm17044_vm0, %v17043_v0  ;;  %v483_v1 = vld [vmem:[%s17228_s28 + $0x178] sm:$0xff] }
  0x93   : > { %16022 = vmatprep.subr.mxu0 %v17043_v0  ;;  %16027 = vmatprep.subr.mxu1 %v17043_v0  ;;  %v547_v13 = vadd.f32 %v483_v1, %v17660_v63  ;;  %v487_v46 = vld [vmem:[%s17228_s28 + $0x198] sm:$0xff]  ;;  %v488_v1 = vld [vmem:[%s17228_s28 + $0x1a0] sm:$0xff] }
  0x94   : > { %16015 = vmatmul.mubr.msk.f32.vlgmr.msra.gmra.mrb[38].mxu0 %vm628_vm1, %v538_v3  ;;  %16020 = vmatmul.mubr.msk.f32.vlgmr.msra.gmra.mrb[38].mxu1 %vm628_vm1, %v539_v5  ;;  %v610_v3 = vld [vmem:[%s17214_s20 + $0x170] sm:$0xff]  ;;  %v611_v5 = vld [vmem:[%s17214_s20 + $0x178] sm:$0xff] }
  0x95   : > { %16023 = vmatpush3.msra.mxu0 %v604_v14  ;;  %16028 = vmatpush3.msra.mxu1 %v605_v15  ;;  %v17676_v14 = vld [vmem:[%s17220_s15 + $0x180] sm:$0xff] }
  0x96   : > { %16024 = vmatprep.mubr.msk.f32.mxu0 %vm17044_vm0, %v17043_v0  ;;  %16029 = vmatprep.mubr.msk.f32.mxu1 %vm17044_vm0, %v17043_v0  ;;  %v484_v15 = vld [vmem:[%s17228_s28 + $0x180] sm:$0xff] }
  0x97   : > { %16032 = vmatprep.subr.mxu0 %v17043_v0  ;;  %16037 = vmatprep.subr.mxu1 %v17043_v0 }
  0x98   : > { %16025 = vmatmul.mubr.msk.f32.vlgmr.msra.gmra.mrb[40].mxu0 %vm628_vm1, %v540_v17  ;;  %16030 = vmatmul.mubr.msk.f32.vlgmr.msra.gmra.mrb[40].mxu1 %vm628_vm1, %v541_v21  ;;  %v17680_v17 = vld [vmem:[%s17220_s15 + $0x188] sm:$0xff] }
  0x99   : > { %16033 = vmatpush3.msra.mxu0 %v606_v30  ;;  %16038 = vmatpush3.msra.mxu1 %v607_v32  ;;  %v485_v21 = vld [vmem:[%s17228_s28 + $0x188] sm:$0xff]  ;;  %v548_v30 = vadd.f32 %v484_v15, %v17676_v14  ;;  %v552_v15 = vadd.f32 %v488_v1, %v17716_v62 }
  0x9a   : > { %16034 = vmatprep.mubr.msk.f32.mxu0 %vm17044_vm0, %v17043_v0  ;;  %16039 = vmatprep.mubr.msk.f32.mxu1 %vm17044_vm0, %v17043_v0  ;;  %v549_v32 = vadd.f32 %v485_v21, %v17680_v17  ;;  %v17760_v1 = vld [vmem:[%s17220_s15 + $0x1c8] sm:$0xff] }
  0x9b   : > { %16042 = vmatprep.subr.mxu0 %v17043_v0  ;;  %16047 = vmatprep.subr.mxu1 %v17043_v0  ;;  %19132 = vst [vmem:[#allocation12_spill] sm:$0xff] %v17760_v1 }
  0x9c   : > { %16035 = vmatmul.mubr.msk.f32.vlgmr.msra.gmra.mrb[42].mxu0 %vm628_vm1, %v542_v34  ;;  %16040 = vmatmul.mubr.msk.f32.vlgmr.msra.gmra.mrb[42].mxu1 %vm628_vm1, %v543_v36  ;;  %v17696_v34 = vld [vmem:[%s17220_s15 + $0x190] sm:$0xff] }
  0x9d   : > { %16043 = vmatpush3.msra.mxu0 %v608_v48  ;;  %16048 = vmatpush3.msra.mxu1 %v609_v52  ;;  %v486_v36 = vld [vmem:[%s17228_s28 + $0x190] sm:$0xff]  ;;  %v615_v52 = vld [vmem:[%s17214_s20 + $0x198] sm:$0xff] }
  0x9e   : > { %16044 = vmatprep.mubr.msk.f32.mxu0 %vm17044_vm0, %v17043_v0  ;;  %16049 = vmatprep.mubr.msk.f32.mxu1 %vm17044_vm0, %v17043_v0  ;;  %v614_v48 = vld [vmem:[%s17214_s20 + $0x190] sm:$0xff] }
  0x9f   : > { %16052 = vmatprep.subr.mxu0 %v17043_v0  ;;  %16057 = vmatprep.subr.mxu1 %v17043_v0 }
  0xa0   : > { %16045 = vmatmul.mubr.msk.f32.vlgmr.msra.gmra.mrb[44].mxu0 %vm628_vm1, %v544_v53  ;;  %16050 = vmatmul.mubr.msk.f32.vlgmr.msra.gmra.mrb[44].mxu1 %vm628_vm1, %v545_v54  ;;  %v550_v53 = vadd.f32 %v486_v36, %v17696_v34  ;;  %v551_v54 = vadd.f32 %v487_v46, %v17700_v40  ;;  %v618_v36 = vld [vmem:[%s17214_s20 + $0x1b0] sm:$0xff]  ;;  %v619_v46 = vld [vmem:[%s17214_s20 + $0x1b8] sm:$0xff] }
  0xa1   : > { %16053 = vmatpush3.msra.mxu0 %v610_v3  ;;  %16058 = vmatpush3.msra.mxu1 %v611_v5  ;;  %v17720_v3 = vld [vmem:[%s17220_s15 + $0x1a8] sm:$0xff] }
  0xa2   : > { %16054 = vmatprep.mubr.msk.f32.mxu0 %vm17044_vm0, %v17043_v0  ;;  %16059 = vmatprep.mubr.msk.f32.mxu1 %vm17044_vm0, %v17043_v0  ;;  %v489_v5 = vld [vmem:[%s17228_s28 + $0x1a8] sm:$0xff] }
  0xa3   : > { %16062 = vmatprep.subr.mxu0 %v17043_v0  ;;  %16067 = vmatprep.subr.mxu1 %v17043_v0  ;;  %v553_v21 = vadd.f32 %v489_v5, %v17720_v3  ;;  %v493_v5 = vld [vmem:[%s17228_s28 + $0x1c8] sm:$0xff] }
  0xa4   : > { %16055 = vmatmul.mubr.msk.f32.vlgmr.msra.gmra.mrb[46].mxu0 %vm628_vm1, %v546_v9  ;;  %16060 = vmatmul.mubr.msk.f32.vlgmr.msra.gmra.mrb[46].mxu1 %vm628_vm1, %v547_v13  ;;  %v616_v9 = vld [vmem:[%s17214_s20 + $0x1a0] sm:$0xff]  ;;  %v617_v13 = vld [vmem:[%s17214_s20 + $0x1a8] sm:$0xff] }
  0xa5   : > { %16063 = vmatpush3.msra.mxu0 %v612_v23  ;;  %16068 = vmatpush3.msra.mxu1 %v613_v25  ;;  %v17736_v23 = vld [vmem:[%s17220_s15 + $0x1b0] sm:$0xff] }
  0xa6   : > { %16064 = vmatprep.mubr.msk.f32.mxu0 %vm17044_vm0, %v17043_v0  ;;  %16069 = vmatprep.mubr.msk.f32.mxu1 %vm17044_vm0, %v17043_v0  ;;  %v490_v25 = vld [vmem:[%s17228_s28 + $0x1b0] sm:$0xff] }
  0xa7   : > { %16072 = vmatprep.subr.mxu0 %v17043_v0  ;;  %16077 = vmatprep.subr.mxu1 %v17043_v0 }
  0xa8   : > { %16065 = vmatmul.mubr.msk.f32.vlgmr.msra.gmra.mrb[48].mxu0 %vm628_vm1, %v548_v30  ;;  %16070 = vmatmul.mubr.msk.f32.vlgmr.msra.gmra.mrb[48].mxu1 %vm628_vm1, %v549_v32  ;;  %v17740_v30 = vld [vmem:[%s17220_s15 + $0x1b8] sm:$0xff] }
  0xa9   : > { %16073 = vmatpush3.msra.mxu0 %v614_v48  ;;  %16078 = vmatpush3.msra.mxu1 %v615_v52  ;;  %v491_v32 = vld [vmem:[%s17228_s28 + $0x1b8] sm:$0xff]  ;;  %v554_v48 = vadd.f32 %v490_v25, %v17736_v23  ;;  %v17776_v25 = vld [vmem:[%s17220_s15 + $0x1d0] sm:$0xff] }
  0xaa   : > { %16074 = vmatprep.mubr.msk.f32.mxu0 %vm17044_vm0, %v17043_v0  ;;  %16079 = vmatprep.mubr.msk.f32.mxu1 %vm17044_vm0, %v17043_v0  ;;  %v555_v52 = vadd.f32 %v491_v32, %v17740_v30  ;;  %19133 = vst [vmem:[#allocation13_spill] sm:$0xff] %v17776_v25  ;;  %v494_v32 = vld [vmem:[%s17228_s28 + $0x1d0] sm:$0xff] }
  0xab   : > { %16082 = vmatprep.subr.mxu0 %v17043_v0  ;;  %16087 = vmatprep.subr.mxu1 %v17043_v0 }
  0xac   : > { %16075 = vmatmul.mubr.msk.f32.vlgmr.msra.gmra.mrb[50].mxu0 %vm628_vm1, %v550_v53  ;;  %16080 = vmatmul.mubr.msk.f32.vlgmr.msra.gmra.mrb[50].mxu1 %vm628_vm1, %v551_v54  ;;  %v17756_v53 = vld [vmem:[%s17220_s15 + $0x1c0] sm:$0xff] }
  0xad   : > { %16083 = vmatpush3.msra.mxu0 %v616_v9  ;;  %16088 = vmatpush3.msra.mxu1 %v617_v13  ;;  %19131 = vst [vmem:[#allocation11_spill] sm:$0xff] %v17756_v53  ;;  %v492_v54 = vld [vmem:[%s17228_s28 + $0x1c0] sm:$0xff]  ;;  %v621_v13 = vld [vmem:[%s17214_s20 + $0x1c8] sm:$0xff] }
  0xae   : > { %16084 = vmatprep.mubr.msk.f32.mxu0 %vm17044_vm0, %v17043_v0  ;;  %16089 = vmatprep.mubr.msk.f32.mxu1 %vm17044_vm0, %v17043_v0  ;;  %v620_v9 = vld [vmem:[%s17214_s20 + $0x1c0] sm:$0xff] }
  0xaf   : > { %16092 = vmatprep.subr.mxu0 %v17043_v0  ;;  %16097 = vmatprep.subr.mxu1 %v17043_v0 }
  0xb0   : > { %16085 = vmatmul.mubr.msk.f32.vlgmr.msra.gmra.mrb[52].mxu0 %vm628_vm1, %v552_v15  ;;  %16090 = vmatmul.mubr.msk.f32.vlgmr.msra.gmra.mrb[52].mxu1 %vm628_vm1, %v553_v21  ;;  %v556_v15 = vadd.f32 %v492_v54, %v17756_v53  ;;  %v557_v21 = vadd.f32 %v493_v5, %v17760_v1  ;;  %v558_v54 = vadd.f32 %v494_v32, %v17776_v25  ;;  %v17800_v1 = vld [vmem:[%s17220_s15 + $0x1e8] sm:$0xff]  ;;  %v499_v25 = vld [vmem:[%s17228_s28 + $0x1f8] sm:$0xff] }
  0xb1   : > { %16093 = vmatpush3.msra.mxu0 %v618_v36  ;;  %16098 = vmatpush3.msra.mxu1 %v619_v46  ;;  %v17780_v36 = vld [vmem:[%s17220_s15 + $0x1d8] sm:$0xff]  ;;  %v497_v53 = vld [vmem:[%s17228_s28 + $0x1e8] sm:$0xff] }
  0xb2   : > { %16094 = vmatprep.mubr.msk.f32.mxu0 %vm17044_vm0, %v17043_v0  ;;  %16099 = vmatprep.mubr.msk.f32.mxu1 %vm17044_vm0, %v17043_v0  ;;  %19134 = vst [vmem:[#allocation14_spill] sm:$0xff] %v17780_v36  ;;  %v495_v46 = vld [vmem:[%s17228_s28 + $0x1d8] sm:$0xff] }
  0xb3   : > { %16102 = vmatprep.subr.mxu0 %v17043_v0  ;;  %16107 = vmatprep.subr.mxu1 %v17043_v0  ;;  %v559_v5 = vadd.f32 %v495_v46, %v17780_v36  ;;  %v561_v46 = vadd.f32 %v497_v53, %v17800_v1  ;;  %v17820_v36 = vld [vmem:[%s17220_s15 + $0x1f8] sm:$0xff] }
  0xb4   : > { %16095 = vmatmul.mubr.msk.f32.vlgmr.msra.gmra.mrb[54].mxu0 %vm628_vm1, %v554_v48  ;;  %16100 = vmatmul.mubr.msk.f32.vlgmr.msra.gmra.mrb[54].mxu1 %vm628_vm1, %v555_v52  ;;  %v622_v48 = vld [vmem:[%s17214_s20 + $0x1d0] sm:$0xff]  ;;  %v623_v52 = vld [vmem:[%s17214_s20 + $0x1d8] sm:$0xff] }
  0xb5   : > { %16103 = vmatpush3.msra.mxu0 %v620_v9  ;;  %16108 = vmatpush3.msra.mxu1 %v621_v13  ;;  %v17796_v9 = vld [vmem:[%s17220_s15 + $0x1e0] sm:$0xff] }
  0xb6   : > { %16104 = vmatprep.mubr.msk.f32.mxu0 %vm17044_vm0, %v17043_v0  ;;  %16109 = vmatprep.mubr.msk.f32.mxu1 %vm17044_vm0, %v17043_v0  ;;  %v496_v13 = vld [vmem:[%s17228_s28 + $0x1e0] sm:$0xff] }
  0xb7   : > { %16112 = vmatprep.subr.mxu0 %v17043_v0  ;;  %16117 = vmatprep.subr.mxu1 %v17043_v0  ;;  %v560_v32 = vadd.f32 %v496_v13, %v17796_v9  ;;  %v563_v13 = vadd.f32 %v499_v25, %v17820_v36  ;;  %v5303_v25 = vld [vmem:[%s17835_s8 + $0x10] sm:$0xff] }
  0xb8   : > { %16105 = vmatmul.mubr.msk.f32.vlgmr.msra.gmra.mrb[56].mxu0 %vm628_vm1, %v556_v15  ;;  %16110 = vmatmul.mubr.msk.f32.vlgmr.msra.gmra.mrb[56].mxu1 %vm628_vm1, %v557_v21  ;;  %v624_v15 = vld [vmem:[%s17214_s20 + $0x1e0] sm:$0xff]  ;;  %v625_v21 = vld [vmem:[%s17214_s20 + $0x1e8] sm:$0xff] }
  0xb9   : > { %16113 = vmatpush3.msra.mxu0 %v622_v48  ;;  %16118 = vmatpush3.msra.mxu1 %v623_v52  ;;  %v17816_v48 = vld [vmem:[%s17220_s15 + $0x1f0] sm:$0xff] }
  0xba   : > { %16114 = vmatprep.mubr.msk.f32.mxu0 %vm17044_vm0, %v17043_v0  ;;  %16119 = vmatprep.mubr.msk.f32.mxu1 %vm17044_vm0, %v17043_v0  ;;  %v498_v52 = vld [vmem:[%s17228_s28 + $0x1f0] sm:$0xff] }
  0xbb   : > { %16122 = vmatprep.subr.mxu0 %v17043_v0  ;;  %16127 = vmatprep.subr.mxu1 %v17043_v0  ;;  %v562_v53 = vadd.f32 %v498_v52, %v17816_v48  ;;  %v16840_v52 = vld [vmem:[%s17220_s15 + $0x8] sm:$0xff] }
  0xbc   : > { %16115 = vmatmul.mubr.msk.f32.vlgmr.msra.gmra.mrb[58].mxu0 %vm628_vm1, %v558_v54  ;;  %16120 = vmatmul.mubr.msk.f32.vlgmr.msra.gmra.mrb[58].mxu1 %vm628_vm1, %v559_v5  ;;  %v626_v54 = vld [vmem:[%s17214_s20 + $0x1f0] sm:$0xff]  ;;  %v627_v5 = vld [vmem:[%s17214_s20 + $0x1f8] sm:$0xff] }
  0xbd   : > { %16123 = vmatpush3.msra.mxu0 %v624_v15  ;;  %16128 = vmatpush3.msra.mxu1 %v625_v21  ;;  %v5301_v15 = vld [vmem:[%s17835_s8] sm:$0xff]  ;;  %v5302_v21 = vld [vmem:[%s17835_s8 + $0x8] sm:$0xff] }
  0xbe   : > { %16124 = vmatprep.mubr.msk.f32.mxu0 %vm17044_vm0, %v17043_v0  ;;  %16129 = vmatprep.mubr.msk.f32.mxu1 %vm17044_vm0, %v17043_v0 }
  0xbf   : > { %16132 = vmatprep.subr.mxu0 %v17043_v0  ;;  %16137 = vmatprep.subr.mxu1 %v17043_v0 }
  0xc0   : > { %16125 = vmatmul.mubr.msk.f32.vlgmr.msra.gmra.mrb[60].mxu0 %vm628_vm1, %v560_v32  ;;  %16130 = vmatmul.mubr.msk.f32.vlgmr.msra.gmra.mrb[60].mxu1 %vm628_vm1, %v561_v46  ;;  %v5304_v32 = vld [vmem:[%s17835_s8 + $0x18] sm:$0xff]  ;;  %v16839_v46 = vld [vmem:[%s17220_s15] sm:$0xff] }
  0xc1   : > { %16133 = vmatpush3.msra.mxu0 %v626_v54  ;;  %16138 = vmatpush3.msra.mxu1 %v627_v5  ;;  %v5305_v54 = vld [vmem:[%s17835_s8 + $0x20] sm:$0xff]  ;;  %v5306_v5 = vld [vmem:[%s17835_s8 + $0x28] sm:$0xff] }
  0xc2   : > { %16134 = vmatprep.mubr.msk.f32.mxu0 %vm17044_vm0, %v17043_v0  ;;  %16139 = vmatprep.mubr.msk.f32.mxu1 %vm17044_vm0, %v17043_v0 }
  0xc3   : > { %16142 = vmatprep.subr.mxu0 %v17043_v0  ;;  %16147 = vmatprep.subr.mxu1 %v17043_v0 }
  0xc4   : > { %16135 = vmatmul.mubr.msk.f32.vlgmr.msra.gmra.mrb[62].mxu0 %vm628_vm1, %v562_v53  ;;  %16140 = vmatmul.mubr.msk.f32.vlgmr.msra.gmra.mrb[62].mxu1 %vm628_vm1, %v563_v13  ;;  %v16841_v53 = vld [vmem:[%s17220_s15 + $0x10] sm:$0xff]  ;;  %v16842_v13 = vld [vmem:[%s17220_s15 + $0x18] sm:$0xff] }
  0xc5   : > { %16143 = vmatpush3.msra.mxu0 %v5301_v15  ;;  %16148 = vmatpush3.msra.mxu1 %v5302_v21  ;;  %v5307_v15 = vld [vmem:[%s17835_s8 + $0x30] sm:$0xff]  ;;  %v5308_v21 = vld [vmem:[%s17835_s8 + $0x38] sm:$0xff] }
  0xc6   : > { %16144 = vmatprep.mubr.msk.f32.mxu0 %vm17044_vm0, %v17043_v0  ;;  %16149 = vmatprep.mubr.msk.f32.mxu1 %vm17044_vm0, %v17043_v0 }
  0xc7   : > { %16152 = vmatprep.subr.mxu0 %v17043_v0  ;;  %16157 = vmatprep.subr.mxu1 %v17043_v0 }
  0xc8   : > { %16145 = vmatmul.mubr.msk.f32.vlgmr.msra.gmra.mrb[64].mxu0 %vm628_vm1, %v16839_v46  ;;  %16150 = vmatmul.mubr.msk.f32.vlgmr.msra.gmra.mrb[64].mxu1 %vm628_vm1, %v16840_v52  ;;  %v5309_v46 = vld [vmem:[%s17835_s8 + $0x40] sm:$0xff]  ;;  %v5310_v52 = vld [vmem:[%s17835_s8 + $0x48] sm:$0xff] }
  0xc9   : > { %16153 = vmatpush3.msra.mxu0 %v5303_v25  ;;  %16158 = vmatpush3.msra.mxu1 %v5304_v32  ;;  %v16843_v25 = vld [vmem:[%s17220_s15 + $0x20] sm:$0xff]  ;;  %v16844_v32 = vld [vmem:[%s17220_s15 + $0x28] sm:$0xff] }
  0xca   : > { %16154 = vmatprep.mubr.msk.f32.mxu0 %vm17044_vm0, %v17043_v0  ;;  %16159 = vmatprep.mubr.msk.f32.mxu1 %vm17044_vm0, %v17043_v0 }
  0xcb   : > { %16162 = vmatprep.subr.mxu0 %v17043_v0  ;;  %16167 = vmatprep.subr.mxu1 %v17043_v0 }
  0xcc   : > { %16155 = vmatmul.mubr.msk.f32.vlgmr.msra.gmra.mrb[66].mxu0 %vm628_vm1, %v16841_v53  ;;  %16160 = vmatmul.mubr.msk.f32.vlgmr.msra.gmra.mrb[66].mxu1 %vm628_vm1, %v16842_v13  ;;  %v5312_v53 = vld [vmem:[%s17835_s8 + $0x58] sm:$0xff]  ;;  %v5314_v13 = vld [vmem:[%s17835_s8 + $0x68] sm:$0xff] }
  0xcd   : > { %16163 = vmatpush3.msra.mxu0 %v5305_v54  ;;  %16168 = vmatpush3.msra.mxu1 %v5306_v5  ;;  %v16845_v54 = vld [vmem:[%s17220_s15 + $0x30] sm:$0xff]  ;;  %s18886_s15 = scalar_lea.vmem [#allocation5], %s17191_s7 }
  0xce   : > { %16164 = vmatprep.mubr.msk.f32.mxu0 %vm17044_vm0, %v17043_v0  ;;  %16169 = vmatprep.mubr.msk.f32.mxu1 %vm17044_vm0, %v17043_v0  ;;  %v5311_v5 = vld [vmem:[%s17835_s8 + $0x50] sm:$0xff] }
  0xcf   : > { %16172 = vmatprep.subr.mxu0 %v17043_v0  ;;  %16177 = vmatprep.subr.mxu1 %v17043_v0 }
  0xd0   : > { %16165 = vmatmul.mubr.msk.f32.vlgmr.msra.gmra.mrb[68].mxu0 %vm628_vm1, %v16843_v25  ;;  %16170 = vmatmul.mubr.msk.f32.vlgmr.msra.gmra.mrb[68].mxu1 %vm628_vm1, %v16844_v32  ;;  %v5347_v25 = vld [vmem:[%s17835_s8 + $0x170] sm:$0xff]  ;;  %v5348_v32 = vld [vmem:[%s17835_s8 + $0x178] sm:$0xff] }
  0xd1   : > { %16173 = vmatpush3.msra.mxu0 %v5307_v15  ;;  %16178 = vmatpush3.msra.mxu1 %v5308_v21 }
  0xd2   : > { %16174 = vmatprep.mubr.msk.f32.mxu0 %vm17044_vm0, %v17043_v0  ;;  %16179 = vmatprep.mubr.msk.f32.mxu1 %vm17044_vm0, %v17043_v0 }
  0xd3   : > { %16182 = vmatprep.subr.mxu0 %v17043_v0  ;;  %16187 = vmatprep.subr.mxu1 %v17043_v0 }
  0xd4   : > { %16175 = vmatmul.mubr.msk.f32.vlgmr.msra.gmra.mrb[70].mxu0 %vm628_vm1, %v16845_v54  ;;  %16180 = vmatmul.mubr.msk.f32.vlgmr.msra.gmra.mrb[70].mxu1 %vm628_vm1, %v17261_v27  ;;  %v5313_v27 = vld [vmem:[%s17835_s8 + $0x60] sm:$0xff] }
  0xd5   : > { %16183 = vmatpush3.msra.mxu0 %v5309_v46  ;;  %16188 = vmatpush3.msra.mxu1 %v5310_v52  ;;  %v5349_v54 = vld [vmem:[%s17835_s8 + $0x180] sm:$0xff] }
  0xd6   : > { %16184 = vmatprep.mubr.msk.f32.mxu0 %vm17044_vm0, %v17043_v0  ;;  %16189 = vmatprep.mubr.msk.f32.mxu1 %vm17044_vm0, %v17043_v0 }
  0xd7   : > { %16192 = vmatprep.subr.mxu0 %v17043_v0  ;;  %16197 = vmatprep.subr.mxu1 %v17043_v0 }
  0xd8   : > { %16185 = vmatmul.mubr.msk.f32.vlgmr.msra.gmra.mrb[72].mxu0 %vm628_vm1, %v17276_v33  ;;  %16190 = vmatmul.mubr.msk.f32.vlgmr.msra.gmra.mrb[72].mxu1 %vm628_vm1, %v17280_v35  ;;  %v5315_v33 = vld [vmem:[%s17835_s8 + $0x70] sm:$0xff]  ;;  %v5316_v35 = vld [vmem:[%s17835_s8 + $0x78] sm:$0xff] }
  0xd9   : > { %16193 = vmatpush3.msra.mxu0 %v5311_v5  ;;  %16198 = vmatpush3.msra.mxu1 %v5312_v53  ;;  %v5350_v5 = vld [vmem:[%s17835_s8 + $0x188] sm:$0xff] }
  0xda   : > { %16194 = vmatprep.mubr.msk.f32.mxu0 %vm17044_vm0, %v17043_v0  ;;  %16199 = vmatprep.mubr.msk.f32.mxu1 %vm17044_vm0, %v17043_v0 }
  0xdb   : > { %16202 = vmatprep.subr.mxu0 %v17043_v0  ;;  %16207 = vmatprep.subr.mxu1 %v17043_v0 }
  0xdc   : > { %16195 = vmatmul.mubr.msk.f32.vlgmr.msra.gmra.mrb[74].mxu0 %vm628_vm1, %v17296_v41  ;;  %16200 = vmatmul.mubr.msk.f32.vlgmr.msra.gmra.mrb[74].mxu1 %vm628_vm1, %v17300_v43  ;;  %v5317_v41 = vld [vmem:[%s17835_s8 + $0x80] sm:$0xff]  ;;  %v5318_v43 = vld [vmem:[%s17835_s8 + $0x88] sm:$0xff] }
  0xdd   : > { %16203 = vmatpush3.msra.mxu0 %v5313_v27  ;;  %16208 = vmatpush3.msra.mxu1 %v5314_v13  ;;  %v5351_v13 = vld [vmem:[%s17835_s8 + $0x190] sm:$0xff] }
  0xde   : > { %16204 = vmatprep.mubr.msk.f32.mxu0 %vm17044_vm0, %v17043_v0  ;;  %16209 = vmatprep.mubr.msk.f32.mxu1 %vm17044_vm0, %v17043_v0 }
  0xdf   : > { %16212 = vmatprep.subr.mxu0 %v17043_v0  ;;  %16217 = vmatprep.subr.mxu1 %v17043_v0 }
  0xe0   : > { %16205 = vmatmul.mubr.msk.f32.vlgmr.msra.gmra.mrb[76].mxu0 %vm628_vm1, %v17316_v49  ;;  %16210 = vmatmul.mubr.msk.f32.vlgmr.msra.gmra.mrb[76].mxu1 %vm628_vm1, %v17320_v51  ;;  %v5319_v49 = vld [vmem:[%s17835_s8 + $0x90] sm:$0xff]  ;;  %v5320_v51 = vld [vmem:[%s17835_s8 + $0x98] sm:$0xff] }
  0xe1   : > { %16213 = vmatpush3.msra.mxu0 %v5315_v33  ;;  %16218 = vmatpush3.msra.mxu1 %v5316_v35  ;;  %v5352_v33 = vld [vmem:[%s17835_s8 + $0x198] sm:$0xff] }
  0xe2   : > { %16214 = vmatprep.mubr.msk.f32.mxu0 %vm17044_vm0, %v17043_v0  ;;  %16219 = vmatprep.mubr.msk.f32.mxu1 %vm17044_vm0, %v17043_v0 }
  0xe3   : > { %16222 = vmatprep.subr.mxu0 %v17043_v0  ;;  %16227 = vmatprep.subr.mxu1 %v17043_v0 }
  0xe4   : > { %16215 = vmatmul.mubr.msk.f32.vlgmr.msra.gmra.mrb[78].mxu0 %vm628_vm1, %v17336_v57  ;;  %16220 = vmatmul.mubr.msk.f32.vlgmr.msra.gmra.mrb[78].mxu1 %vm628_vm1, %v17340_v59  ;;  %v5321_v57 = vld [vmem:[%s17835_s8 + $0xa0] sm:$0xff]  ;;  %v5322_v59 = vld [vmem:[%s17835_s8 + $0xa8] sm:$0xff] }
  0xe5   : > { %16223 = vmatpush3.msra.mxu0 %v5317_v41  ;;  %16228 = vmatpush3.msra.mxu1 %v5318_v43  ;;  %v5353_v43 = vld [vmem:[%s17835_s8 + $0x1a0] sm:$0xff] }
  0xe6   : > { %16224 = vmatprep.mubr.msk.f32.mxu0 %vm17044_vm0, %v17043_v0  ;;  %16229 = vmatprep.mubr.msk.f32.mxu1 %vm17044_vm0, %v17043_v0 }
  0xe7   : > { %16232 = vmatprep.subr.mxu0 %v17043_v0  ;;  %16237 = vmatprep.subr.mxu1 %v17043_v0 }
  0xe8   : > { %16225 = vmatmul.mubr.msk.f32.vlgmr.msra.gmra.mrb[80].mxu0 %vm628_vm1, %v17356_v2  ;;  %16230 = vmatmul.mubr.msk.f32.vlgmr.msra.gmra.mrb[80].mxu1 %vm628_vm1, %v17360_v4  ;;  %v5323_v2 = vld [vmem:[%s17835_s8 + $0xb0] sm:$0xff]  ;;  %v5324_v4 = vld [vmem:[%s17835_s8 + $0xb8] sm:$0xff] }
  0xe9   : > { %16233 = vmatpush3.msra.mxu0 %v5319_v49  ;;  %16238 = vmatpush3.msra.mxu1 %v5320_v51  ;;  %v5354_v49 = vld [vmem:[%s17835_s8 + $0x1a8] sm:$0xff] }
  0xea   : > { %16234 = vmatprep.mubr.msk.f32.mxu0 %vm17044_vm0, %v17043_v0  ;;  %16239 = vmatprep.mubr.msk.f32.mxu1 %vm17044_vm0, %v17043_v0 }
  0xeb   : > { %16242 = vmatprep.subr.mxu0 %v17043_v0  ;;  %16247 = vmatprep.subr.mxu1 %v17043_v0 }
  0xec   : > { %16235 = vmatmul.mubr.msk.f32.vlgmr.msra.gmra.mrb[82].mxu0 %vm628_vm1, %v17376_v10  ;;  %16240 = vmatmul.mubr.msk.f32.vlgmr.msra.gmra.mrb[82].mxu1 %vm628_vm1, %v17380_v12  ;;  %v5325_v10 = vld [vmem:[%s17835_s8 + $0xc0] sm:$0xff]  ;;  %v5326_v12 = vld [vmem:[%s17835_s8 + $0xc8] sm:$0xff] }
  0xed   : > { %16243 = vmatpush3.msra.mxu0 %v5321_v57  ;;  %16248 = vmatpush3.msra.mxu1 %v5322_v59  ;;  %v5355_v59 = vld [vmem:[%s17835_s8 + $0x1b0] sm:$0xff] }
  0xee   : > { %16244 = vmatprep.mubr.msk.f32.mxu0 %vm17044_vm0, %v17043_v0  ;;  %16249 = vmatprep.mubr.msk.f32.mxu1 %vm17044_vm0, %v17043_v0 }
  0xef   : > { %16252 = vmatprep.subr.mxu0 %v17043_v0  ;;  %16257 = vmatprep.subr.mxu1 %v17043_v0 }
  0xf0   : > { %16245 = vmatmul.mubr.msk.f32.vlgmr.msra.gmra.mrb[84].mxu0 %vm628_vm1, %v17396_v18  ;;  %16250 = vmatmul.mubr.msk.f32.vlgmr.msra.gmra.mrb[84].mxu1 %vm628_vm1, %v17400_v20  ;;  %v5327_v18 = vld [vmem:[%s17835_s8 + $0xd0] sm:$0xff]  ;;  %v5328_v20 = vld [vmem:[%s17835_s8 + $0xd8] sm:$0xff] }
  0xf1   : > { %16253 = vmatpush3.msra.mxu0 %v5323_v2  ;;  %16258 = vmatpush3.msra.mxu1 %v5324_v4  ;;  %v5356_v2 = vld [vmem:[%s17835_s8 + $0x1b8] sm:$0xff] }
  0xf2   : > { %16254 = vmatprep.mubr.msk.f32.mxu0 %vm17044_vm0, %v17043_v0  ;;  %16259 = vmatprep.mubr.msk.f32.mxu1 %vm17044_vm0, %v17043_v0 }
  0xf3   : > { %16262 = vmatprep.subr.mxu0 %v17043_v0  ;;  %16267 = vmatprep.subr.mxu1 %v17043_v0 }
  0xf4   : > { %16255 = vmatmul.mubr.msk.f32.vlgmr.msra.gmra.mrb[86].mxu0 %vm628_vm1, %v17416_v26  ;;  %16260 = vmatmul.mubr.msk.f32.vlgmr.msra.gmra.mrb[86].mxu1 %vm628_vm1, %v17420_v29  ;;  %v5329_v26 = vld [vmem:[%s17835_s8 + $0xe0] sm:$0xff]  ;;  %v5330_v29 = vld [vmem:[%s17835_s8 + $0xe8] sm:$0xff] }
  0xf5   : > { %16263 = vmatpush3.msra.mxu0 %v5325_v10  ;;  %16268 = vmatpush3.msra.mxu1 %v5326_v12  ;;  %v5357_v12 = vld [vmem:[%s17835_s8 + $0x1c0] sm:$0xff] }
  0xf6   : > { %16264 = vmatprep.mubr.msk.f32.mxu0 %vm17044_vm0, %v17043_v0  ;;  %16269 = vmatprep.mubr.msk.f32.mxu1 %vm17044_vm0, %v17043_v0 }
  0xf7   : > { %16272 = vmatprep.subr.mxu0 %v17043_v0  ;;  %16277 = vmatprep.subr.mxu1 %v17043_v0 }
  0xf8   : > { %16265 = vmatmul.mubr.msk.f32.vlgmr.msra.gmra.mrb[88].mxu0 %vm628_vm1, %v17436_v37  ;;  %16270 = vmatmul.mubr.msk.f32.vlgmr.msra.gmra.mrb[88].mxu1 %vm628_vm1, %v17440_v39  ;;  %v5331_v37 = vld [vmem:[%s17835_s8 + $0xf0] sm:$0xff]  ;;  %v5332_v39 = vld [vmem:[%s17835_s8 + $0xf8] sm:$0xff] }
  0xf9   : > { %16273 = vmatpush3.msra.mxu0 %v5327_v18  ;;  %16278 = vmatpush3.msra.mxu1 %v5328_v20  ;;  %v5358_v18 = vld [vmem:[%s17835_s8 + $0x1c8] sm:$0xff] }
  0xfa   : > { %16274 = vmatprep.mubr.msk.f32.mxu0 %vm17044_vm0, %v17043_v0  ;;  %16279 = vmatprep.mubr.msk.f32.mxu1 %vm17044_vm0, %v17043_v0 }
  0xfb   : > { %16282 = vmatprep.subr.mxu0 %v17043_v0  ;;  %16287 = vmatprep.subr.mxu1 %v17043_v0 }
  0xfc   : > { %16275 = vmatmul.mubr.msk.f32.vlgmr.msra.gmra.mrb[90].mxu0 %vm628_vm1, %v17456_v47  ;;  %16280 = vmatmul.mubr.msk.f32.vlgmr.msra.gmra.mrb[90].mxu1 %vm628_vm1, %v17460_v50  ;;  %v5333_v47 = vld [vmem:[%s17835_s8 + $0x100] sm:$0xff]  ;;  %v5334_v50 = vld [vmem:[%s17835_s8 + $0x108] sm:$0xff] }
  0xfd   : > { %16283 = vmatpush3.msra.mxu0 %v5329_v26  ;;  %16288 = vmatpush3.msra.mxu1 %v5330_v29  ;;  %v5359_v29 = vld [vmem:[%s17835_s8 + $0x1d0] sm:$0xff] }
  0xfe   : > { %16284 = vmatprep.mubr.msk.f32.mxu0 %vm17044_vm0, %v17043_v0  ;;  %16289 = vmatprep.mubr.msk.f32.mxu1 %vm17044_vm0, %v17043_v0 }
  0xff   : > { %16292 = vmatprep.subr.mxu0 %v17043_v0  ;;  %16297 = vmatprep.subr.mxu1 %v17043_v0 }
 0x100   : > { %16285 = vmatmul.mubr.msk.f32.vlgmr.msra.gmra.mrb[92].mxu0 %vm628_vm1, %v17476_v58  ;;  %16290 = vmatmul.mubr.msk.f32.vlgmr.msra.gmra.mrb[92].mxu1 %vm628_vm1, %v17480_v61  ;;  %v5335_v58 = vld [vmem:[%s17835_s8 + $0x110] sm:$0xff]  ;;  %v5336_v61 = vld [vmem:[%s17835_s8 + $0x118] sm:$0xff] }
 0x101   : > { %16293 = vmatpush3.msra.mxu0 %v5331_v37  ;;  %16298 = vmatpush3.msra.mxu1 %v5332_v39  ;;  %v5360_v37 = vld [vmem:[%s17835_s8 + $0x1d8] sm:$0xff] }
 0x102   : > { %16294 = vmatprep.mubr.msk.f32.mxu0 %vm17044_vm0, %v17043_v0  ;;  %16299 = vmatprep.mubr.msk.f32.mxu1 %vm17044_vm0, %v17043_v0 }
 0x103   : > { %16302 = vmatprep.subr.mxu0 %v17043_v0  ;;  %16307 = vmatprep.subr.mxu1 %v17043_v0 }
 0x104   : > { %16295 = vmatmul.mubr.msk.f32.vlgmr.msra.gmra.mrb[94].mxu0 %vm628_vm1, %v17496_v6  ;;  %16300 = vmatmul.mubr.msk.f32.vlgmr.msra.gmra.mrb[94].mxu1 %vm628_vm1, %v17500_v8  ;;  %v5337_v6 = vld [vmem:[%s17835_s8 + $0x120] sm:$0xff]  ;;  %v5338_v8 = vld [vmem:[%s17835_s8 + $0x128] sm:$0xff] }
 0x105   : > { %16303 = vmatpush3.msra.mxu0 %v5333_v47  ;;  %16308 = vmatpush3.msra.mxu1 %v5334_v50  ;;  %v19135_v50 = vld [vmem:[#allocation11_spill] sm:$0xff] }
 0x106   : > { %16304 = vmatprep.mubr.msk.f32.mxu0 %vm17044_vm0, %v17043_v0  ;;  %16309 = vmatprep.mubr.msk.f32.mxu1 %vm17044_vm0, %v17043_v0 }
 0x107   : > { %16312 = vmatprep.subr.mxu0 %v17043_v0  ;;  %16317 = vmatprep.subr.mxu1 %v17043_v0 }
 0x108   : > { %16305 = vmatmul.mubr.msk.f32.vlgmr.msra.gmra.mrb[96].mxu0 %vm628_vm1, %v17516_v16  ;;  %16310 = vmatmul.mubr.msk.f32.vlgmr.msra.gmra.mrb[96].mxu1 %vm628_vm1, %v17520_v19  ;;  %v5339_v16 = vld [vmem:[%s17835_s8 + $0x130] sm:$0xff]  ;;  %v5340_v19 = vld [vmem:[%s17835_s8 + $0x138] sm:$0xff] }
 0x109   : > { %16313 = vmatpush3.msra.mxu0 %v5335_v58  ;;  %16318 = vmatpush3.msra.mxu1 %v5336_v61  ;;  %v19136_v58 = vld [vmem:[#allocation12_spill] sm:$0xff]  ;;  %v5361_v61 = vld [vmem:[%s17835_s8 + $0x1e0] sm:$0xff] }
 0x10a   : > { %16314 = vmatprep.mubr.msk.f32.mxu0 %vm17044_vm0, %v17043_v0  ;;  %16319 = vmatprep.mubr.msk.f32.mxu1 %vm17044_vm0, %v17043_v0 }
 0x10b   : > { %16322 = vmatprep.subr.mxu0 %v17043_v0  ;;  %16327 = vmatprep.subr.mxu1 %v17043_v0 }
 0x10c   : > { %16315 = vmatmul.mubr.msk.f32.vlgmr.msra.gmra.mrb[98].mxu0 %vm628_vm1, %v17536_v28  ;;  %16320 = vmatmul.mubr.msk.f32.vlgmr.msra.gmra.mrb[98].mxu1 %vm628_vm1, %v17540_v31  ;;  %v5341_v28 = vld [vmem:[%s17835_s8 + $0x140] sm:$0xff]  ;;  %v5342_v31 = vld [vmem:[%s17835_s8 + $0x148] sm:$0xff] }
 0x10d   : > { %16323 = vmatpush3.msra.mxu0 %v5337_v6  ;;  %16328 = vmatpush3.msra.mxu1 %v5338_v8  ;;  %v5362_v6 = vld [vmem:[%s17835_s8 + $0x1e8] sm:$0xff] }
 0x10e   : > { %16324 = vmatprep.mubr.msk.f32.mxu0 %vm17044_vm0, %v17043_v0  ;;  %16329 = vmatprep.mubr.msk.f32.mxu1 %vm17044_vm0, %v17043_v0 }
 0x10f   : > { %16332 = vmatprep.subr.mxu0 %v17043_v0  ;;  %16337 = vmatprep.subr.mxu1 %v17043_v0 }
 0x110   : > { %16325 = vmatmul.mubr.msk.f32.vlgmr.msra.gmra.mrb[100].mxu0 %vm628_vm1, %v17556_v42  ;;  %16330 = vmatmul.mubr.msk.f32.vlgmr.msra.gmra.mrb[100].mxu1 %vm628_vm1, %v17560_v45  ;;  %v5343_v42 = vld [vmem:[%s17835_s8 + $0x150] sm:$0xff]  ;;  %v5344_v45 = vld [vmem:[%s17835_s8 + $0x158] sm:$0xff] }
 0x111   : > { %16333 = vmatpush3.msra.mxu0 %v5339_v16  ;;  %16338 = vmatpush3.msra.mxu1 %v5340_v19 }
 0x112   : > { %16334 = vmatprep.mubr.msk.f32.mxu0 %vm17044_vm0, %v17043_v0  ;;  %16339 = vmatprep.mubr.msk.f32.mxu1 %vm17044_vm0, %v17043_v0 }
 0x113   : > { %16342 = vmatprep.subr.mxu0 %v17043_v0  ;;  %16347 = vmatprep.subr.mxu1 %v17043_v0 }
 0x114   : > { %16335 = vmatmul.mubr.msk.f32.vlgmr.msra.gmra.mrb[102].mxu0 %vm628_vm1, %v17576_v55  ;;  %16340 = vmatmul.mubr.msk.f32.vlgmr.msra.gmra.mrb[102].mxu1 %vm628_vm1, %v17580_v60  ;;  %v5345_v55 = vld [vmem:[%s17835_s8 + $0x160] sm:$0xff]  ;;  %v5346_v60 = vld [vmem:[%s17835_s8 + $0x168] sm:$0xff] }
 0x115   : > { %16343 = vmatpush3.msra.mxu0 %v5341_v28  ;;  %16348 = vmatpush3.msra.mxu1 %v5342_v31  ;;  %v19137_v31 = vld [vmem:[#allocation13_spill] sm:$0xff] }
 0x116   : > { %16344 = vmatprep.mubr.msk.f32.mxu0 %vm17044_vm0, %v17043_v0  ;;  %16349 = vmatprep.mubr.msk.f32.mxu1 %vm17044_vm0, %v17043_v0 }
 0x117   : > { %16352 = vmatprep.subr.mxu0 %v17043_v0  ;;  %16357 = vmatprep.subr.mxu1 %v17043_v0 }
 0x118   : > { %16345 = vmatmul.mubr.msk.f32.vlgmr.msra.gmra.mrb[104].mxu0 %vm628_vm1, %v17596_v7  ;;  %16350 = vmatmul.mubr.msk.f32.vlgmr.msra.gmra.mrb[104].mxu1 %vm628_vm1, %v17600_v11 }
 0x119   : > { %16353 = vmatpush3.msra.mxu0 %v5343_v42  ;;  %16358 = vmatpush3.msra.mxu1 %v5344_v45  ;;  %v19138_v42 = vld [vmem:[#allocation14_spill] sm:$0xff]  ;;  %v5363_v45 = vld [vmem:[%s17835_s8 + $0x1f0] sm:$0xff] }
 0x11a   : > { %16354 = vmatprep.mubr.msk.f32.mxu0 %vm17044_vm0, %v17043_v0  ;;  %16359 = vmatprep.mubr.msk.f32.mxu1 %vm17044_vm0, %v17043_v0 }
 0x11b   : > { %v18109_v15 = vpop.f32.mrb[0].mxu0  ;;  %v18111_v21 = vpop.f32.mrb[0].mxu1  ;;  %16362 = vmatprep.subr.mxu0 %v17043_v0  ;;  %16367 = vmatprep.subr.mxu1 %v17043_v0 }
 0x11c   : > { %v15826_v7 = vpop.f32.mrb[1].mxu0  ;;  %v15831_v11 = vpop.f32.mrb[1].mxu1  ;;  %16355 = vmatmul.mubr.msk.f32.vlgmr.msra.gmra.mrb[106].mxu0 %vm628_vm1, %v17616_v22  ;;  %16360 = vmatmul.mubr.msk.f32.vlgmr.msra.gmra.mrb[106].mxu1 %vm628_vm1, %v17620_v24 }
 0x11d   : > { %16363 = vmatpush3.msra.mxu0 %v5345_v55  ;;  %16368 = vmatpush3.msra.mxu1 %v5346_v60  ;;  %v5364_v55 = vld [vmem:[%s17835_s8 + $0x1f8] sm:$0xff] }
 0x11e   : > { %16364 = vmatprep.mubr.msk.f32.mxu0 %vm17044_vm0, %v17043_v0  ;;  %16369 = vmatprep.mubr.msk.f32.mxu1 %vm17044_vm0, %v17043_v0 }
 0x11f   : > { %v18125_v46 = vpop.f32.mrb[2].mxu0  ;;  %v18127_v52 = vpop.f32.mrb[2].mxu1  ;;  %16372 = vmatprep.subr.mxu0 %v17043_v0  ;;  %16377 = vmatprep.subr.mxu1 %v17043_v0 }
 0x120   : > { %v15836_v22 = vpop.f32.mrb[3].mxu0  ;;  %v15841_v24 = vpop.f32.mrb[3].mxu1  ;;  %16365 = vmatmul.mubr.msk.f32.vlgmr.msra.gmra.mrb[108].mxu0 %vm628_vm1, %v17636_v38  ;;  %16370 = vmatmul.mubr.msk.f32.vlgmr.msra.gmra.mrb[108].mxu1 %vm628_vm1, %v17640_v44 }
 0x121   : > { %16373 = vmatpush3.msra.mxu0 %v5347_v25  ;;  %16378 = vmatpush3.msra.mxu1 %v5348_v32  ;;  %v10037_v32 = vld [vmem:[%s17195_s13] sm:$0xff]  ;;  %v10038_v22 = vld [vmem:[%s17195_s13 + $0x8] sm:$0xff] }
 0x122   : > { %16374 = vmatprep.mubr.msk.f32.mxu0 %vm17044_vm0, %v17043_v0  ;;  %16379 = vmatprep.mubr.msk.f32.mxu1 %vm17044_vm0, %v17043_v0 }
 0x123   : > { %v18141_v53 = vpop.f32.mrb[4].mxu0  ;;  %v18143_v27 = vpop.f32.mrb[4].mxu1  ;;  %16382 = vmatprep.subr.mxu0 %v17043_v0  ;;  %16387 = vmatprep.subr.mxu1 %v17043_v0 }
 0x124   : > { %v15846_v38 = vpop.f32.mrb[5].mxu0  ;;  %v15851_v44 = vpop.f32.mrb[5].mxu1  ;;  %16375 = vmatmul.mubr.msk.f32.vlgmr.msra.gmra.mrb[110].mxu0 %vm628_vm1, %v17656_v56  ;;  %16380 = vmatmul.mubr.msk.f32.vlgmr.msra.gmra.mrb[110].mxu1 %vm628_vm1, %v17660_v63 }
 0x125   : > { %16383 = vmatpush3.msra.mxu0 %v5349_v54  ;;  %16388 = vmatpush3.msra.mxu1 %v5350_v5  ;;  %v10039_v5 = vld [vmem:[%s17195_s13 + $0x10] sm:$0xff]  ;;  %v10040_v38 = vld [vmem:[%s17195_s13 + $0x18] sm:$0xff] }
 0x126   : > { %16384 = vmatprep.mubr.msk.f32.mxu0 %vm17044_vm0, %v17043_v0  ;;  %16389 = vmatprep.mubr.msk.f32.mxu1 %vm17044_vm0, %v17043_v0 }
 0x127   : > { %v18157_v35 = vpop.f32.mrb[6].mxu0  ;;  %v18159_v41 = vpop.f32.mrb[6].mxu1  ;;  %16392 = vmatprep.subr.mxu0 %v17043_v0  ;;  %16397 = vmatprep.subr.mxu1 %v17043_v0 }
 0x128   : > { %v15856_v56 = vpop.f32.mrb[7].mxu0  ;;  %v15861_v63 = vpop.f32.mrb[7].mxu1  ;;  %16385 = vmatmul.mubr.msk.f32.vlgmr.msra.gmra.mrb[112].mxu0 %vm628_vm1, %v17676_v14  ;;  %16390 = vmatmul.mubr.msk.f32.vlgmr.msra.gmra.mrb[112].mxu1 %vm628_vm1, %v17680_v17 }
 0x129   : > { %16393 = vmatpush3.msra.mxu0 %v5351_v13  ;;  %16398 = vmatpush3.msra.mxu1 %v5352_v33  ;;  %v16846_v33 = vld [vmem:[%s17228_s28] sm:$0xff]  ;;  %v16847_v56 = vld [vmem:[%s17228_s28 + $0x8] sm:$0xff] }
 0x12a   : > { %16394 = vmatprep.mubr.msk.f32.mxu0 %vm17044_vm0, %v17043_v0  ;;  %16399 = vmatprep.mubr.msk.f32.mxu1 %vm17044_vm0, %v17043_v0  ;;  %v10041_v63 = vld [vmem:[%s17195_s13 + $0x20] sm:$0xff] }
 0x12b   : > { %v18173_v51 = vpop.f32.mrb[8].mxu0  ;;  %v18175_v57 = vpop.f32.mrb[8].mxu1  ;;  %16402 = vmatprep.subr.mxu0 %v17043_v0  ;;  %16407 = vmatprep.subr.mxu1 %v17043_v0 }
 0x12c   : > { %v15866_v14 = vpop.f32.mrb[9].mxu0  ;;  %v15871_v17 = vpop.f32.mrb[9].mxu1  ;;  %16395 = vmatmul.mubr.msk.f32.vlgmr.msra.gmra.mrb[114].mxu0 %vm628_vm1, %v17696_v34  ;;  %16400 = vmatmul.mubr.msk.f32.vlgmr.msra.gmra.mrb[114].mxu1 %vm628_vm1, %v17700_v40 }
 0x12d   : > { %16403 = vmatpush3.msra.mxu0 %v5353_v43  ;;  %16408 = vmatpush3.msra.mxu1 %v5354_v49  ;;  %v10042_v43 = vld [vmem:[%s17195_s13 + $0x28] sm:$0xff] }
 0x12e   : > { %16404 = vmatprep.mubr.msk.f32.mxu0 %vm17044_vm0, %v17043_v0  ;;  %16409 = vmatprep.mubr.msk.f32.mxu1 %vm17044_vm0, %v17043_v0 }
 0x12f   : > { %v18189_v4 = vpop.f32.mrb[10].mxu0  ;;  %v18191_v10 = vpop.f32.mrb[10].mxu1  ;;  %16412 = vmatprep.subr.mxu0 %v17043_v0  ;;  %16417 = vmatprep.subr.mxu1 %v17043_v0 }
 0x130   : > { %v15876_v34 = vpop.f32.mrb[11].mxu0  ;;  %v15881_v40 = vpop.f32.mrb[11].mxu1  ;;  %16405 = vmatmul.mubr.msk.f32.vlgmr.msra.gmra.mrb[116].mxu0 %vm628_vm1, %v17716_v62  ;;  %16410 = vmatmul.mubr.msk.f32.vlgmr.msra.gmra.mrb[116].mxu1 %vm628_vm1, %v17720_v3 }
 0x131   : > { %16413 = vmatpush3.msra.mxu0 %v5355_v59  ;;  %16418 = vmatpush3.msra.mxu1 %v5356_v2  ;;  %v16848_v2 = vld [vmem:[%s17228_s28 + $0x10] sm:$0xff]  ;;  %v16849_v34 = vld [vmem:[%s17228_s28 + $0x18] sm:$0xff] }
 0x132   : > { %16414 = vmatprep.mubr.msk.f32.mxu0 %vm17044_vm0, %v17043_v0  ;;  %16419 = vmatprep.mubr.msk.f32.mxu1 %vm17044_vm0, %v17043_v0  ;;  %v10043_v40 = vld [vmem:[%s17195_s13 + $0x30] sm:$0xff] }
 0x133   : > { %v18205_v20 = vpop.f32.mrb[12].mxu0  ;;  %v18207_v26 = vpop.f32.mrb[12].mxu1  ;;  %16422 = vmatprep.subr.mxu0 %v17043_v0  ;;  %16427 = vmatprep.subr.mxu1 %v17043_v0 }
 0x134   : > { %v15886_v62 = vpop.f32.mrb[13].mxu0  ;;  %v15891_v3 = vpop.f32.mrb[13].mxu1  ;;  %16415 = vmatmul.mubr.msk.f32.vlgmr.msra.gmra.mrb[118].mxu0 %vm628_vm1, %v17736_v23  ;;  %16420 = vmatmul.mubr.msk.f32.vlgmr.msra.gmra.mrb[118].mxu1 %vm628_vm1, %v17740_v30 }
 0x135   : > { %16423 = vmatpush3.msra.mxu0 %v5357_v12  ;;  %16428 = vmatpush3.msra.mxu1 %v5358_v18  ;;  %v10044_v12 = vld [vmem:[%s17195_s13 + $0x38] sm:$0xff] }
 0x136   : > { %16424 = vmatprep.mubr.msk.f32.mxu0 %vm17044_vm0, %v17043_v0  ;;  %16429 = vmatprep.mubr.msk.f32.mxu1 %vm17044_vm0, %v17043_v0 }
 0x137   : > { %v18221_v39 = vpop.f32.mrb[14].mxu0  ;;  %v18223_v47 = vpop.f32.mrb[14].mxu1  ;;  %16432 = vmatprep.subr.mxu0 %v17043_v0  ;;  %16437 = vmatprep.subr.mxu1 %v17043_v0 }
 0x138   : > { %v15896_v23 = vpop.f32.mrb[15].mxu0  ;;  %v15901_v30 = vpop.f32.mrb[15].mxu1  ;;  %16425 = vmatmul.mubr.msk.f32.vlgmr.msra.gmra.mrb[120].mxu0 %vm628_vm1, %v19135_v50  ;;  %16430 = vmatmul.mubr.msk.f32.vlgmr.msra.gmra.mrb[120].mxu1 %vm628_vm1, %v19136_v58  ;;  %v10046_v50 = vld [vmem:[%s17195_s13 + $0x48] sm:$0xff] }
 0x139   : > { %16433 = vmatpush3.msra.mxu0 %v5359_v29  ;;  %16438 = vmatpush3.msra.mxu1 %v5360_v37  ;;  %v16850_v37 = vld [vmem:[%s17228_s28 + $0x20] sm:$0xff]  ;;  %v16851_v23 = vld [vmem:[%s17228_s28 + $0x28] sm:$0xff] }
 0x13a   : > { %16434 = vmatprep.mubr.msk.f32.mxu0 %vm17044_vm0, %v17043_v0  ;;  %16439 = vmatprep.mubr.msk.f32.mxu1 %vm17044_vm0, %v17043_v0  ;;  %v10045_v30 = vld [vmem:[%s17195_s13 + $0x40] sm:$0xff] }
 0x13b   : > { %v18237_v8 = vpop.f32.mrb[16].mxu0  ;;  %v18239_v16 = vpop.f32.mrb[16].mxu1  ;;  %16442 = vmatprep.subr.mxu0 %v17043_v0  ;;  %16447 = vmatprep.subr.mxu1 %v17043_v0 }
 0x13c   : > { %v15906_v19 = vpop.f32.mrb[17].mxu0  ;;  %v15911_v28 = vpop.f32.mrb[17].mxu1  ;;  %16435 = vmatmul.mubr.msk.f32.vlgmr.msra.gmra.mrb[122].mxu0 %vm628_vm1, %v19137_v31  ;;  %16440 = vmatmul.mubr.msk.f32.vlgmr.msra.gmra.mrb[122].mxu1 %vm628_vm1, %v19138_v42  ;;  %v16853_v31 = vld [vmem:[%s17228_s28 + $0x38] sm:$0xff]  ;;  %v10047_v42 = vld [vmem:[%s17195_s13 + $0x50] sm:$0xff] }
 0x13d   : > { %16443 = vmatpush3.msra.mxu0 %v5361_v61  ;;  %16448 = vmatpush3.msra.mxu1 %v5362_v6  ;;  %v16852_v28 = vld [vmem:[%s17228_s28 + $0x30] sm:$0xff] }
 0x13e   : > { %16444 = vmatprep.mubr.msk.f32.mxu0 %vm17044_vm0, %v17043_v0  ;;  %16449 = vmatprep.mubr.msk.f32.mxu1 %vm17044_vm0, %v17043_v0 }
 0x13f   : > { %v18253_v60 = vpop.f32.mrb[18].mxu0  ;;  %v18255_v7 = vpop.f32.mrb[18].mxu1  ;;  %16452 = vmatprep.subr.mxu0 %v17043_v0  ;;  %16457 = vmatprep.subr.mxu1 %v17043_v0 }
 0x140   : > { %v15916_v11 = vpop.f32.mrb[19].mxu0  ;;  %v15921_v25 = vpop.f32.mrb[19].mxu1  ;;  %16445 = vmatmul.mubr.msk.f32.vlgmr.msra.gmra.mrb[124].mxu0 %vm628_vm1, %v17796_v9  ;;  %16450 = vmatmul.mubr.msk.f32.vlgmr.msra.gmra.mrb[124].mxu1 %vm628_vm1, %v17800_v1 }
 0x141   : > { %16453 = vmatpush3.msra.mxu0 %v5363_v45  ;;  %16458 = vmatpush3.msra.mxu1 %v5364_v55  ;;  %v10048_v45 = vld [vmem:[%s17195_s13 + $0x58] sm:$0xff] }
 0x142   : > { %16454 = vmatprep.mubr.msk.f32.mxu0 %vm17044_vm0, %v17043_v0  ;;  %16459 = vmatprep.mubr.msk.f32.mxu1 %vm17044_vm0, %v17043_v0 }
 0x143   : > { %v18269_v24 = vpop.f32.mrb[20].mxu0  ;;  %v18271_v54 = vpop.f32.mrb[20].mxu1  ;;  %16462 = vmatprep.subr.mxu0 %v17043_v0  ;;  %16467 = vmatprep.subr.mxu1 %v17043_v0 }
 0x144   : > { %19139 = vst [vmem:[#allocation11_spill] sm:$0xff] %v18271_v54  ;;  %v15926_v1 = vpop.f32.mrb[21].mxu0  ;;  %v15931_v9 = vpop.f32.mrb[21].mxu1  ;;  %16455 = vmatmul.mubr.msk.f32.vlgmr.msra.gmra.mrb[126].mxu0 %vm628_vm1, %v17816_v48  ;;  %16460 = vmatmul.mubr.msk.f32.vlgmr.msra.gmra.mrb[126].mxu1 %vm628_vm1, %v17820_v36 }
 0x145   : > { %16463 = vmatpush3.msra.mxu0 %v10037_v32  ;;  %16468 = vmatpush3.msra.mxu1 %v10038_v22  ;;  %v16854_v22 = vld [vmem:[%s17228_s28 + $0x40] sm:$0xff]  ;;  %v16855_v1 = vld [vmem:[%s17228_s28 + $0x48] sm:$0xff] }
 0x146   : > { %16464 = vmatprep.mubr.msk.f32.mxu0 %vm17044_vm0, %v17043_v0  ;;  %16469 = vmatprep.mubr.msk.f32.mxu1 %vm17044_vm0, %v17043_v0  ;;  %v10049_v9 = vld [vmem:[%s17195_s13 + $0x60] sm:$0xff] }
 0x147   : > { %v18285_v44 = vpop.f32.mrb[22].mxu0  ;;  %v18287_v13 = vpop.f32.mrb[22].mxu1  ;;  %16472 = vmatprep.subr.mxu0 %v17043_v0  ;;  %16477 = vmatprep.subr.mxu1 %v17043_v0 }
 0x148   : > { %v15936_v36 = vpop.f32.mrb[23].mxu0  ;;  %v15941_v48 = vpop.f32.mrb[23].mxu1  ;;  %16465 = vmatmul.mubr.msk.f32.vlgmr.msra.gmra.mrb[128].mxu0 %vm628_vm1, %v16846_v33  ;;  %16470 = vmatmul.mubr.msk.f32.vlgmr.msra.gmra.mrb[128].mxu1 %vm628_vm1, %v16847_v56  ;;  %v16856_v56 = vld [vmem:[%s17228_s28 + $0x50] sm:$0xff] }
 0x149   : > { %16473 = vmatpush3.msra.mxu0 %v10039_v5  ;;  %16478 = vmatpush3.msra.mxu1 %v10040_v38  ;;  %v10050_v5 = vld [vmem:[%s17195_s13 + $0x68] sm:$0xff] }
 0x14a   : > { %16474 = vmatprep.mubr.msk.f32.mxu0 %vm17044_vm0, %v17043_v0  ;;  %16479 = vmatprep.mubr.msk.f32.mxu1 %vm17044_vm0, %v17043_v0 }
 0x14b   : > { %v18301_v49 = vpop.f32.mrb[24].mxu0  ;;  %v18303_v14 = vpop.f32.mrb[24].mxu1  ;;  %16482 = vmatprep.subr.mxu0 %v17043_v0  ;;  %16487 = vmatprep.subr.mxu1 %v17043_v0 }
 0x14c   : > { %v15946_v17 = vpop.f32.mrb[25].mxu0  ;;  %v15951_v59 = vpop.f32.mrb[25].mxu1  ;;  %16475 = vmatmul.mubr.msk.f32.vlgmr.msra.gmra.mrb[130].mxu0 %vm628_vm1, %v16848_v2  ;;  %16480 = vmatmul.mubr.msk.f32.vlgmr.msra.gmra.mrb[130].mxu1 %vm628_vm1, %v16849_v34 }
 0x14d   : > { %16483 = vmatpush3.msra.mxu0 %v10041_v63  ;;  %16488 = vmatpush3.msra.mxu1 %v10042_v43  ;;  %v16857_v63 = vld [vmem:[%s17228_s28 + $0x58] sm:$0xff]  ;;  %v10051_v43 = vld [vmem:[%s17195_s13 + $0x70] sm:$0xff] }
 0x14e   : > { %16484 = vmatprep.mubr.msk.f32.mxu0 %vm17044_vm0, %v17043_v0  ;;  %16489 = vmatprep.mubr.msk.f32.mxu1 %vm17044_vm0, %v17043_v0  ;;  %v10052_v17 = vld [vmem:[%s17195_s13 + $0x78] sm:$0xff] }
 0x14f   : > { %v18317_v18 = vpop.f32.mrb[26].mxu0  ;;  %v18319_v62 = vpop.f32.mrb[26].mxu1  ;;  %16492 = vmatprep.subr.mxu0 %v17043_v0  ;;  %16497 = vmatprep.subr.mxu1 %v17043_v0 }
 0x150   : > { %v15956_v3 = vpop.f32.mrb[27].mxu0  ;;  %v15961_v29 = vpop.f32.mrb[27].mxu1  ;;  %16485 = vmatmul.mubr.msk.f32.vlgmr.msra.gmra.mrb[132].mxu0 %vm628_vm1, %v16850_v37  ;;  %16490 = vmatmul.mubr.msk.f32.vlgmr.msra.gmra.mrb[132].mxu1 %vm628_vm1, %v16851_v23  ;;  %v10054_v37 = vld [vmem:[%s17195_s13 + $0x88] sm:$0xff] }
 0x151   : > { %16493 = vmatpush3.msra.mxu0 %v10043_v40  ;;  %16498 = vmatpush3.msra.mxu1 %v10044_v12  ;;  %v16858_v12 = vld [vmem:[%s17228_s28 + $0x60] sm:$0xff]  ;;  %v16859_v3 = vld [vmem:[%s17228_s28 + $0x68] sm:$0xff] }
 0x152   : > { %16494 = vmatprep.mubr.msk.f32.mxu0 %vm17044_vm0, %v17043_v0  ;;  %16499 = vmatprep.mubr.msk.f32.mxu1 %vm17044_vm0, %v17043_v0  ;;  %v10053_v29 = vld [vmem:[%s17195_s13 + $0x80] sm:$0xff] }
 0x153   : > { %v18333_v58 = vpop.f32.mrb[28].mxu0  ;;  %v18335_v61 = vpop.f32.mrb[28].mxu1  ;;  %16502 = vmatprep.subr.mxu0 %v17043_v0  ;;  %16507 = vmatprep.subr.mxu1 %v17043_v0 }
 0x154   : > { %v15966_v6 = vpop.f32.mrb[29].mxu0  ;;  %v15971_v19 = vpop.f32.mrb[29].mxu1  ;;  %16495 = vmatmul.mubr.msk.f32.vlgmr.msra.gmra.mrb[134].mxu0 %vm628_vm1, %v16852_v28  ;;  %16500 = vmatmul.mubr.msk.f32.vlgmr.msra.gmra.mrb[134].mxu1 %vm628_vm1, %v16853_v31  ;;  %v16861_v28 = vld [vmem:[%s17228_s28 + $0x78] sm:$0xff]  ;;  %v10055_v31 = vld [vmem:[%s17195_s13 + $0x90] sm:$0xff] }
 0x155   : > { %16503 = vmatpush3.msra.mxu0 %v10045_v30  ;;  %16508 = vmatpush3.msra.mxu1 %v10046_v50  ;;  %v16860_v19 = vld [vmem:[%s17228_s28 + $0x70] sm:$0xff] }
 0x156   : > { %16504 = vmatprep.mubr.msk.f32.mxu0 %vm17044_vm0, %v17043_v0  ;;  %16509 = vmatprep.mubr.msk.f32.mxu1 %vm17044_vm0, %v17043_v0 }
 0x157   : > { %v18349_v55 = vpop.f32.mrb[30].mxu0  ;;  %v18351_v11 = vpop.f32.mrb[30].mxu1  ;;  %16512 = vmatprep.subr.mxu0 %v17043_v0  ;;  %16517 = vmatprep.subr.mxu1 %v17043_v0 }
 0x158   : > { %v15976_v25 = vpop.f32.mrb[31].mxu0  ;;  %v15981_v32 = vpop.f32.mrb[31].mxu1  ;;  %16505 = vmatmul.mubr.msk.f32.vlgmr.msra.gmra.mrb[136].mxu0 %vm628_vm1, %v16854_v22  ;;  %16510 = vmatmul.mubr.msk.f32.vlgmr.msra.gmra.mrb[136].mxu1 %vm628_vm1, %v16855_v1  ;;  %v16862_v1 = vld [vmem:[%s17228_s28 + $0x80] sm:$0xff] }
 0x159   : > { %16513 = vmatpush3.msra.mxu0 %v10047_v42  ;;  %16518 = vmatpush3.msra.mxu1 %v10048_v45  ;;  %v10056_v42 = vld [vmem:[%s17195_s13 + $0x98] sm:$0xff] }
 0x15a   : > { %16514 = vmatprep.mubr.msk.f32.mxu0 %vm17044_vm0, %v17043_v0  ;;  %16519 = vmatprep.mubr.msk.f32.mxu1 %vm17044_vm0, %v17043_v0 }
 0x15b   : > { %v18365_v38 = vpop.f32.mrb[32].mxu0  ;;  %v18367_v36 = vpop.f32.mrb[32].mxu1  ;;  %16522 = vmatprep.subr.mxu0 %v17043_v0  ;;  %16527 = vmatprep.subr.mxu1 %v17043_v0 }
 0x15c   : > { %v15986_v48 = vpop.f32.mrb[33].mxu0  ;;  %v15991_v33 = vpop.f32.mrb[33].mxu1  ;;  %16515 = vmatmul.mubr.msk.f32.vlgmr.msra.gmra.mrb[138].mxu0 %vm628_vm1, %v16856_v56  ;;  %16520 = vmatmul.mubr.msk.f32.vlgmr.msra.gmra.mrb[138].mxu1 %vm628_vm1, %v16857_v63 }
 0x15d   : > { %16523 = vmatpush3.msra.mxu0 %v10049_v9  ;;  %16528 = vmatpush3.msra.mxu1 %v10050_v5  ;;  %v16863_v9 = vld [vmem:[%s17228_s28 + $0x88] sm:$0xff]  ;;  %v10057_v5 = vld [vmem:[%s17195_s13 + $0xa0] sm:$0xff] }
 0x15e   : > { %16524 = vmatprep.mubr.msk.f32.mxu0 %vm17044_vm0, %v17043_v0  ;;  %16529 = vmatprep.mubr.msk.f32.mxu1 %vm17044_vm0, %v17043_v0  ;;  %v10058_v48 = vld [vmem:[%s17195_s13 + $0xa8] sm:$0xff] }
 0x15f   : > { %v18381_v59 = vpop.f32.mrb[34].mxu0  ;;  %v18383_v2 = vpop.f32.mrb[34].mxu1  ;;  %16532 = vmatprep.subr.mxu0 %v17043_v0  ;;  %16537 = vmatprep.subr.mxu1 %v17043_v0 }
 0x160   : > { %v15996_v34 = vpop.f32.mrb[35].mxu0  ;;  %v16001_v40 = vpop.f32.mrb[35].mxu1  ;;  %16525 = vmatmul.mubr.msk.f32.vlgmr.msra.gmra.mrb[140].mxu0 %vm628_vm1, %v16858_v12  ;;  %16530 = vmatmul.mubr.msk.f32.vlgmr.msra.gmra.mrb[140].mxu1 %vm628_vm1, %v16859_v3  ;;  %v10060_v12 = vld [vmem:[%s17195_s13 + $0xb8] sm:$0xff] }
 0x161   : > { %16533 = vmatpush3.msra.mxu0 %v10051_v43  ;;  %16538 = vmatpush3.msra.mxu1 %v10052_v17  ;;  %v16864_v17 = vld [vmem:[%s17228_s28 + $0x90] sm:$0xff]  ;;  %v16865_v34 = vld [vmem:[%s17228_s28 + $0x98] sm:$0xff] }
 0x162   : > { %16534 = vmatprep.mubr.msk.f32.mxu0 %vm17044_vm0, %v17043_v0  ;;  %16539 = vmatprep.mubr.msk.f32.mxu1 %vm17044_vm0, %v17043_v0  ;;  %v10059_v40 = vld [vmem:[%s17195_s13 + $0xb0] sm:$0xff] }
 0x163   : > { %v18397_v23 = vpop.f32.mrb[36].mxu0  ;;  %v18399_v30 = vpop.f32.mrb[36].mxu1  ;;  %16542 = vmatprep.subr.mxu0 %v17043_v0  ;;  %16547 = vmatprep.subr.mxu1 %v17043_v0 }
 0x164   : > { %v16006_v50 = vpop.f32.mrb[37].mxu0  ;;  %v16011_v6 = vpop.f32.mrb[37].mxu1  ;;  %16535 = vmatmul.mubr.msk.f32.vlgmr.msra.gmra.mrb[142].mxu0 %vm628_vm1, %v16860_v19  ;;  %16540 = vmatmul.mubr.msk.f32.vlgmr.msra.gmra.mrb[142].mxu1 %vm628_vm1, %v16861_v28  ;;  %v16867_v19 = vld [vmem:[%s17228_s28 + $0xa8] sm:$0xff]  ;;  %v10061_v28 = vld [vmem:[%s17195_s13 + $0xc0] sm:$0xff] }
 0x165   : > { %16543 = vmatpush3.msra.mxu0 %v10053_v29  ;;  %16548 = vmatpush3.msra.mxu1 %v10054_v37  ;;  %v16866_v6 = vld [vmem:[%s17228_s28 + $0xa0] sm:$0xff] }
 0x166   : > { %16544 = vmatprep.mubr.msk.f32.mxu0 %vm17044_vm0, %v17043_v0  ;;  %16549 = vmatprep.mubr.msk.f32.mxu1 %vm17044_vm0, %v17043_v0 }
 0x167   : > { %v18413_v45 = vpop.f32.mrb[38].mxu0  ;;  %v18415_v25 = vpop.f32.mrb[38].mxu1  ;;  %16552 = vmatprep.subr.mxu0 %v17043_v0  ;;  %16557 = vmatprep.subr.mxu1 %v17043_v0 }
 0x168   : > { %v16016_v32 = vpop.f32.mrb[39].mxu0  ;;  %v16021_v22 = vpop.f32.mrb[39].mxu1  ;;  %16545 = vmatmul.mubr.msk.f32.vlgmr.msra.gmra.mrb[144].mxu0 %vm628_vm1, %v16862_v1  ;;  %16550 = vmatmul.mubr.msk.f32.vlgmr.msra.gmra.mrb[144].mxu1 %vm628_vm1, %v16863_v9  ;;  %v16868_v9 = vld [vmem:[%s17228_s28 + $0xb0] sm:$0xff] }
 0x169   : > { %16553 = vmatpush3.msra.mxu0 %v10055_v31  ;;  %16558 = vmatpush3.msra.mxu1 %v10056_v42  ;;  %v10062_v31 = vld [vmem:[%s17195_s13 + $0xc8] sm:$0xff] }
 0x16a   : > { %16554 = vmatprep.mubr.msk.f32.mxu0 %vm17044_vm0, %v17043_v0  ;;  %16559 = vmatprep.mubr.msk.f32.mxu1 %vm17044_vm0, %v17043_v0 }
 0x16b   : > { %v18429_v33 = vpop.f32.mrb[40].mxu0  ;;  %v18431_v56 = vpop.f32.mrb[40].mxu1  ;;  %16562 = vmatprep.subr.mxu0 %v17043_v0  ;;  %16567 = vmatprep.subr.mxu1 %v17043_v0 }
 0x16c   : > { %v16026_v63 = vpop.f32.mrb[41].mxu0  ;;  %v16031_v43 = vpop.f32.mrb[41].mxu1  ;;  %16555 = vmatmul.mubr.msk.f32.vlgmr.msra.gmra.mrb[146].mxu0 %vm628_vm1, %v16864_v17  ;;  %16560 = vmatmul.mubr.msk.f32.vlgmr.msra.gmra.mrb[146].mxu1 %vm628_vm1, %v16865_v34 }
 0x16d   : > { %16563 = vmatpush3.msra.mxu0 %v10057_v5  ;;  %16568 = vmatpush3.msra.mxu1 %v10058_v48  ;;  %v16869_v5 = vld [vmem:[%s17228_s28 + $0xb8] sm:$0xff]  ;;  %v10063_v48 = vld [vmem:[%s17195_s13 + $0xd0] sm:$0xff] }
 0x16e   : > { %16564 = vmatprep.mubr.msk.f32.mxu0 %vm17044_vm0, %v17043_v0  ;;  %16569 = vmatprep.mubr.msk.f32.mxu1 %vm17044_vm0, %v17043_v0  ;;  %v10064_v63 = vld [vmem:[%s17195_s13 + $0xd8] sm:$0xff] }
 0x16f   : > { %v18445_v3 = vpop.f32.mrb[42].mxu0  ;;  %v18447_v29 = vpop.f32.mrb[42].mxu1  ;;  %16572 = vmatprep.subr.mxu0 %v17043_v0  ;;  %16577 = vmatprep.subr.mxu1 %v17043_v0 }
 0x170   : > { %v16036_v37 = vpop.f32.mrb[43].mxu0  ;;  %v16041_v50 = vpop.f32.mrb[43].mxu1  ;;  %16565 = vmatmul.mubr.msk.f32.vlgmr.msra.gmra.mrb[148].mxu0 %vm628_vm1, %v16866_v6  ;;  %16570 = vmatmul.mubr.msk.f32.vlgmr.msra.gmra.mrb[148].mxu1 %vm628_vm1, %v16867_v19  ;;  %v10066_v6 = vld [vmem:[%s17195_s13 + $0xe8] sm:$0xff] }
 0x171   : > { %16573 = vmatpush3.msra.mxu0 %v10059_v40  ;;  %16578 = vmatpush3.msra.mxu1 %v10060_v12  ;;  %v16870_v12 = vld [vmem:[%s17228_s28 + $0xc0] sm:$0xff]  ;;  %v16871_v37 = vld [vmem:[%s17228_s28 + $0xc8] sm:$0xff] }
 0x172   : > { %16574 = vmatprep.mubr.msk.f32.mxu0 %vm17044_vm0, %v17043_v0  ;;  %16579 = vmatprep.mubr.msk.f32.mxu1 %vm17044_vm0, %v17043_v0  ;;  %v10065_v50 = vld [vmem:[%s17195_s13 + $0xe0] sm:$0xff] }
 0x173   : > { %v18461_v42 = vpop.f32.mrb[44].mxu0  ;;  %v18463_v32 = vpop.f32.mrb[44].mxu1  ;;  %16582 = vmatprep.subr.mxu0 %v17043_v0  ;;  %16587 = vmatprep.subr.mxu1 %v17043_v0 }
 0x174   : > { %v16046_v22 = vpop.f32.mrb[45].mxu0  ;;  %v16051_v1 = vpop.f32.mrb[45].mxu1  ;;  %16575 = vmatmul.mubr.msk.f32.vlgmr.msra.gmra.mrb[150].mxu0 %vm628_vm1, %v16868_v9  ;;  %16580 = vmatmul.mubr.msk.f32.vlgmr.msra.gmra.mrb[150].mxu1 %vm628_vm1, %v16869_v5  ;;  %v16873_v9 = vld [vmem:[%s17228_s28 + $0xd8] sm:$0xff]  ;;  %v10067_v5 = vld [vmem:[%s17195_s13 + $0xf0] sm:$0xff] }
 0x175   : > { %16583 = vmatpush3.msra.mxu0 %v10061_v28  ;;  %16588 = vmatpush3.msra.mxu1 %v10062_v31  ;;  %v16872_v1 = vld [vmem:[%s17228_s28 + $0xd0] sm:$0xff] }
 0x176   : > { %16584 = vmatprep.mubr.msk.f32.mxu0 %vm17044_vm0, %v17043_v0  ;;  %16589 = vmatprep.mubr.msk.f32.mxu1 %vm17044_vm0, %v17043_v0 }
 0x177   : > { %v18477_v43 = vpop.f32.mrb[46].mxu0  ;;  %v18479_v17 = vpop.f32.mrb[46].mxu1  ;;  %16592 = vmatprep.subr.mxu0 %v17043_v0  ;;  %16597 = vmatprep.subr.mxu1 %v17043_v0 }
 0x178   : > { %v16056_v34 = vpop.f32.mrb[47].mxu0  ;;  %v16061_v40 = vpop.f32.mrb[47].mxu1  ;;  %16585 = vmatmul.mubr.msk.f32.vlgmr.msra.gmra.mrb[152].mxu0 %vm628_vm1, %v16870_v12  ;;  %16590 = vmatmul.mubr.msk.f32.vlgmr.msra.gmra.mrb[152].mxu1 %vm628_vm1, %v16871_v37  ;;  %v16874_v37 = vld [vmem:[%s17228_s28 + $0xe0] sm:$0xff] }
 0x179   : > { %16593 = vmatpush3.msra.mxu0 %v10063_v48  ;;  %16598 = vmatpush3.msra.mxu1 %v10064_v63  ;;  %v10068_v48 = vld [vmem:[%s17195_s13 + $0xf8] sm:$0xff] }
 0x17a   : > { %16594 = vmatprep.mubr.msk.f32.mxu0 %vm17044_vm0, %v17043_v0  ;;  %16599 = vmatprep.mubr.msk.f32.mxu1 %vm17044_vm0, %v17043_v0 }
 0x17b   : > { %v18493_v19 = vpop.f32.mrb[48].mxu0  ;;  %v18495_v28 = vpop.f32.mrb[48].mxu1  ;;  %16602 = vmatprep.subr.mxu0 %v17043_v0  ;;  %16607 = vmatprep.subr.mxu1 %v17043_v0 }
 0x17c   : > { %19140 = vst [vmem:[#allocation12_spill] sm:$0xff] %v18495_v28  ;;  %v16066_v31 = vpop.f32.mrb[49].mxu0  ;;  %v16071_v22 = vpop.f32.mrb[49].mxu1  ;;  %16595 = vmatmul.mubr.msk.f32.vlgmr.msra.gmra.mrb[154].mxu0 %vm628_vm1, %v16872_v1  ;;  %16600 = vmatmul.mubr.msk.f32.vlgmr.msra.gmra.mrb[154].mxu1 %vm628_vm1, %v16873_v9 }
 0x17d   : > { %16603 = vmatpush3.msra.mxu0 %v10065_v50  ;;  %16608 = vmatpush3.msra.mxu1 %v10066_v6  ;;  %v16875_v50 = vld [vmem:[%s17228_s28 + $0xe8] sm:$0xff]  ;;  %v10069_v6 = vld [vmem:[%s17195_s13 + $0x100] sm:$0xff] }
 0x17e   : > { %16604 = vmatprep.mubr.msk.f32.mxu0 %vm17044_vm0, %v17043_v0  ;;  %16609 = vmatprep.mubr.msk.f32.mxu1 %vm17044_vm0, %v17043_v0  ;;  %v10070_v31 = vld [vmem:[%s17195_s13 + $0x108] sm:$0xff] }
 0x17f   : > { %v18509_v63 = vpop.f32.mrb[50].mxu0  ;;  %v18511_v34 = vpop.f32.mrb[50].mxu1  ;;  %16612 = vmatprep.subr.mxu0 %v17043_v0  ;;  %16617 = vmatprep.subr.mxu1 %v17043_v0 }
 0x180   : > { %19141 = vst [vmem:[#allocation13_spill] sm:$0xff] %v18509_v63  ;;  %19142 = vst [vmem:[#allocation14_spill] sm:$0xff] %v18511_v34  ;;  %v16076_v40 = vpop.f32.mrb[51].mxu0  ;;  %v16081_v12 = vpop.f32.mrb[51].mxu1  ;;  %16605 = vmatmul.mubr.msk.f32.vlgmr.msra.gmra.mrb[156].mxu0 %vm628_vm1, %v16874_v37  ;;  %16610 = vmatmul.mubr.msk.f32.vlgmr.msra.gmra.mrb[156].mxu1 %vm628_vm1, %v16875_v50  ;;  %v10072_v37 = vld [vmem:[%s17195_s13 + $0x118] sm:$0xff] }
 0x181   : > { %16613 = vmatpush3.msra.mxu0 %v10067_v5  ;;  %16618 = vmatpush3.msra.mxu1 %v10068_v48  ;;  %v16876_v48 = vld [vmem:[%s17228_s28 + $0xf0] sm:$0xff]  ;;  %v16877_v40 = vld [vmem:[%s17228_s28 + $0xf8] sm:$0xff] }
 0x182   : > { %16614 = vmatprep.mubr.msk.f32.mxu0 %vm17044_vm0, %v17043_v0  ;;  %16619 = vmatprep.mubr.msk.f32.mxu1 %vm17044_vm0, %v17043_v0  ;;  %v10071_v12 = vld [vmem:[%s17195_s13 + $0x110] sm:$0xff] }
 0x183   : > { %v18525_v22 = vpop.f32.mrb[52].mxu0  ;;  %v18527_v1 = vpop.f32.mrb[52].mxu1  ;;  %16622 = vmatprep.subr.mxu0 %v17043_v0  ;;  %16627 = vmatprep.subr.mxu1 %v17043_v0 }
 0x184   : > { %19143 = vst [vmem:[#allocation15_spill] sm:$0xff] %v18525_v22  ;;  %19144 = vst [vmem:[#allocation16_spill] sm:$0xff] %v18527_v1  ;;  %v16086_v9 = vpop.f32.mrb[53].mxu0  ;;  %v16091_v5 = vpop.f32.mrb[53].mxu1  ;;  %16615 = vmatmul.mubr.msk.f32.vlgmr.msra.gmra.mrb[158].mxu0 %vm628_vm1, %v16876_v48  ;;  %16620 = vmatmul.mubr.msk.f32.vlgmr.msra.gmra.mrb[158].mxu1 %vm628_vm1, %v16877_v40  ;;  %v16879_v48 = vld [vmem:[%s17228_s28 + $0x108] sm:$0xff]  ;;  %v10073_v40 = vld [vmem:[%s17195_s13 + $0x120] sm:$0xff] }
 0x185   : > { %16623 = vmatpush3.msra.mxu0 %v10069_v6  ;;  %16628 = vmatpush3.msra.mxu1 %v10070_v31  ;;  %v16878_v5 = vld [vmem:[%s17228_s28 + $0x100] sm:$0xff]  ;;  %v16889_v1 = vld [vmem:[%s17228_s28 + $0x158] sm:$0xff] }
 0x186   : > { %16624 = vmatprep.mubr.msk.f32.mxu0 %vm17044_vm0, %v17043_v0  ;;  %16629 = vmatprep.mubr.msk.f32.mxu1 %vm17044_vm0, %v17043_v0 }
 0x187   : > { %v18541_v50 = vpop.f32.mrb[54].mxu0  ;;  %v18543_v9 = vpop.f32.mrb[54].mxu1  ;;  %16632 = vmatprep.subr.mxu0 %v17043_v0  ;;  %16637 = vmatprep.subr.mxu1 %v17043_v0 }
 0x188   : > { %19145 = vst [vmem:[#allocation17_spill] sm:$0xff] %v18541_v50  ;;  %19146 = vst [vmem:[#allocation18_spill] sm:$0xff] %v18543_v9  ;;  %v16096_v6 = vpop.f32.mrb[55].mxu0  ;;  %v16101_v31 = vpop.f32.mrb[55].mxu1  ;;  %16625 = vmatmul.mubr.msk.f32.vlgmr.msra.gmra.mrb[160].mxu0 %vm628_vm1, %v16878_v5  ;;  %16630 = vmatmul.mubr.msk.f32.vlgmr.msra.gmra.mrb[160].mxu1 %vm628_vm1, %v16879_v48  ;;  %v16880_v5 = vld [vmem:[%s17228_s28 + $0x110] sm:$0xff]  ;;  %v16881_v48 = vld [vmem:[%s17228_s28 + $0x118] sm:$0xff] }
 0x189   : > { %16633 = vmatpush3.msra.mxu0 %v10071_v12  ;;  %16638 = vmatpush3.msra.mxu1 %v10072_v37  ;;  %v10074_v6 = vld [vmem:[%s17195_s13 + $0x128] sm:$0xff]  ;;  %v16888_v50 = vld [vmem:[%s17228_s28 + $0x150] sm:$0xff] }
 0x18a   : > { %16634 = vmatprep.mubr.msk.f32.mxu0 %vm17044_vm0, %v17043_v0  ;;  %16639 = vmatprep.mubr.msk.f32.mxu1 %vm17044_vm0, %v17043_v0 }
 0x18b   : > { %v18557_v31 = vpop.f32.mrb[56].mxu0  ;;  %v18559_v9 = vpop.f32.mrb[56].mxu1  ;;  %16642 = vmatprep.subr.mxu0 %v17043_v0  ;;  %16647 = vmatprep.subr.mxu1 %v17043_v0 }
 0x18c   : > { %19147 = vst [vmem:[#allocation19_spill] sm:$0xff] %v18557_v31  ;;  %19148 = vst [vmem:[#allocation20_spill] sm:$0xff] %v18559_v9  ;;  %v16106_v12 = vpop.f32.mrb[57].mxu0  ;;  %v16111_v37 = vpop.f32.mrb[57].mxu1  ;;  %16635 = vmatmul.mubr.msk.f32.vlgmr.msra.gmra.mrb[162].mxu0 %vm628_vm1, %v16880_v5  ;;  %16640 = vmatmul.mubr.msk.f32.vlgmr.msra.gmra.mrb[162].mxu1 %vm628_vm1, %v16881_v48  ;;  %v10075_v9 = vld [vmem:[%s17195_s13 + $0x130] sm:$0xff]  ;;  %v16882_v5 = vld [vmem:[%s17228_s28 + $0x120] sm:$0xff] }
 0x18d   : > { %16643 = vmatpush3.msra.mxu0 %v10073_v40  ;;  %16648 = vmatpush3.msra.mxu1 %v10074_v6  ;;  %v10076_v12 = vld [vmem:[%s17195_s13 + $0x138] sm:$0xff]  ;;  %v16883_v48 = vld [vmem:[%s17228_s28 + $0x128] sm:$0xff] }
 0x18e   : > { %16644 = vmatprep.mubr.msk.f32.mxu0 %vm17044_vm0, %v17043_v0  ;;  %16649 = vmatprep.mubr.msk.f32.mxu1 %vm17044_vm0, %v17043_v0 }
 0x18f   : > { %v18573_v37 = vpop.f32.mrb[58].mxu0  ;;  %v18575_v31 = vpop.f32.mrb[58].mxu1  ;;  %16652 = vmatprep.subr.mxu0 %v17043_v0  ;;  %16657 = vmatprep.subr.mxu1 %v17043_v0 }
 0x190   : > { %19149 = vst [vmem:[#allocation21_spill] sm:$0xff] %v18573_v37  ;;  %19150 = vst [vmem:[#allocation22_spill] sm:$0xff] %v18575_v31  ;;  %v16116_v40 = vpop.f32.mrb[59].mxu0  ;;  %v16121_v6 = vpop.f32.mrb[59].mxu1  ;;  %16645 = vmatmul.mubr.msk.f32.vlgmr.msra.gmra.mrb[164].mxu0 %vm628_vm1, %v16882_v5  ;;  %16650 = vmatmul.mubr.msk.f32.vlgmr.msra.gmra.mrb[164].mxu1 %vm628_vm1, %v16883_v48  ;;  %v10077_v31 = vld [vmem:[%s17195_s13 + $0x140] sm:$0xff]  ;;  %v16884_v5 = vld [vmem:[%s17228_s28 + $0x130] sm:$0xff] }
 0x191   : > { %16653 = vmatpush3.msra.mxu0 %v10075_v9  ;;  %16658 = vmatpush3.msra.mxu1 %v10076_v12  ;;  %v10078_v40 = vld [vmem:[%s17195_s13 + $0x148] sm:$0xff]  ;;  %v16885_v48 = vld [vmem:[%s17228_s28 + $0x138] sm:$0xff] }
 0x192   : > { %16654 = vmatprep.mubr.msk.f32.mxu0 %vm17044_vm0, %v17043_v0  ;;  %16659 = vmatprep.mubr.msk.f32.mxu1 %vm17044_vm0, %v17043_v0 }
 0x193   : > { %v18589_v6 = vpop.f32.mrb[60].mxu0  ;;  %v18591_v37 = vpop.f32.mrb[60].mxu1  ;;  %16662 = vmatprep.subr.mxu0 %v17043_v0  ;;  %16667 = vmatprep.subr.mxu1 %v17043_v0 }
 0x194   : > { %19151 = vst [vmem:[#allocation23_spill] sm:$0xff] %v18589_v6  ;;  %19152 = vst [vmem:[#allocation24_spill] sm:$0xff] %v18591_v37  ;;  %v16126_v9 = vpop.f32.mrb[61].mxu0  ;;  %v16131_v12 = vpop.f32.mrb[61].mxu1  ;;  %16655 = vmatmul.mubr.msk.f32.vlgmr.msra.gmra.mrb[166].mxu0 %vm628_vm1, %v16884_v5  ;;  %16660 = vmatmul.mubr.msk.f32.vlgmr.msra.gmra.mrb[166].mxu1 %vm628_vm1, %v16885_v48  ;;  %v10079_v37 = vld [vmem:[%s17195_s13 + $0x150] sm:$0xff]  ;;  %v16886_v5 = vld [vmem:[%s17228_s28 + $0x140] sm:$0xff] }
 0x195   : > { %16663 = vmatpush3.msra.mxu0 %v10077_v31  ;;  %16668 = vmatpush3.msra.mxu1 %v10078_v40  ;;  %v10080_v9 = vld [vmem:[%s17195_s13 + $0x158] sm:$0xff]  ;;  %v16887_v48 = vld [vmem:[%s17228_s28 + $0x148] sm:$0xff] }
 0x196   : > { %16664 = vmatprep.mubr.msk.f32.mxu0 %vm17044_vm0, %v17043_v0  ;;  %16669 = vmatprep.mubr.msk.f32.mxu1 %vm17044_vm0, %v17043_v0 }
 0x197   : > { %v18605_v12 = vpop.f32.mrb[62].mxu0  ;;  %v18607_v6 = vpop.f32.mrb[62].mxu1  ;;  %16672 = vmatprep.subr.mxu0 %v17043_v0  ;;  %16677 = vmatprep.subr.mxu1 %v17043_v0 }
 0x198   : > { %19153 = vst [vmem:[#allocation25_spill] sm:$0xff] %v18605_v12  ;;  %19154 = vst [vmem:[#allocation26_spill] sm:$0xff] %v18607_v6  ;;  %v16136_v31 = vpop.f32.mrb[63].mxu0  ;;  %v16141_v40 = vpop.f32.mrb[63].mxu1  ;;  %16665 = vmatmul.mubr.msk.f32.vlgmr.msra.gmra.mrb[168].mxu0 %vm628_vm1, %v16886_v5  ;;  %16670 = vmatmul.mubr.msk.f32.vlgmr.msra.gmra.mrb[168].mxu1 %vm628_vm1, %v16887_v48  ;;  %v10081_v6 = vld [vmem:[%s17195_s13 + $0x160] sm:$0xff] }
 0x199   : > { %16673 = vmatpush3.msra.mxu0 %v10079_v37  ;;  %16678 = vmatpush3.msra.mxu1 %v10080_v9  ;;  %v10082_v31 = vld [vmem:[%s17195_s13 + $0x168] sm:$0xff] }
 0x19a   : > { %16674 = vmatprep.mubr.msk.f32.mxu0 %vm17044_vm0, %v17043_v0  ;;  %16679 = vmatprep.mubr.msk.f32.mxu1 %vm17044_vm0, %v17043_v0 }
 0x19b   : > { %v5434_v40 = vpop.f32.mrb[64].mxu0  ;;  %v5507_v12 = vpop.f32.mrb[64].mxu1  ;;  %16682 = vmatprep.subr.mxu0 %v17043_v0  ;;  %16687 = vmatprep.subr.mxu1 %v17043_v0 }
 0x19c   : > { %v14901_v37 = vadd.f32 %v5434_v40, %v18109_v15  ;;  %v14902_v9 = vadd.f32 %v5507_v12, %v18111_v21  ;;  %v16146_v5 = vpop.f32.mrb[65].mxu0  ;;  %v16151_v48 = vpop.f32.mrb[65].mxu1  ;;  %16675 = vmatmul.mubr.msk.f32.vlgmr.msra.gmra.mrb[170].mxu0 %vm628_vm1, %v16888_v50  ;;  %16680 = vmatmul.mubr.msk.f32.vlgmr.msra.gmra.mrb[170].mxu1 %vm628_vm1, %v16889_v1  ;;  %v10083_v50 = vld [vmem:[%s17195_s13 + $0x170] sm:$0xff]  ;;  %v10084_v12 = vld [vmem:[%s17195_s13 + $0x178] sm:$0xff] }
 0x19d   : > { %16683 = vmatpush3.msra.mxu0 %v10081_v6  ;;  %16688 = vmatpush3.msra.mxu1 %v10082_v31  ;;  %v16890_v5 = vld [vmem:[%s17228_s28 + $0x160] sm:$0xff]  ;;  %v16891_v48 = vld [vmem:[%s17228_s28 + $0x168] sm:$0xff] }
 0x19e   : > { %14965 = vst [vmem:[%s18630_s18] sm:$0xff] %v14901_v37  ;;  %14966 = vst [vmem:[%s18630_s18 + $0x8] sm:$0xff] %v14902_v9  ;;  %16684 = vmatprep.mubr.msk.f32.mxu0 %vm17044_vm0, %v17043_v0  ;;  %16689 = vmatprep.mubr.msk.f32.mxu1 %vm17044_vm0, %v17043_v0 }
 0x19f   : > { %v5580_v1 = vpop.f32.mrb[66].mxu0  ;;  %v5653_v6 = vpop.f32.mrb[66].mxu1  ;;  %16692 = vmatprep.subr.mxu0 %v17043_v0  ;;  %16697 = vmatprep.subr.mxu1 %v17043_v0 }
 0x1a0   : > { %v14903_v31 = vadd.f32 %v5580_v1, %v18125_v46  ;;  %v14904_v40 = vadd.f32 %v5653_v6, %v18127_v52  ;;  %v16156_v37 = vpop.f32.mrb[67].mxu0  ;;  %v16161_v9 = vpop.f32.mrb[67].mxu1  ;;  %16685 = vmatmul.mubr.msk.f32.vlgmr.msra.gmra.mrb[172].mxu0 %vm628_vm1, %v16890_v5  ;;  %16690 = vmatmul.mubr.msk.f32.vlgmr.msra.gmra.mrb[172].mxu1 %vm628_vm1, %v16891_v48  ;;  %v10085_v1 = vld [vmem:[%s17195_s13 + $0x180] sm:$0xff]  ;;  %v10086_v6 = vld [vmem:[%s17195_s13 + $0x188] sm:$0xff]  ;;  %v16892_v5 = vld [vmem:[%s17228_s28 + $0x170] sm:$0xff] }
 0x1a1   : > { %16693 = vmatpush3.msra.mxu0 %v10083_v50  ;;  %16698 = vmatpush3.msra.mxu1 %v10084_v12  ;;  %v16893_v48 = vld [vmem:[%s17228_s28 + $0x178] sm:$0xff] }
 0x1a2   : > { %14967 = vst [vmem:[%s18630_s18 + $0x10] sm:$0xff] %v14903_v31  ;;  %14968 = vst [vmem:[%s18630_s18 + $0x18] sm:$0xff] %v14904_v40  ;;  %16694 = vmatprep.mubr.msk.f32.mxu0 %vm17044_vm0, %v17043_v0  ;;  %16699 = vmatprep.mubr.msk.f32.mxu1 %vm17044_vm0, %v17043_v0 }
 0x1a3   : > { %v5726_v37 = vpop.f32.mrb[68].mxu0  ;;  %v5799_v9 = vpop.f32.mrb[68].mxu1  ;;  %16702 = vmatprep.subr.mxu0 %v17043_v0  ;;  %16707 = vmatprep.subr.mxu1 %v17043_v0 }
 0x1a4   : > { %v14905_v50 = vadd.f32 %v5726_v37, %v18141_v53  ;;  %v14906_v12 = vadd.f32 %v5799_v9, %v18143_v27  ;;  %v16166_v31 = vpop.f32.mrb[69].mxu0  ;;  %v16171_v40 = vpop.f32.mrb[69].mxu1  ;;  %16695 = vmatmul.mubr.msk.f32.vlgmr.msra.gmra.mrb[174].mxu0 %vm628_vm1, %v16892_v5  ;;  %16700 = vmatmul.mubr.msk.f32.vlgmr.msra.gmra.mrb[174].mxu1 %vm628_vm1, %v16893_v48  ;;  %v10087_v37 = vld [vmem:[%s17195_s13 + $0x190] sm:$0xff]  ;;  %v10088_v9 = vld [vmem:[%s17195_s13 + $0x198] sm:$0xff]  ;;  %v16894_v5 = vld [vmem:[%s17228_s28 + $0x180] sm:$0xff] }
 0x1a5   : > { %16703 = vmatpush3.msra.mxu0 %v10085_v1  ;;  %16708 = vmatpush3.msra.mxu1 %v10086_v6  ;;  %v16895_v48 = vld [vmem:[%s17228_s28 + $0x188] sm:$0xff] }
 0x1a6   : > { %14969 = vst [vmem:[%s18630_s18 + $0x20] sm:$0xff] %v14905_v50  ;;  %14970 = vst [vmem:[%s18630_s18 + $0x28] sm:$0xff] %v14906_v12  ;;  %16704 = vmatprep.mubr.msk.f32.mxu0 %vm17044_vm0, %v17043_v0  ;;  %16709 = vmatprep.mubr.msk.f32.mxu1 %vm17044_vm0, %v17043_v0 }
 0x1a7   : > { %v5872_v31 = vpop.f32.mrb[70].mxu0  ;;  %v5945_v40 = vpop.f32.mrb[70].mxu1  ;;  %16712 = vmatprep.subr.mxu0 %v17043_v0  ;;  %16717 = vmatprep.subr.mxu1 %v17043_v0 }
 0x1a8   : > { %v14907_v1 = vadd.f32 %v5872_v31, %v18157_v35  ;;  %v14908_v6 = vadd.f32 %v5945_v40, %v18159_v41  ;;  %v16176_v50 = vpop.f32.mrb[71].mxu0  ;;  %v16181_v12 = vpop.f32.mrb[71].mxu1  ;;  %16705 = vmatmul.mubr.msk.f32.vlgmr.msra.gmra.mrb[176].mxu0 %vm628_vm1, %v16894_v5  ;;  %16710 = vmatmul.mubr.msk.f32.vlgmr.msra.gmra.mrb[176].mxu1 %vm628_vm1, %v16895_v48  ;;  %v10089_v31 = vld [vmem:[%s17195_s13 + $0x1a0] sm:$0xff]  ;;  %v10090_v40 = vld [vmem:[%s17195_s13 + $0x1a8] sm:$0xff]  ;;  %v16896_v5 = vld [vmem:[%s17228_s28 + $0x190] sm:$0xff] }
 0x1a9   : > { %16713 = vmatpush3.msra.mxu0 %v10087_v37  ;;  %16718 = vmatpush3.msra.mxu1 %v10088_v9  ;;  %v16897_v48 = vld [vmem:[%s17228_s28 + $0x198] sm:$0xff] }
 0x1aa   : > { %14971 = vst [vmem:[%s18630_s18 + $0x30] sm:$0xff] %v14907_v1  ;;  %14972 = vst [vmem:[%s18630_s18 + $0x38] sm:$0xff] %v14908_v6  ;;  %16714 = vmatprep.mubr.msk.f32.mxu0 %vm17044_vm0, %v17043_v0  ;;  %16719 = vmatprep.mubr.msk.f32.mxu1 %vm17044_vm0, %v17043_v0 }
 0x1ab   : > { %v6018_v50 = vpop.f32.mrb[72].mxu0  ;;  %v6091_v12 = vpop.f32.mrb[72].mxu1  ;;  %16722 = vmatprep.subr.mxu0 %v17043_v0  ;;  %16727 = vmatprep.subr.mxu1 %v17043_v0 }
 0x1ac   : > { %v14909_v37 = vadd.f32 %v6018_v50, %v18173_v51  ;;  %v14910_v9 = vadd.f32 %v6091_v12, %v18175_v57  ;;  %v16186_v1 = vpop.f32.mrb[73].mxu0  ;;  %v16191_v6 = vpop.f32.mrb[73].mxu1  ;;  %16715 = vmatmul.mubr.msk.f32.vlgmr.msra.gmra.mrb[178].mxu0 %vm628_vm1, %v16896_v5  ;;  %16720 = vmatmul.mubr.msk.f32.vlgmr.msra.gmra.mrb[178].mxu1 %vm628_vm1, %v16897_v48  ;;  %v10091_v50 = vld [vmem:[%s17195_s13 + $0x1b0] sm:$0xff]  ;;  %v10092_v12 = vld [vmem:[%s17195_s13 + $0x1b8] sm:$0xff]  ;;  %v16898_v5 = vld [vmem:[%s17228_s28 + $0x1a0] sm:$0xff] }
 0x1ad   : > { %16723 = vmatpush3.msra.mxu0 %v10089_v31  ;;  %16728 = vmatpush3.msra.mxu1 %v10090_v40  ;;  %v16899_v48 = vld [vmem:[%s17228_s28 + $0x1a8] sm:$0xff] }
 0x1ae   : > { %14973 = vst [vmem:[%s18630_s18 + $0x40] sm:$0xff] %v14909_v37  ;;  %14974 = vst [vmem:[%s18630_s18 + $0x48] sm:$0xff] %v14910_v9  ;;  %16724 = vmatprep.mubr.msk.f32.mxu0 %vm17044_vm0, %v17043_v0  ;;  %16729 = vmatprep.mubr.msk.f32.mxu1 %vm17044_vm0, %v17043_v0 }
 0x1af   : > { %v6164_v1 = vpop.f32.mrb[74].mxu0  ;;  %v6237_v6 = vpop.f32.mrb[74].mxu1  ;;  %16732 = vmatprep.subr.mxu0 %v17043_v0  ;;  %16737 = vmatprep.subr.mxu1 %v17043_v0 }
 0x1b0   : > { %v14911_v31 = vadd.f32 %v6164_v1, %v18189_v4  ;;  %v14912_v40 = vadd.f32 %v6237_v6, %v18191_v10  ;;  %v16196_v37 = vpop.f32.mrb[75].mxu0  ;;  %v16201_v9 = vpop.f32.mrb[75].mxu1  ;;  %16725 = vmatmul.mubr.msk.f32.vlgmr.msra.gmra.mrb[180].mxu0 %vm628_vm1, %v16898_v5  ;;  %16730 = vmatmul.mubr.msk.f32.vlgmr.msra.gmra.mrb[180].mxu1 %vm628_vm1, %v16899_v48  ;;  %v10093_v1 = vld [vmem:[%s17195_s13 + $0x1c0] sm:$0xff]  ;;  %v10094_v6 = vld [vmem:[%s17195_s13 + $0x1c8] sm:$0xff]  ;;  %v16900_v5 = vld [vmem:[%s17228_s28 + $0x1b0] sm:$0xff] }
 0x1b1   : > { %16733 = vmatpush3.msra.mxu0 %v10091_v50  ;;  %16738 = vmatpush3.msra.mxu1 %v10092_v12  ;;  %v16901_v48 = vld [vmem:[%s17228_s28 + $0x1b8] sm:$0xff] }
 0x1b2   : > { %14975 = vst [vmem:[%s18630_s18 + $0x50] sm:$0xff] %v14911_v31  ;;  %14976 = vst [vmem:[%s18630_s18 + $0x58] sm:$0xff] %v14912_v40  ;;  %16734 = vmatprep.mubr.msk.f32.mxu0 %vm17044_vm0, %v17043_v0  ;;  %16739 = vmatprep.mubr.msk.f32.mxu1 %vm17044_vm0, %v17043_v0 }
 0x1b3   : > { %v6310_v37 = vpop.f32.mrb[76].mxu0  ;;  %v6383_v9 = vpop.f32.mrb[76].mxu1  ;;  %16742 = vmatprep.subr.mxu0 %v17043_v0  ;;  %16747 = vmatprep.subr.mxu1 %v17043_v0 }
 0x1b4   : > { %v14913_v50 = vadd.f32 %v6310_v37, %v18205_v20  ;;  %v14914_v12 = vadd.f32 %v6383_v9, %v18207_v26  ;;  %v16206_v31 = vpop.f32.mrb[77].mxu0  ;;  %v16211_v40 = vpop.f32.mrb[77].mxu1  ;;  %16735 = vmatmul.mubr.msk.f32.vlgmr.msra.gmra.mrb[182].mxu0 %vm628_vm1, %v16900_v5  ;;  %16740 = vmatmul.mubr.msk.f32.vlgmr.msra.gmra.mrb[182].mxu1 %vm628_vm1, %v16901_v48  ;;  %v10095_v37 = vld [vmem:[%s17195_s13 + $0x1d0] sm:$0xff]  ;;  %v10096_v9 = vld [vmem:[%s17195_s13 + $0x1d8] sm:$0xff]  ;;  %v16902_v5 = vld [vmem:[%s17228_s28 + $0x1c0] sm:$0xff] }
 0x1b5   : > { %16743 = vmatpush3.msra.mxu0 %v10093_v1  ;;  %16748 = vmatpush3.msra.mxu1 %v10094_v6  ;;  %v16903_v48 = vld [vmem:[%s17228_s28 + $0x1c8] sm:$0xff] }
 0x1b6   : > { %14977 = vst [vmem:[%s18630_s18 + $0x60] sm:$0xff] %v14913_v50  ;;  %14978 = vst [vmem:[%s18630_s18 + $0x68] sm:$0xff] %v14914_v12  ;;  %16744 = vmatprep.mubr.msk.f32.mxu0 %vm17044_vm0, %v17043_v0  ;;  %16749 = vmatprep.mubr.msk.f32.mxu1 %vm17044_vm0, %v17043_v0 }
 0x1b7   : > { %v6456_v31 = vpop.f32.mrb[78].mxu0  ;;  %v6529_v40 = vpop.f32.mrb[78].mxu1  ;;  %16752 = vmatprep.subr.mxu0 %v17043_v0  ;;  %16757 = vmatprep.subr.mxu1 %v17043_v0 }
 0x1b8   : > { %v14915_v1 = vadd.f32 %v6456_v31, %v18221_v39  ;;  %v14916_v6 = vadd.f32 %v6529_v40, %v18223_v47  ;;  %v16216_v50 = vpop.f32.mrb[79].mxu0  ;;  %v16221_v12 = vpop.f32.mrb[79].mxu1  ;;  %16745 = vmatmul.mubr.msk.f32.vlgmr.msra.gmra.mrb[184].mxu0 %vm628_vm1, %v16902_v5  ;;  %16750 = vmatmul.mubr.msk.f32.vlgmr.msra.gmra.mrb[184].mxu1 %vm628_vm1, %v16903_v48  ;;  %v10097_v31 = vld [vmem:[%s17195_s13 + $0x1e0] sm:$0xff]  ;;  %v10098_v40 = vld [vmem:[%s17195_s13 + $0x1e8] sm:$0xff]  ;;  %v16904_v5 = vld [vmem:[%s17228_s28 + $0x1d0] sm:$0xff] }
 0x1b9   : > { %16753 = vmatpush3.msra.mxu0 %v10095_v37  ;;  %16758 = vmatpush3.msra.mxu1 %v10096_v9  ;;  %v16905_v48 = vld [vmem:[%s17228_s28 + $0x1d8] sm:$0xff] }
 0x1ba   : > { %14979 = vst [vmem:[%s18630_s18 + $0x70] sm:$0xff] %v14915_v1  ;;  %14980 = vst [vmem:[%s18630_s18 + $0x78] sm:$0xff] %v14916_v6  ;;  %16754 = vmatprep.mubr.msk.f32.mxu0 %vm17044_vm0, %v17043_v0  ;;  %16759 = vmatprep.mubr.msk.f32.mxu1 %vm17044_vm0, %v17043_v0 }
 0x1bb   : > { %v6602_v50 = vpop.f32.mrb[80].mxu0  ;;  %v6675_v12 = vpop.f32.mrb[80].mxu1  ;;  %16762 = vmatprep.subr.mxu0 %v17043_v0  ;;  %16767 = vmatprep.subr.mxu1 %v17043_v0 }
 0x1bc   : > { %v14917_v37 = vadd.f32 %v6602_v50, %v18237_v8  ;;  %v14918_v9 = vadd.f32 %v6675_v12, %v18239_v16  ;;  %v16226_v1 = vpop.f32.mrb[81].mxu0  ;;  %v16231_v6 = vpop.f32.mrb[81].mxu1  ;;  %16755 = vmatmul.mubr.msk.f32.vlgmr.msra.gmra.mrb[186].mxu0 %vm628_vm1, %v16904_v5  ;;  %16760 = vmatmul.mubr.msk.f32.vlgmr.msra.gmra.mrb[186].mxu1 %vm628_vm1, %v16905_v48  ;;  %v10099_v50 = vld [vmem:[%s17195_s13 + $0x1f0] sm:$0xff]  ;;  %v10100_v12 = vld [vmem:[%s17195_s13 + $0x1f8] sm:$0xff]  ;;  %v16906_v5 = vld [vmem:[%s17228_s28 + $0x1e0] sm:$0xff]  ;;  %s15436_s13 = sshll.u32 %s17105_s25, 13 }
 0x1bd   : > { %16763 = vmatpush3.msra.mxu0 %v10097_v31  ;;  %16768 = vmatpush3.msra.mxu1 %v10098_v40  ;;  %v16907_v48 = vld [vmem:[%s17228_s28 + $0x1e8] sm:$0xff]  ;;  %s18882_s11 = scalar_lea.hbm %s19104_s6, %s15436_s13 }
 0x1be   : > { %14981 = vst [vmem:[%s18630_s18 + $0x80] sm:$0xff] %v14917_v37  ;;  %14982 = vst [vmem:[%s18630_s18 + $0x88] sm:$0xff] %v14918_v9  ;;  %16764 = vmatprep.mubr.msk.f32.mxu0 %vm17044_vm0, %v17043_v0  ;;  %16769 = vmatprep.mubr.msk.f32.mxu1 %vm17044_vm0, %v17043_v0 }
 0x1bf   : > { %v6748_v1 = vpop.f32.mrb[82].mxu0  ;;  %v6821_v6 = vpop.f32.mrb[82].mxu1  ;;  %16772 = vmatprep.subr.mxu0 %v17043_v0  ;;  %16777 = vmatprep.subr.mxu1 %v17043_v0 }
 0x1c0   : > { %v14919_v31 = vadd.f32 %v6748_v1, %v18253_v60  ;;  %v14920_v40 = vadd.f32 %v6821_v6, %v18255_v7  ;;  %v16236_v37 = vpop.f32.mrb[83].mxu0  ;;  %v16241_v9 = vpop.f32.mrb[83].mxu1  ;;  %16765 = vmatmul.mubr.msk.f32.vlgmr.msra.gmra.mrb[188].mxu0 %vm628_vm1, %v16906_v5  ;;  %16770 = vmatmul.mubr.msk.f32.vlgmr.msra.gmra.mrb[188].mxu1 %vm628_vm1, %v16907_v48 }
 0x1c1   : > { %16773 = vmatpush3.msra.mxu0 %v10099_v50  ;;  %16778 = vmatpush3.msra.mxu1 %v10100_v12  ;;  %v16908_v12 = vld [vmem:[%s17228_s28 + $0x1f0] sm:$0xff] }
 0x1c2   : > { %14983 = vst [vmem:[%s18630_s18 + $0x90] sm:$0xff] %v14919_v31  ;;  %14984 = vst [vmem:[%s18630_s18 + $0x98] sm:$0xff] %v14920_v40  ;;  %16774 = vmatprep.mubr.msk.f32.mxu0 %vm17044_vm0, %v17043_v0  ;;  %16779 = vmatprep.mubr.msk.f32.mxu1 %vm17044_vm0, %v17043_v0  ;;  %v16909_v31 = vld [vmem:[%s17228_s28 + $0x1f8] sm:$0xff]  ;;  %s17045_s28 = smov [#allocation6]  }
 0x1c3   : > { %v6894_v1 = vpop.f32.mrb[84].mxu0  ;;  %v6967_v6 = vpop.f32.mrb[84].mxu1  ;;  %s16944_s7 = sshll.u32 %s17045_s28, 4  ;;  %s16945_s7 = int_to_ptr.vmem [resolvable:$false] %s16944_s7 }
 0x1c4   : > { %v14921_v37 = vadd.f32 %v6894_v1, %v18269_v24  ;;  %v14922_v9 = vadd.f32 %v6967_v6, %v18271_v54  ;;  %v16246_v50 = vpop.f32.mrb[85].mxu0  ;;  %v16251_v5 = vpop.f32.mrb[85].mxu1  ;;  %16775 = vmatmul.mubr.msk.f32.vlgmr.msra.gmra.mrb[190].mxu0 %vm628_vm1, %v16908_v12  ;;  %16780 = vmatmul.mubr.msk.f32.vlgmr.msra.gmra.mrb[190].mxu1 %vm628_vm1, %v16909_v31  ;;  %s16946_s12 = scalar_lea.vmem %s16945_s7, 16384  ;;  %p16947_p10 = scmp.lt.s32.totalorder %s18890_s14, %s16945_s7 }
 0x1c5   : > { %p16948_p0 = scmp.lt.s32.totalorder %s16946_s12, %s16940_s26 }
 0x1c6   : > { %14985 = vst [vmem:[%s18630_s18 + $0xa0] sm:$0xff] %v14921_v37  ;;  %14986 = vst [vmem:[%s18630_s18 + $0xa8] sm:$0xff] %v14922_v9 }
 0x1c7   : > { %v7040_v0 = vpop.f32.mrb[86].mxu0  ;;  %v7113_v40 = vpop.f32.mrb[86].mxu1  ;;  %p16949_p2 = por %p16948_p0, %p16947_p10 }
 0x1c8   : > { %v14923_v48 = vadd.f32 %v7040_v0, %v18285_v44  ;;  %v14924_v1 = vadd.f32 %v7113_v40, %v18287_v13  ;;  %v16256_v6 = vpop.f32.mrb[87].mxu0  ;;  %v16261_v54 = vpop.f32.mrb[87].mxu1 }
 0x1c9   : > { %p16950_p4 = pnand %p16949_p2, %p16943_p8 }
 0x1ca   : > { %14987 = vst [vmem:[%s18630_s18 + $0xb0] sm:$0xff] %v14923_v48  ;;  %14988 = vst [vmem:[%s18630_s18 + $0xb8] sm:$0xff] %v14924_v1 }
 0x1cb   : > { %v7186_v50 = vpop.f32.mrb[88].mxu0  ;;  %v7259_v5 = vpop.f32.mrb[88].mxu1 }
 0x1cc   : > { %v14925_v12 = vadd.f32 %v7186_v50, %v18301_v49  ;;  %v14926_v37 = vadd.f32 %v7259_v5, %v18303_v14  ;;  %v16266_v9 = vpop.f32.mrb[89].mxu0  ;;  %v16271_v31 = vpop.f32.mrb[89].mxu1 }
 0x1ce   : > { %14989 = vst [vmem:[%s18630_s18 + $0xc0] sm:$0xff] %v14925_v12  ;;  %14990 = vst [vmem:[%s18630_s18 + $0xc8] sm:$0xff] %v14926_v37 }
 0x1cf   : > { %v7332_v0 = vpop.f32.mrb[90].mxu0  ;;  %v7405_v40 = vpop.f32.mrb[90].mxu1 }
 0x1d0   : > { %v14927_v54 = vadd.f32 %v7332_v0, %v18317_v18  ;;  %v14928_v48 = vadd.f32 %v7405_v40, %v18319_v62  ;;  %v16276_v1 = vpop.f32.mrb[91].mxu0  ;;  %v16281_v6 = vpop.f32.mrb[91].mxu1 }
 0x1d2   : > { %14991 = vst [vmem:[%s18630_s18 + $0xd0] sm:$0xff] %v14927_v54  ;;  %14992 = vst [vmem:[%s18630_s18 + $0xd8] sm:$0xff] %v14928_v48 }
 0x1d3   : > { %v7478_v50 = vpop.f32.mrb[92].mxu0  ;;  %v7551_v5 = vpop.f32.mrb[92].mxu1 }
 0x1d4   : > { %v14929_v9 = vadd.f32 %v7478_v50, %v18333_v58  ;;  %v14930_v12 = vadd.f32 %v7551_v5, %v18335_v61  ;;  %v16286_v37 = vpop.f32.mrb[93].mxu0  ;;  %v16291_v31 = vpop.f32.mrb[93].mxu1 }
 0x1d6   : > { %14993 = vst [vmem:[%s18630_s18 + $0xe0] sm:$0xff] %v14929_v9  ;;  %14994 = vst [vmem:[%s18630_s18 + $0xe8] sm:$0xff] %v14930_v12 }
 0x1d7   : > { %v7624_v0 = vpop.f32.mrb[94].mxu0  ;;  %v7697_v40 = vpop.f32.mrb[94].mxu1 }
 0x1d8   : > { %v14931_v1 = vadd.f32 %v7624_v0, %v18349_v55  ;;  %v14932_v54 = vadd.f32 %v7697_v40, %v18351_v11  ;;  %v16296_v48 = vpop.f32.mrb[95].mxu0  ;;  %v16301_v6 = vpop.f32.mrb[95].mxu1 }
 0x1da   : > { %14995 = vst [vmem:[%s18630_s18 + $0xf0] sm:$0xff] %v14931_v1  ;;  %14996 = vst [vmem:[%s18630_s18 + $0xf8] sm:$0xff] %v14932_v54 }
 0x1db   : > { %v7770_v50 = vpop.f32.mrb[96].mxu0  ;;  %v7843_v5 = vpop.f32.mrb[96].mxu1 }
 0x1dc   : > { %v14933_v37 = vadd.f32 %v7770_v50, %v18365_v38  ;;  %v14934_v9 = vadd.f32 %v7843_v5, %v18367_v36  ;;  %v16306_v12 = vpop.f32.mrb[97].mxu0  ;;  %v16311_v31 = vpop.f32.mrb[97].mxu1 }
 0x1de   : > { %14997 = vst [vmem:[%s18630_s18 + $0x100] sm:$0xff] %v14933_v37  ;;  %14998 = vst [vmem:[%s18630_s18 + $0x108] sm:$0xff] %v14934_v9 }
 0x1df   : > { %v7916_v0 = vpop.f32.mrb[98].mxu0  ;;  %v7989_v40 = vpop.f32.mrb[98].mxu1 }
 0x1e0   : > { %v14935_v48 = vadd.f32 %v7916_v0, %v18381_v59  ;;  %v14936_v1 = vadd.f32 %v7989_v40, %v18383_v2  ;;  %v16316_v54 = vpop.f32.mrb[99].mxu0  ;;  %v16321_v6 = vpop.f32.mrb[99].mxu1 }
 0x1e2   : > { %14999 = vst [vmem:[%s18630_s18 + $0x110] sm:$0xff] %v14935_v48  ;;  %15000 = vst [vmem:[%s18630_s18 + $0x118] sm:$0xff] %v14936_v1 }
 0x1e3   : > { %v8062_v50 = vpop.f32.mrb[100].mxu0  ;;  %v8135_v5 = vpop.f32.mrb[100].mxu1 }
 0x1e4   : > { %v14937_v12 = vadd.f32 %v8062_v50, %v18397_v23  ;;  %v14938_v37 = vadd.f32 %v8135_v5, %v18399_v30  ;;  %v16326_v9 = vpop.f32.mrb[101].mxu0  ;;  %v16331_v31 = vpop.f32.mrb[101].mxu1 }
 0x1e6   : > { %15001 = vst [vmem:[%s18630_s18 + $0x120] sm:$0xff] %v14937_v12  ;;  %15002 = vst [vmem:[%s18630_s18 + $0x128] sm:$0xff] %v14938_v37 }
 0x1e7   : > { %v8208_v0 = vpop.f32.mrb[102].mxu0  ;;  %v8281_v40 = vpop.f32.mrb[102].mxu1 }
 0x1e8   : > { %v14939_v54 = vadd.f32 %v8208_v0, %v18413_v45  ;;  %v14940_v48 = vadd.f32 %v8281_v40, %v18415_v25  ;;  %v16336_v1 = vpop.f32.mrb[103].mxu0  ;;  %v16341_v6 = vpop.f32.mrb[103].mxu1 }
 0x1ea   : > { %15003 = vst [vmem:[%s18630_s18 + $0x130] sm:$0xff] %v14939_v54  ;;  %15004 = vst [vmem:[%s18630_s18 + $0x138] sm:$0xff] %v14940_v48 }
 0x1eb   : > { %v8354_v50 = vpop.f32.mrb[104].mxu0  ;;  %v8427_v5 = vpop.f32.mrb[104].mxu1 }
 0x1ec   : > { %v14941_v9 = vadd.f32 %v8354_v50, %v18429_v33  ;;  %v14942_v12 = vadd.f32 %v8427_v5, %v18431_v56  ;;  %v16346_v37 = vpop.f32.mrb[105].mxu0  ;;  %v16351_v31 = vpop.f32.mrb[105].mxu1 }
 0x1ee   : > { %15005 = vst [vmem:[%s18630_s18 + $0x140] sm:$0xff] %v14941_v9  ;;  %15006 = vst [vmem:[%s18630_s18 + $0x148] sm:$0xff] %v14942_v12 }
 0x1ef   : > { %v8500_v0 = vpop.f32.mrb[106].mxu0  ;;  %v8573_v40 = vpop.f32.mrb[106].mxu1 }
 0x1f0   : > { %v14943_v1 = vadd.f32 %v8500_v0, %v18445_v3  ;;  %v14944_v54 = vadd.f32 %v8573_v40, %v18447_v29  ;;  %v16356_v48 = vpop.f32.mrb[107].mxu0  ;;  %v16361_v6 = vpop.f32.mrb[107].mxu1 }
 0x1f2   : > { %15007 = vst [vmem:[%s18630_s18 + $0x150] sm:$0xff] %v14943_v1  ;;  %15008 = vst [vmem:[%s18630_s18 + $0x158] sm:$0xff] %v14944_v54 }
 0x1f3   : > { %v8646_v50 = vpop.f32.mrb[108].mxu0  ;;  %v8719_v5 = vpop.f32.mrb[108].mxu1 }
 0x1f4   : > { %v14945_v37 = vadd.f32 %v8646_v50, %v18461_v42  ;;  %v14946_v9 = vadd.f32 %v8719_v5, %v18463_v32  ;;  %v16366_v12 = vpop.f32.mrb[109].mxu0  ;;  %v16371_v31 = vpop.f32.mrb[109].mxu1 }
 0x1f6   : > { %15009 = vst [vmem:[%s18630_s18 + $0x160] sm:$0xff] %v14945_v37  ;;  %15010 = vst [vmem:[%s18630_s18 + $0x168] sm:$0xff] %v14946_v9 }
 0x1f7   : > { %v8792_v0 = vpop.f32.mrb[110].mxu0  ;;  %v8865_v40 = vpop.f32.mrb[110].mxu1 }
 0x1f8   : > { %v14947_v48 = vadd.f32 %v8792_v0, %v18477_v43  ;;  %v14948_v1 = vadd.f32 %v8865_v40, %v18479_v17  ;;  %v16376_v54 = vpop.f32.mrb[111].mxu0  ;;  %v16381_v6 = vpop.f32.mrb[111].mxu1 }
 0x1fa   : > { %15011 = vst [vmem:[%s18630_s18 + $0x170] sm:$0xff] %v14947_v48  ;;  %15012 = vst [vmem:[%s18630_s18 + $0x178] sm:$0xff] %v14948_v1 }
 0x1fb   : > { %v8938_v50 = vpop.f32.mrb[112].mxu0  ;;  %v9011_v5 = vpop.f32.mrb[112].mxu1 }
 0x1fc   : > { %v14949_v12 = vadd.f32 %v8938_v50, %v18493_v19  ;;  %v14950_v37 = vadd.f32 %v9011_v5, %v18495_v28  ;;  %v16386_v9 = vpop.f32.mrb[113].mxu0  ;;  %v16391_v31 = vpop.f32.mrb[113].mxu1 }
 0x1fe   : > { %15013 = vst [vmem:[%s18630_s18 + $0x180] sm:$0xff] %v14949_v12  ;;  %15014 = vst [vmem:[%s18630_s18 + $0x188] sm:$0xff] %v14950_v37  ;;  %v19155_v12 = vld [vmem:[#allocation16_spill] sm:$0xff] }
 0x1ff   : > { %v9084_v0 = vpop.f32.mrb[114].mxu0  ;;  %v9157_v40 = vpop.f32.mrb[114].mxu1 }
 0x200   : > { %v14951_v54 = vadd.f32 %v9084_v0, %v18509_v63  ;;  %v14952_v48 = vadd.f32 %v9157_v40, %v18511_v34  ;;  %v16396_v1 = vpop.f32.mrb[115].mxu0  ;;  %v16401_v6 = vpop.f32.mrb[115].mxu1 }
 0x201   : > { %v19156_v1 = vld [vmem:[#allocation17_spill] sm:$0xff] }
 0x202   : > { %15015 = vst [vmem:[%s18630_s18 + $0x190] sm:$0xff] %v14951_v54  ;;  %15016 = vst [vmem:[%s18630_s18 + $0x198] sm:$0xff] %v14952_v48  ;;  %v19157_v54 = vld [vmem:[#allocation18_spill] sm:$0xff] }
 0x203   : > { %v9230_v50 = vpop.f32.mrb[116].mxu0  ;;  %v9303_v5 = vpop.f32.mrb[116].mxu1 }
 0x204   : > { %v14953_v9 = vadd.f32 %v9230_v50, %v18525_v22  ;;  %v14954_v31 = vadd.f32 %v9303_v5, %v19155_v12  ;;  %v16406_v37 = vpop.f32.mrb[117].mxu0  ;;  %v16411_v28 = vpop.f32.mrb[117].mxu1 }
 0x205   : > { %v19158_v37 = vld [vmem:[#allocation19_spill] sm:$0xff] }
 0x206   : > { %15017 = vst [vmem:[%s18630_s18 + $0x1a0] sm:$0xff] %v14953_v9  ;;  %15018 = vst [vmem:[%s18630_s18 + $0x1a8] sm:$0xff] %v14954_v31  ;;  %v19159_v9 = vld [vmem:[#allocation20_spill] sm:$0xff] }
 0x207   : > { %v9376_v0 = vpop.f32.mrb[118].mxu0  ;;  %v9449_v40 = vpop.f32.mrb[118].mxu1 }
 0x208   : > { %v14955_v6 = vadd.f32 %v9376_v0, %v19156_v1  ;;  %v14956_v34 = vadd.f32 %v9449_v40, %v19157_v54  ;;  %v16416_v48 = vpop.f32.mrb[119].mxu0  ;;  %v16421_v63 = vpop.f32.mrb[119].mxu1 }
 0x209   : > { %v19160_v48 = vld [vmem:[#allocation21_spill] sm:$0xff] }
 0x20a   : > { %15019 = vst [vmem:[%s18630_s18 + $0x1b0] sm:$0xff] %v14955_v6  ;;  %15020 = vst [vmem:[%s18630_s18 + $0x1b8] sm:$0xff] %v14956_v34  ;;  %v19161_v6 = vld [vmem:[#allocation22_spill] sm:$0xff] }
 0x20b   : > { %v9522_v50 = vpop.f32.mrb[120].mxu0  ;;  %v9595_v5 = vpop.f32.mrb[120].mxu1 }
 0x20c   : > { %v14957_v28 = vadd.f32 %v9522_v50, %v19158_v37  ;;  %v14958_v12 = vadd.f32 %v9595_v5, %v19159_v9  ;;  %v16426_v31 = vpop.f32.mrb[121].mxu0  ;;  %v16431_v22 = vpop.f32.mrb[121].mxu1 }
 0x20d   : > { %v19162_v22 = vld [vmem:[#allocation23_spill] sm:$0xff]  ;;  %v19163_v31 = vld [vmem:[#allocation24_spill] sm:$0xff] }
 0x20e   : > { %15021 = vst [vmem:[%s18630_s18 + $0x1c0] sm:$0xff] %v14957_v28  ;;  %15022 = vst [vmem:[%s18630_s18 + $0x1c8] sm:$0xff] %v14958_v12 }
 0x20f   : > { %v9668_v0 = vpop.f32.mrb[122].mxu0  ;;  %v9741_v40 = vpop.f32.mrb[122].mxu1 }
 0x210   : > { %v14959_v63 = vadd.f32 %v9668_v0, %v19160_v48  ;;  %v14960_v54 = vadd.f32 %v9741_v40, %v19161_v6  ;;  %v16436_v34 = vpop.f32.mrb[123].mxu0  ;;  %v16441_v1 = vpop.f32.mrb[123].mxu1 }
 0x211   : > { %v19164_v1 = vld [vmem:[#allocation25_spill] sm:$0xff] }
 0x212   : > { %15023 = vst [vmem:[%s18630_s18 + $0x1d0] sm:$0xff] %v14959_v63  ;;  %15024 = vst [vmem:[%s18630_s18 + $0x1d8] sm:$0xff] %v14960_v54  ;;  %v19165_v54 = vld [vmem:[#allocation26_spill] sm:$0xff] }
 0x213   : > { %v9814_v50 = vpop.f32.mrb[124].mxu0  ;;  %v9887_v5 = vpop.f32.mrb[124].mxu1 }
 0x214   : > { %v14961_v28 = vadd.f32 %v9814_v50, %v19162_v22  ;;  %v14962_v12 = vadd.f32 %v9887_v5, %v19163_v31  ;;  %v16446_v9 = vpop.f32.mrb[125].mxu0  ;;  %v16451_v37 = vpop.f32.mrb[125].mxu1 }
 0x216   : > { %15025 = vst [vmem:[%s18630_s18 + $0x1e0] sm:$0xff] %v14961_v28  ;;  %15026 = vst [vmem:[%s18630_s18 + $0x1e8] sm:$0xff] %v14962_v12 }
 0x217   : > { %v9960_v0 = vpop.f32.mrb[126].mxu0  ;;  %v10033_v40 = vpop.f32.mrb[126].mxu1 }
 0x218   : > { %v14963_v63 = vadd.f32 %v9960_v0, %v19164_v1  ;;  %v14964_v34 = vadd.f32 %v10033_v40, %v19165_v54  ;;  %v16456_v6 = vpop.f32.mrb[127].mxu0  ;;  %v16461_v48 = vpop.f32.mrb[127].mxu1 }
 0x21a   : > { %15027 = vst [vmem:[%s18630_s18 + $0x1f0] sm:$0xff] %v14963_v63  ;;  %15028 = vst [vmem:[%s18630_s18 + $0x1f8] sm:$0xff] %v14964_v34 }
 0x21b   : > { %v10170_v50 = vpop.f32.mrb[128].mxu0  ;;  %v10243_v9 = vpop.f32.mrb[128].mxu1 }
 0x21c   : > { %v14773_v37 = vsub.f32 %v18109_v15, %v10170_v50  ;;  %v14774_v5 = vsub.f32 %v18111_v21, %v10243_v9  ;;  %v16466_v28 = vpop.f32.mrb[129].mxu0  ;;  %v16471_v12 = vpop.f32.mrb[129].mxu1 }
 0x21e   : > { %14837 = vst [vmem:[%s18886_s15] sm:$0xff] %v14773_v37  ;;  %14838 = vst [vmem:[%s18886_s15 + $0x8] sm:$0xff] %v14774_v5 }
 0x21f   : > { %v10316_v15 = vpop.f32.mrb[130].mxu0  ;;  %v10389_v21 = vpop.f32.mrb[130].mxu1 }
 0x220   : > { %16953 = shalt.err (!%p16950_p4)
}
 0x221   : > { %s16954_s16 = scalar_lea.hbm %s18882_s11, 8192  ;;  %s16958_s19 = scalar_lea.hbm %s19104_s6, 16384 }
 0x222   : > { %p16955_p5 = scmp.ne.s32.totalorder %s18882_s11, %s16954_s16  ;;  %p16959_p1 = scmp.lt.u32.totalorder %s18882_s11, %s19104_s6 }
 0x223   : > { %p16960_p3 = scmp.lt.u32.totalorder %s16958_s19, %s16954_s16  ;;  %p16962_p6 = scmp.lt.u32.totalorder %s16954_s16, %s18882_s11 }
 0x224   : > { %p16956_p7 = pnand %p16955_p5, %p19166_p12 }
 0x225   : > { %p16961_p11 = por %p16960_p3, %p16959_p1 }
 0x226   : > { %p16957_p9 = pneg %p16956_p7 }
 0x227   : > { %p16963_p13 = por %p16962_p6, %p16961_p11 }
 0x229   : > { %p16964_p8 = pnand %p16963_p13, %p16957_p9 }
 0x22b   : > { %16967 = shalt.err (!%p16964_p8)
}
 0x22c   : > { %s17046_s26 = smov 128   ;;  %s17047_s7 = smov 8   ;;  %v14775_v48 = vsub.f32 %v18125_v46, %v10316_v15  ;;  %v14776_v6 = vsub.f32 %v18127_v52, %v10389_v21  ;;  %v16476_v0 = vpop.f32.mrb[131].mxu0  ;;  %v16481_v40 = vpop.f32.mrb[131].mxu1 }
 0x22d   : > { %16785 = dma.vmem_to_hbm [thread:$0]  (%p19166_p12), %s18890_s14, 8192, %s18882_s11, %s15035_s17, %s17046_s26, %s17046_s26, %s17047_s7   ;;  %v10462_v63 = vpop.f32.mrb[132].mxu0  ;;  %v10535_v34 = vpop.f32.mrb[132].mxu1 }
 0x22e   : > { %14839 = vst [vmem:[%s18886_s15 + $0x10] sm:$0xff] %v14775_v48  ;;  %14840 = vst [vmem:[%s18886_s15 + $0x18] sm:$0xff] %v14776_v6  ;;  %v14777_v50 = vsub.f32 %v18141_v53, %v10462_v63  ;;  %v14778_v9 = vsub.f32 %v18143_v27, %v10535_v34  ;;  %v16486_v37 = vpop.f32.mrb[133].mxu0  ;;  %v16491_v5 = vpop.f32.mrb[133].mxu1  ;;  %s15048_s11 = sshll.u32 %s18886_s15, 4  ;;  %s19047_s12 = scalar_lea.hbm %s19103_s5, %s15436_s13  ;;  %s19049_s11 = int_to_ptr.vmem [resolvable:$true] %s15048_s11 }
 0x22f   : > { %v10608_v46 = vpop.f32.mrb[134].mxu0  ;;  %v10681_v52 = vpop.f32.mrb[134].mxu1  ;;  %s15030_s16 = scalar_lea.sflag [#allocation4], %s17188_s29  ;;  %s16968_s8 = scalar_lea.vmem %s19049_s11, 8192 }
 0x230   : > { %14841 = vst [vmem:[%s18886_s15 + $0x20] sm:$0xff] %v14777_v50  ;;  %14842 = vst [vmem:[%s18886_s15 + $0x28] sm:$0xff] %v14778_v9  ;;  %v14779_v28 = vsub.f32 %v18157_v35, %v10608_v46  ;;  %v14780_v12 = vsub.f32 %v18159_v41, %v10681_v52  ;;  %v16496_v15 = vpop.f32.mrb[135].mxu0  ;;  %v16501_v21 = vpop.f32.mrb[135].mxu1  ;;  %p16969_p10 = scmp.ne.s32.totalorder %s19049_s11, %s16968_s8  ;;  %s17048_s18 = smov [#allocation5]  }
 0x231   : > { %v10754_v53 = vpop.f32.mrb[136].mxu0  ;;  %v10827_v27 = vpop.f32.mrb[136].mxu1  ;;  %s16972_s25 = sshll.u32 %s17048_s18, 4  ;;  %s16973_s25 = int_to_ptr.vmem [resolvable:$false] %s16972_s25 }
 0x232   : > { %14843 = vst [vmem:[%s18886_s15 + $0x30] sm:$0xff] %v14779_v28  ;;  %14844 = vst [vmem:[%s18886_s15 + $0x38] sm:$0xff] %v14780_v12  ;;  %v14781_v48 = vsub.f32 %v18173_v51, %v10754_v53  ;;  %v14782_v6 = vsub.f32 %v18175_v57, %v10827_v27  ;;  %v16506_v0 = vpop.f32.mrb[137].mxu0  ;;  %v16511_v40 = vpop.f32.mrb[137].mxu1  ;;  %p16970_p0 = pnand %p16969_p10, %p19166_p12  ;;  %s16974_s19 = scalar_lea.vmem %s16973_s25, 16384 }
 0x233   : > { %v10900_v35 = vpop.f32.mrb[138].mxu0  ;;  %v10973_v41 = vpop.f32.mrb[138].mxu1  ;;  %p16975_p4 = scmp.lt.s32.totalorder %s19049_s11, %s16973_s25  ;;  %p16976_p5 = scmp.lt.s32.totalorder %s16974_s19, %s16968_s8 }
 0x234   : > { %14845 = vst [vmem:[%s18886_s15 + $0x40] sm:$0xff] %v14781_v48  ;;  %14846 = vst [vmem:[%s18886_s15 + $0x48] sm:$0xff] %v14782_v6  ;;  %v14783_v63 = vsub.f32 %v18189_v4, %v10900_v35  ;;  %v14784_v34 = vsub.f32 %v18191_v10, %v10973_v41  ;;  %v16516_v50 = vpop.f32.mrb[139].mxu0  ;;  %v16521_v9 = vpop.f32.mrb[139].mxu1  ;;  %p16971_p2 = pneg %p16970_p0 }
 0x235   : > { %v11046_v51 = vpop.f32.mrb[140].mxu0  ;;  %v11119_v57 = vpop.f32.mrb[140].mxu1  ;;  %p16977_p7 = por %p16976_p5, %p16975_p4 }
 0x236   : > { %14847 = vst [vmem:[%s18886_s15 + $0x50] sm:$0xff] %v14783_v63  ;;  %14848 = vst [vmem:[%s18886_s15 + $0x58] sm:$0xff] %v14784_v34  ;;  %v14785_v37 = vsub.f32 %v18205_v20, %v11046_v51  ;;  %v14786_v5 = vsub.f32 %v18207_v26, %v11119_v57  ;;  %v16526_v46 = vpop.f32.mrb[141].mxu0  ;;  %v16531_v52 = vpop.f32.mrb[141].mxu1  ;;  %v19167_v34 = vld [vmem:[#allocation11_spill] sm:$0xff] }
 0x237   : > { %v11192_v4 = vpop.f32.mrb[142].mxu0  ;;  %v11265_v10 = vpop.f32.mrb[142].mxu1  ;;  %p16978_p9 = pnand %p16977_p7, %p16971_p2 }
 0x238   : > { %14849 = vst [vmem:[%s18886_s15 + $0x60] sm:$0xff] %v14785_v37  ;;  %14850 = vst [vmem:[%s18886_s15 + $0x68] sm:$0xff] %v14786_v5  ;;  %v14787_v28 = vsub.f32 %v18221_v39, %v11192_v4  ;;  %v14788_v12 = vsub.f32 %v18223_v47, %v11265_v10  ;;  %v16536_v15 = vpop.f32.mrb[143].mxu0  ;;  %v16541_v21 = vpop.f32.mrb[143].mxu1 }
 0x23a   : > { %14851 = vst [vmem:[%s18886_s15 + $0x70] sm:$0xff] %v14787_v28  ;;  %14852 = vst [vmem:[%s18886_s15 + $0x78] sm:$0xff] %v14788_v12 }
 0x23b   : > { %v11338_v20 = vpop.f32.mrb[144].mxu0  ;;  %v11411_v26 = vpop.f32.mrb[144].mxu1 }
 0x23c   : > { %v14789_v53 = vsub.f32 %v18237_v8, %v11338_v20  ;;  %v14790_v27 = vsub.f32 %v18239_v16, %v11411_v26  ;;  %v16546_v48 = vpop.f32.mrb[145].mxu0  ;;  %v16551_v6 = vpop.f32.mrb[145].mxu1 }
 0x23e   : > { %14853 = vst [vmem:[%s18886_s15 + $0x80] sm:$0xff] %v14789_v53  ;;  %14854 = vst [vmem:[%s18886_s15 + $0x88] sm:$0xff] %v14790_v27 }
 0x23f   : > { %v11484_v39 = vpop.f32.mrb[146].mxu0  ;;  %v11557_v47 = vpop.f32.mrb[146].mxu1 }
 0x240   : > { %v14791_v0 = vsub.f32 %v18253_v60, %v11484_v39  ;;  %v14792_v40 = vsub.f32 %v18255_v7, %v11557_v47  ;;  %v16556_v35 = vpop.f32.mrb[147].mxu0  ;;  %v16561_v41 = vpop.f32.mrb[147].mxu1 }
 0x242   : > { %14855 = vst [vmem:[%s18886_s15 + $0x90] sm:$0xff] %v14791_v0  ;;  %14856 = vst [vmem:[%s18886_s15 + $0x98] sm:$0xff] %v14792_v40 }
 0x243   : > { %v11630_v8 = vpop.f32.mrb[148].mxu0  ;;  %v11703_v16 = vpop.f32.mrb[148].mxu1 }
 0x244   : > { %v14793_v63 = vsub.f32 %v18269_v24, %v11630_v8  ;;  %v14794_v50 = vsub.f32 %v19167_v34, %v11703_v16  ;;  %v16566_v9 = vpop.f32.mrb[149].mxu0  ;;  %v16571_v51 = vpop.f32.mrb[149].mxu1 }
 0x246   : > { %14857 = vst [vmem:[%s18886_s15 + $0xa0] sm:$0xff] %v14793_v63  ;;  %14858 = vst [vmem:[%s18886_s15 + $0xa8] sm:$0xff] %v14794_v50 }
 0x247   : > { %v11776_v60 = vpop.f32.mrb[150].mxu0  ;;  %v11849_v7 = vpop.f32.mrb[150].mxu1 }
 0x248   : > { %v14795_v57 = vsub.f32 %v18285_v44, %v11776_v60  ;;  %v14796_v37 = vsub.f32 %v18287_v13, %v11849_v7  ;;  %v16576_v5 = vpop.f32.mrb[151].mxu0  ;;  %v16581_v46 = vpop.f32.mrb[151].mxu1 }
 0x24a   : > { %14859 = vst [vmem:[%s18886_s15 + $0xb0] sm:$0xff] %v14795_v57  ;;  %14860 = vst [vmem:[%s18886_s15 + $0xb8] sm:$0xff] %v14796_v37 }
 0x24b   : > { %v11922_v24 = vpop.f32.mrb[152].mxu0  ;;  %v11995_v52 = vpop.f32.mrb[152].mxu1 }
 0x24c   : > { %v14797_v4 = vsub.f32 %v18301_v49, %v11922_v24  ;;  %v14798_v10 = vsub.f32 %v18303_v14, %v11995_v52  ;;  %v16586_v28 = vpop.f32.mrb[153].mxu0  ;;  %v16591_v12 = vpop.f32.mrb[153].mxu1 }
 0x24e   : > { %14861 = vst [vmem:[%s18886_s15 + $0xc0] sm:$0xff] %v14797_v4  ;;  %14862 = vst [vmem:[%s18886_s15 + $0xc8] sm:$0xff] %v14798_v10 }
 0x24f   : > { %v12068_v44 = vpop.f32.mrb[154].mxu0  ;;  %v12141_v13 = vpop.f32.mrb[154].mxu1 }
 0x250   : > { %v14799_v15 = vsub.f32 %v18317_v18, %v12068_v44  ;;  %v14800_v21 = vsub.f32 %v18319_v62, %v12141_v13  ;;  %v16596_v20 = vpop.f32.mrb[155].mxu0  ;;  %v16601_v26 = vpop.f32.mrb[155].mxu1 }
 0x252   : > { %14863 = vst [vmem:[%s18886_s15 + $0xd0] sm:$0xff] %v14799_v15  ;;  %14864 = vst [vmem:[%s18886_s15 + $0xd8] sm:$0xff] %v14800_v21 }
 0x253   : > { %v12214_v49 = vpop.f32.mrb[156].mxu0  ;;  %v12287_v14 = vpop.f32.mrb[156].mxu1 }
 0x254   : > { %v14801_v53 = vsub.f32 %v18333_v58, %v12214_v49  ;;  %v14802_v27 = vsub.f32 %v18335_v61, %v12287_v14  ;;  %v16606_v48 = vpop.f32.mrb[157].mxu0  ;;  %v16611_v6 = vpop.f32.mrb[157].mxu1 }
 0x256   : > { %14865 = vst [vmem:[%s18886_s15 + $0xe0] sm:$0xff] %v14801_v53  ;;  %14866 = vst [vmem:[%s18886_s15 + $0xe8] sm:$0xff] %v14802_v27 }
 0x257   : > { %v12360_v18 = vpop.f32.mrb[158].mxu0  ;;  %v12433_v62 = vpop.f32.mrb[158].mxu1 }
 0x258   : > { %v14803_v39 = vsub.f32 %v18349_v55, %v12360_v18  ;;  %v14804_v47 = vsub.f32 %v18351_v11, %v12433_v62  ;;  %v16616_v0 = vpop.f32.mrb[159].mxu0  ;;  %v16621_v40 = vpop.f32.mrb[159].mxu1  ;;  %v19168_v18 = vld [vmem:[#allocation12_spill] sm:$0xff] }
 0x259   : > { %v19169_v0 = vld [vmem:[#allocation13_spill] sm:$0xff] }
 0x25a   : > { %14867 = vst [vmem:[%s18886_s15 + $0xf0] sm:$0xff] %v14803_v39  ;;  %14868 = vst [vmem:[%s18886_s15 + $0xf8] sm:$0xff] %v14804_v47 }
 0x25b   : > { %v12506_v58 = vpop.f32.mrb[160].mxu0  ;;  %v12579_v61 = vpop.f32.mrb[160].mxu1 }
 0x25c   : > { %v14805_v35 = vsub.f32 %v18365_v38, %v12506_v58  ;;  %v14806_v41 = vsub.f32 %v18367_v36, %v12579_v61  ;;  %v16626_v8 = vpop.f32.mrb[161].mxu0  ;;  %v16631_v16 = vpop.f32.mrb[161].mxu1  ;;  %v19170_v58 = vld [vmem:[#allocation14_spill] sm:$0xff] }
 0x25d   : > { %v19171_v16 = vld [vmem:[#allocation15_spill] sm:$0xff] }
 0x25e   : > { %14869 = vst [vmem:[%s18886_s15 + $0x100] sm:$0xff] %v14805_v35  ;;  %14870 = vst [vmem:[%s18886_s15 + $0x108] sm:$0xff] %v14806_v41 }
 0x25f   : > { %v12652_v55 = vpop.f32.mrb[162].mxu0  ;;  %v12725_v11 = vpop.f32.mrb[162].mxu1 }
 0x260   : > { %v14807_v63 = vsub.f32 %v18381_v59, %v12652_v55  ;;  %v14808_v34 = vsub.f32 %v18383_v2, %v12725_v11  ;;  %v16636_v50 = vpop.f32.mrb[163].mxu0  ;;  %v16641_v9 = vpop.f32.mrb[163].mxu1  ;;  %v19172_v11 = vld [vmem:[#allocation16_spill] sm:$0xff] }
 0x262   : > { %14871 = vst [vmem:[%s18886_s15 + $0x110] sm:$0xff] %v14807_v63  ;;  %14872 = vst [vmem:[%s18886_s15 + $0x118] sm:$0xff] %v14808_v34 }
 0x263   : > { %v12798_v38 = vpop.f32.mrb[164].mxu0  ;;  %v12871_v36 = vpop.f32.mrb[164].mxu1 }
 0x264   : > { %v14809_v51 = vsub.f32 %v18397_v23, %v12798_v38  ;;  %v14810_v60 = vsub.f32 %v18399_v30, %v12871_v36  ;;  %v16646_v7 = vpop.f32.mrb[165].mxu0  ;;  %v16651_v57 = vpop.f32.mrb[165].mxu1  ;;  %v19173_v36 = vld [vmem:[#allocation17_spill] sm:$0xff] }
 0x266   : > { %14873 = vst [vmem:[%s18886_s15 + $0x120] sm:$0xff] %v14809_v51  ;;  %14874 = vst [vmem:[%s18886_s15 + $0x128] sm:$0xff] %v14810_v60  ;;  %v19174_v60 = vld [vmem:[#allocation18_spill] sm:$0xff] }
 0x267   : > { %v12944_v59 = vpop.f32.mrb[166].mxu0  ;;  %v13017_v2 = vpop.f32.mrb[166].mxu1 }
 0x268   : > { %v14811_v37 = vsub.f32 %v18413_v45, %v12944_v59  ;;  %v14812_v5 = vsub.f32 %v18415_v25, %v13017_v2  ;;  %v16656_v46 = vpop.f32.mrb[167].mxu0  ;;  %v16661_v24 = vpop.f32.mrb[167].mxu1 }
 0x269   : > { %v19176_v24 = vld [vmem:[#allocation20_spill] sm:$0xff] }
 0x26a   : > { %14875 = vst [vmem:[%s18886_s15 + $0x130] sm:$0xff] %v14811_v37  ;;  %14876 = vst [vmem:[%s18886_s15 + $0x138] sm:$0xff] %v14812_v5  ;;  %v19175_v5 = vld [vmem:[#allocation19_spill] sm:$0xff] }
 0x26b   : > { %v13090_v23 = vpop.f32.mrb[168].mxu0  ;;  %v13163_v30 = vpop.f32.mrb[168].mxu1 }
 0x26c   : > { %v14813_v52 = vsub.f32 %v18429_v33, %v13090_v23  ;;  %v14814_v4 = vsub.f32 %v18431_v56, %v13163_v30  ;;  %v16666_v10 = vpop.f32.mrb[169].mxu0  ;;  %v16671_v28 = vpop.f32.mrb[169].mxu1 }
 0x26d   : > { %v19177_v28 = vld [vmem:[#allocation21_spill] sm:$0xff] }
 0x26e   : > { %14877 = vst [vmem:[%s18886_s15 + $0x140] sm:$0xff] %v14813_v52  ;;  %14878 = vst [vmem:[%s18886_s15 + $0x148] sm:$0xff] %v14814_v4 }
 0x26f   : > { %v13236_v45 = vpop.f32.mrb[170].mxu0  ;;  %v13309_v25 = vpop.f32.mrb[170].mxu1 }
 0x270   : > { %v14815_v12 = vsub.f32 %v18445_v3, %v13236_v45  ;;  %v14816_v44 = vsub.f32 %v18447_v29, %v13309_v25  ;;  %v16676_v13 = vpop.f32.mrb[171].mxu0  ;;  %v16681_v15 = vpop.f32.mrb[171].mxu1  ;;  %v19178_v25 = vld [vmem:[#allocation22_spill] sm:$0xff] }
 0x272   : > { %14879 = vst [vmem:[%s18886_s15 + $0x150] sm:$0xff] %v14815_v12  ;;  %14880 = vst [vmem:[%s18886_s15 + $0x158] sm:$0xff] %v14816_v44 }
 0x273   : > { %v13382_v33 = vpop.f32.mrb[172].mxu0  ;;  %v13455_v56 = vpop.f32.mrb[172].mxu1 }
 0x274   : > { %v14817_v21 = vsub.f32 %v18461_v42, %v13382_v33  ;;  %v14818_v20 = vsub.f32 %v18463_v32, %v13455_v56  ;;  %v16686_v26 = vpop.f32.mrb[173].mxu0  ;;  %v16691_v49 = vpop.f32.mrb[173].mxu1 }
 0x276   : > { %14881 = vst [vmem:[%s18886_s15 + $0x160] sm:$0xff] %v14817_v21  ;;  %14882 = vst [vmem:[%s18886_s15 + $0x168] sm:$0xff] %v14818_v20 }
 0x277   : > { %v13528_v3 = vpop.f32.mrb[174].mxu0  ;;  %v13601_v29 = vpop.f32.mrb[174].mxu1 }
 0x278   : > { %v14819_v14 = vsub.f32 %v18477_v43, %v13528_v3  ;;  %v14820_v53 = vsub.f32 %v18479_v17, %v13601_v29  ;;  %v16696_v27 = vpop.f32.mrb[175].mxu0  ;;  %v16701_v48 = vpop.f32.mrb[175].mxu1 }
 0x27a   : > { %14883 = vst [vmem:[%s18886_s15 + $0x170] sm:$0xff] %v14819_v14  ;;  %14884 = vst [vmem:[%s18886_s15 + $0x178] sm:$0xff] %v14820_v53 }
 0x27b   : > { %v13674_v42 = vpop.f32.mrb[176].mxu0  ;;  %v13747_v32 = vpop.f32.mrb[176].mxu1 }
 0x27c   : > { %v14821_v6 = vsub.f32 %v18493_v19, %v13674_v42  ;;  %v14822_v62 = vsub.f32 %v19168_v18, %v13747_v32  ;;  %v16706_v39 = vpop.f32.mrb[177].mxu0  ;;  %v16711_v47 = vpop.f32.mrb[177].mxu1 }
 0x27e   : > { %14885 = vst [vmem:[%s18886_s15 + $0x180] sm:$0xff] %v14821_v6  ;;  %14886 = vst [vmem:[%s18886_s15 + $0x188] sm:$0xff] %v14822_v62 }
 0x27f   : > { %v13820_v43 = vpop.f32.mrb[178].mxu0  ;;  %v13893_v17 = vpop.f32.mrb[178].mxu1 }
 0x280   : > { %v14823_v40 = vsub.f32 %v19169_v0, %v13820_v43  ;;  %v14824_v61 = vsub.f32 %v19170_v58, %v13893_v17  ;;  %v16716_v35 = vpop.f32.mrb[179].mxu0  ;;  %v16721_v41 = vpop.f32.mrb[179].mxu1 }
 0x282   : > { %14887 = vst [vmem:[%s18886_s15 + $0x190] sm:$0xff] %v14823_v40  ;;  %14888 = vst [vmem:[%s18886_s15 + $0x198] sm:$0xff] %v14824_v61 }
 0x283   : > { %v13966_v19 = vpop.f32.mrb[180].mxu0  ;;  %v14039_v8 = vpop.f32.mrb[180].mxu1 }
 0x284   : > { %v14825_v55 = vsub.f32 %v19171_v16, %v13966_v19  ;;  %v14826_v63 = vsub.f32 %v19172_v11, %v14039_v8  ;;  %v16726_v34 = vpop.f32.mrb[181].mxu0  ;;  %v16731_v50 = vpop.f32.mrb[181].mxu1 }
 0x286   : > { %14889 = vst [vmem:[%s18886_s15 + $0x1a0] sm:$0xff] %v14825_v55  ;;  %14890 = vst [vmem:[%s18886_s15 + $0x1a8] sm:$0xff] %v14826_v63 }
 0x287   : > { %v14112_v9 = vpop.f32.mrb[182].mxu0  ;;  %v14185_v38 = vpop.f32.mrb[182].mxu1 }
 0x288   : > { %v14827_v51 = vsub.f32 %v19173_v36, %v14112_v9  ;;  %v14828_v7 = vsub.f32 %v19174_v60, %v14185_v38  ;;  %v16736_v57 = vpop.f32.mrb[183].mxu0  ;;  %v16741_v59 = vpop.f32.mrb[183].mxu1 }
 0x28a   : > { %14891 = vst [vmem:[%s18886_s15 + $0x1b0] sm:$0xff] %v14827_v51  ;;  %14892 = vst [vmem:[%s18886_s15 + $0x1b8] sm:$0xff] %v14828_v7 }
 0x28b   : > { %v14258_v2 = vpop.f32.mrb[184].mxu0  ;;  %v14331_v37 = vpop.f32.mrb[184].mxu1 }
 0x28c   : > { %v14829_v46 = vsub.f32 %v19175_v5, %v14258_v2  ;;  %v14830_v23 = vsub.f32 %v19176_v24, %v14331_v37  ;;  %v16746_v30 = vpop.f32.mrb[185].mxu0  ;;  %v16751_v52 = vpop.f32.mrb[185].mxu1 }
 0x28e   : > { %14893 = vst [vmem:[%s18886_s15 + $0x1c0] sm:$0xff] %v14829_v46  ;;  %14894 = vst [vmem:[%s18886_s15 + $0x1c8] sm:$0xff] %v14830_v23 }
 0x28f   : > { %v14404_v4 = vpop.f32.mrb[186].mxu0  ;;  %v14477_v10 = vpop.f32.mrb[186].mxu1 }
 0x290   : > { %v14831_v45 = vsub.f32 %v19177_v28, %v14404_v4  ;;  %v14832_v12 = vsub.f32 %v19178_v25, %v14477_v10  ;;  %v16756_v44 = vpop.f32.mrb[187].mxu0  ;;  %v16761_v13 = vpop.f32.mrb[187].mxu1 }
 0x292   : > { %14895 = vst [vmem:[%s18886_s15 + $0x1d0] sm:$0xff] %v14831_v45  ;;  %14896 = vst [vmem:[%s18886_s15 + $0x1d8] sm:$0xff] %v14832_v12 }
 0x293   : > { %v14550_v15 = vpop.f32.mrb[188].mxu0  ;;  %v14623_v33 = vpop.f32.mrb[188].mxu1 }
 0x294   : > { %v14833_v56 = vsub.f32 %v19162_v22, %v14550_v15  ;;  %v14834_v21 = vsub.f32 %v19163_v31, %v14623_v33  ;;  %v16766_v20 = vpop.f32.mrb[189].mxu0  ;;  %v16771_v26 = vpop.f32.mrb[189].mxu1 }
 0x296   : > { %14897 = vst [vmem:[%s18886_s15 + $0x1e0] sm:$0xff] %v14833_v56  ;;  %14898 = vst [vmem:[%s18886_s15 + $0x1e8] sm:$0xff] %v14834_v21 }
 0x297   : > { %v14696_v49 = vpop.f32.mrb[190].mxu0  ;;  %v14769_v3 = vpop.f32.mrb[190].mxu1 }
 0x298   : > { %v14835_v29 = vsub.f32 %v19164_v1, %v14696_v49  ;;  %v14836_v14 = vsub.f32 %v19165_v54, %v14769_v3  ;;  %v16776_v53 = vpop.f32.mrb[191].mxu0  ;;  %v16781_v27 = vpop.f32.mrb[191].mxu1 }
 0x29a   : > { %14899 = vst [vmem:[%s18886_s15 + $0x1f0] sm:$0xff] %v14835_v29  ;;  %14900 = vst [vmem:[%s18886_s15 + $0x1f8] sm:$0xff] %v14836_v14 }
 0x29b   : > { %16981 = shalt.err (!%p16978_p9)
}
 0x29c   : > { %s16982_s13 = scalar_lea.hbm %s19047_s12, 8192  ;;  %s16986_s28 = scalar_lea.hbm %s19103_s5, 16384 }
 0x29d   : > { %p16983_p1 = scmp.ne.s32.totalorder %s19047_s12, %s16982_s13  ;;  %p16987_p6 = scmp.lt.u32.totalorder %s19047_s12, %s19103_s5 }
 0x29e   : > { %p16988_p13 = scmp.lt.u32.totalorder %s16986_s28, %s16982_s13  ;;  %p16990_p10 = scmp.lt.u32.totalorder %s16982_s13, %s19047_s12 }
 0x29f   : > { %p16984_p3 = pnand %p16983_p1, %p19166_p12 }
 0x2a0   : > { %p16989_p8 = por %p16988_p13, %p16987_p6 }
 0x2a1   : > { %p16985_p11 = pneg %p16984_p3 }
 0x2a2   : > { %p16991_p0 = por %p16990_p10, %p16989_p8 }
 0x2a4   : > { %p16992_p2 = pnand %p16991_p0, %p16985_p11 }
 0x2a6   : > { %16995 = shalt.err (!%p16992_p2)
}
 0x2a7   : > { %16784 = dma.vmem_to_hbm [thread:$0]  (%p19166_p12), %s19049_s11, 8192, %s19047_s12, %s15030_s16, %s17046_s26, %s17046_s26, %s17047_s7  }
 0x2a8 PF: > { %s15079_s8 = sand.u32 1, %s17026_s21   ;;  %p19179_p4 = scmp.ne.s32.totalorder %s19129_s10, 0 }
 0x2a9   : > { %p19180_p5 = scmp.ge.s32.totalorder %s17038_s24, 2  ;;  %s15080_s18 = scalar_lea.sflag [#allocation4], %s15079_s8 }
 0x2ab   : > { %p16793_p7 = pnand %p19180_p5, %p19179_p4 }
 0x2ad   : > { %17017 = dma.done.wait (!%p16793_p7), %s15080_s18, 8192  }
 0x2ae   : > { %17019 = vsyncadd (!%p16793_p7), %s15080_s18, 4294959104  ;;  %s15089_s9 = scalar_lea.sflag [#allocation7], %s15079_s8 }
 0x2af   : > { %17021 = dma.done.wait (!%p16793_p7), %s15089_s9, 8192  }
 0x2b0   : > { %17023 = vsyncadd (!%p16793_p7), %s15089_s9, 4294959104  ;;  %p23_p12 = scmp.ge.s32.totalorder %s17109_s27, 4   ;;  %s19181_s21 = smov %s17030_s22 }
 0x2b1   : > { %s19182_s22 = smov %s17034_s23  ;;  %s19183_s23 = smov %s17121_s30 }
 0x2b2   : > { %s19184_s24 = smov %s17109_s27  ;;  %25 = sbr.rel (!%p23_p12) target bundleno = 7 (0x7), region = 114 }
 0x2b9   :  { %15094 = vsyncpa [#allocation3], 1 }
 0x2ba   :  { %15096 = vsyncpa [#allocation3 + $0x1], 1 }
 0x2bb   :  { %15097 = vsyncpa [#allocation4], 1 }
 0x2bc   :  { %15099 = vsyncpa [#allocation4 + $0x1], 1 }
 0x2bd   :  { %15100 = vsyncpa [#allocation7], 1 }
 0x2be   :  { %15102 = vsyncpa [#allocation7 + $0x1], 1 }

</bundles_post_ra>
